<compile_context>
chip_gen: v5e
topology: v5e:2x2
jax: 0.10.0
libtpu: 0.0.40
codegen_flags: <defaults>
</compile_context>

<pallas_src>
import functools

import numpy as np
import jax
import jax.numpy as jnp
from jax.experimental import pallas as pl
from jax.experimental.pallas import tpu as pltpu

_PAD = 128      # zero flank (lanes) on each side of the tap scratch; must be >= Wo_max + 1
_CINP = 8       # per-tap channel (K) padding -> full 8-sublane f32 tiles
_TAPS = tuple((dy, dx) for dy in (-1, 0, 1) for dx in (-1, 0, 1))   # im2col tap order


# ------------------------------ fused decoder kernel ------------------------------

def _build_decoder_kernel(block_meta):
    """block_meta: tuple of dicts with static ints: cin, cout, n_dec, Wo, HoWo."""
    n_blocks = len(block_meta)
    n_in = 1 + 6 * n_blocks

    def kernel(*refs):
        x_ref = refs[0]
        blk_in = refs[1:n_in]
        blk_out = refs[n_in:n_in + 2 * n_blocks]
        scr = refs[n_in + 2 * n_blocks]              # (9*_CINP, 2*_PAD + HoWo_max) f32 VMEM

        z = x_ref[0]                                 # pooled-resolution activation, f32
        for i, m in enumerate(block_meta):
            rep_ref, mask_ref, upw_ref, upb_ref, dw_ref, db_ref = blk_in[6 * i:6 * i + 6]
            up_ref, dec_ref = blk_out[2 * i], blk_out[2 * i + 1]
            Wo, HoWo = m['Wo'], m['HoWo']

            # ---- MaxUnpool2d(2,2): MXU 2x2 nearest-neighbour replication + argmax mask ----
            rep = jnp.dot(z.astype(jnp.bfloat16), rep_ref[...],
                          preferred_element_type=jnp.float32)         # (cin, HoWo) = z[c, src(q)]
            u = rep * mask_ref[0]                                     # zero except the argmax slot
            up_ref[0] = u                                             # UpSampleBlock's up_layer

            # Horizontal-wrap column masks, hoisted once per block (not per tap / per conv).
            col = jax.lax.broadcasted_iota(jnp.int32, (1, HoWo), 1) % Wo
            m_l = jnp.where(col != 0, 1.0, 0.0)        # zero source col 0     (feeds dx=+1 taps)
            m_r = jnp.where(col != Wo - 1, 1.0, 0.0)   # zero source col Wo-1  (feeds dx=-1 taps)

            # Re-zero the tap scratch for THIS block: the zero flanks provide the top/bottom
            # conv halo and blocks have different Wo/HoWo footprints.  Runs every block of
            # every grid step on purpose (see header note about "parallel" + scratch init).
            scr[...] = jnp.zeros(scr.shape, scr.dtype)

            # ---- up-conv + (1 + mid_layers) dec convs: 9 shifted stores + ONE MXU matmul ----
            convs = [(upw_ref[...], upb_ref[...])]
            for l in range(m['n_dec']):
                convs.append((dw_ref[l], db_ref[l]))

            a = u                                                     # (cin, HoWo) f32
            for w2d, shift in convs:
                cina = a.shape[0]
                a_l = a * m_l
                a_r = a * m_r
                for t, (dy, dx) in enumerate(_TAPS):
                    src = a_r if dx == -1 else (a_l if dx == 1 else a)
                    off = dy * Wo + dx
                    scr[pl.ds(t * _CINP, cina), pl.ds(_PAD - off, HoWo)] = src
                patches = scr[:, pl.ds(_PAD, HoWo)].astype(jnp.bfloat16)   # (9*_CINP, HoWo)
                y = jnp.dot(w2d, patches, preferred_element_type=jnp.float32) + shift
                a = jnp.maximum(y, 0.0)                               # folded-BN shift + ReLU
            dec_ref[0] = a
            z = a                                                     # next block's pooled input

    return kernel


# ------------------------------ wrapper-side constants ------------------------------

def _make_rep(h, w):
    """(h*w, 4*h*w) 0/1 matrix: Rep[p, q] = 1 iff pooled pixel p is the 2x2 NN source of
    flat position q of the row-major (2h, 2w) unpooled plane."""
    wo = 2 * w
    q = np.arange(4 * h * w)
    src = (q // wo // 2) * w + (q % wo) // 2
    rep = np.zeros((h * w, 4 * h * w), np.float32)
    rep[src, q] = 1.0
    return jnp.asarray(rep, dtype=jnp.bfloat16)


def _unpool_mask(idx_nchw):
    """0/1 mask on the unpooled plane: 1 where MaxPool stored its argmax.  Relies on PyTorch
    MaxPool2d(2,2,return_indices=True) semantics (index lies inside its own 2x2 window)."""
    N, C, h, w = idx_nchw.shape
    howo = 4 * h * w
    idx_rep = jnp.repeat(jnp.repeat(idx_nchw.astype(jnp.int32), 2, axis=2), 2, axis=3)
    q = jnp.arange(howo, dtype=jnp.int32)
    return (idx_rep.reshape(N, C, howo) == q).astype(jnp.float32)


def _fold_im2col(w_hwio, scale, cin_pad=_CINP):
    """(cout, 9*cin_pad) bf16 weights with BN scale folded; column index = tap*cin_pad + ci,
    tap order t = 3*(dy+1) + (dx+1) (matches _TAPS)."""
    _, _, cin, cout = w_hwio.shape
    wt = jnp.transpose(w_hwio, (3, 0, 1, 2)) * scale[:, None, None, None]   # (cout,3,3,cin)
    wt = wt.reshape(cout, 9, cin)
    wt = jnp.pad(wt, ((0, 0), (0, 0), (0, cin_pad - cin)))
    return wt.reshape(cout, 9 * cin_pad).astype(jnp.bfloat16)


# ------------------------------ pallas_call driver ------------------------------

def decoder_pallas(x, down_indices, params):
    """x: (N, C0, H0, W0) f32 NCHW.  Returns ([up_i], [dec_i]) NCHW f32 arrays."""
    N, C0, H0, W0 = x.shape

    inputs = [x.astype(jnp.float32).reshape(N, C0, H0 * W0)]
    in_specs = [pl.BlockSpec((1, C0, H0 * W0), lambda n: (n, 0, 0))]
    out_shapes, out_specs, block_meta, chans = [], [], [], []

    h, w, cin = H0, W0, C0
    for i, blk in enumerate(params):
        wo, howo = 2 * w, 4 * h * w
        cout, L = blk['up_b'].shape[0], blk['dec_w2d'].shape[0]
        idx = down_indices[-(i + 1)]
        assert idx.shape == (N, cin, h, w)

        inputs += [_make_rep(h, w), _unpool_mask(idx),
                   blk['up_w2d'], blk['up_b'], blk['dec_w2d'], blk['dec_b']]
        in_specs += [
            pl.BlockSpec((h * w, howo), lambda n: (0, 0)),             # Rep (batch-shared)
            pl.BlockSpec((1, cin, howo), lambda n: (n, 0, 0)),         # unpool argmax mask
            pl.BlockSpec((cout, 9 * _CINP), lambda n: (0, 0)),         # up-conv weights (bf16)
            pl.BlockSpec((cout, 1), lambda n: (0, 0)),                 # up-conv BN shift
            pl.BlockSpec((L, cout, 9 * _CINP), lambda n: (0, 0, 0)),   # dec-conv weights (bf16)
            pl.BlockSpec((L, cout, 1), lambda n: (0, 0, 0)),           # dec BN shifts
        ]
        out_shapes += [jax.ShapeDtypeStruct((N, cin, howo), jnp.float32),
                       jax.ShapeDtypeStruct((N, cout, howo), jnp.float32)]
        out_specs += [pl.BlockSpec((1, cin, howo), lambda n: (n, 0, 0)),
                      pl.BlockSpec((1, cout, howo), lambda n: (n, 0, 0))]
        block_meta.append(dict(cin=cin, cout=cout, n_dec=L, Wo=wo, HoWo=howo))
        chans.append((cin, cout))
        h, w, cin = 2 * h, 2 * w, cout

    howo_max = max(m['HoWo'] for m in block_meta)
    assert max(m['Wo'] for m in block_meta) + 1 <= _PAD

    outs = pl.pallas_call(
        _build_decoder_kernel(tuple(block_meta)),
        out_shape=tuple(out_shapes),
        grid=(N,),
        in_specs=in_specs,
        out_specs=tuple(out_specs),
        scratch_shapes=[pltpu.VMEM((9 * _CINP, 2 * _PAD + howo_max), jnp.float32)],
        compiler_params=pltpu.CompilerParams(dimension_semantics=("parallel",)),
    )(*inputs)

    up_layer, dec_layer = [], []
    h, w = H0, W0
    for i, (ci, co) in enumerate(chans):
        up_layer.append(outs[2 * i].reshape(N, ci, 2 * h, 2 * w))
        dec_layer.append(outs[2 * i + 1].reshape(N, co, 2 * h, 2 * w))
        h, w = 2 * h, 2 * w
    return up_layer, dec_layer


# ------------------------------ pure-JAX reference ------------------------------

def _conv_bn_relu_ref(x, p):
    y = jax.lax.conv_general_dilated(
        x, p['w_hwio'], (1, 1), 'SAME',
        dimension_numbers=('NCHW', 'HWIO', 'NCHW'),
        precision=jax.lax.Precision.HIGHEST)
    y = y * p['scale'].reshape(1, -1, 1, 1) + p['shift'].reshape(1, -1, 1, 1)
    return jnp.maximum(y, 0.0)


def _max_unpool2x2_ref(x, idx):
    N, C, H, W = x.shape
    out = jnp.zeros((N, C, 4 * H * W), x.dtype)
    n_i = jnp.arange(N)[:, None, None]
    c_i = jnp.arange(C)[None, :, None]
    out = out.at[n_i, c_i, idx.reshape(N, C, H * W)].set(x.reshape(N, C, H * W))
    return out.reshape(N, C, 2 * H, 2 * W)


# ------------------------------ params & forward ------------------------------

def make_convlayer_params(key, cin, cout):
    k1, k2, k3, k4, k5 = jax.random.split(key, 5)
    w_hwio = jax.random.normal(k1, (3, 3, cin, cout), jnp.float32) / (3.0 * float(np.sqrt(cin)))
    gamma = 1.0 + 0.1 * jax.random.normal(k2, (cout,), jnp.float32)
    beta = 0.1 * jax.random.normal(k3, (cout,), jnp.float32)
    mean = 0.1 * jax.random.normal(k4, (cout,), jnp.float32)
    var = jnp.abs(jax.random.normal(k5, (cout,), jnp.float32)) + 0.5
    eps = 1e-5
    scale = gamma / jnp.sqrt(var + eps)
    shift = beta - mean * scale
    return {'w_hwio': w_hwio, 'scale': scale, 'shift': shift,
            'w2d': _fold_im2col(w_hwio, scale), 'b': shift.reshape(cout, 1)}


def make_decoder_params(key, filt, mid_layers):
    params = []
    chans = list(zip(filt[:-1], filt[1:])) + [(filt[-1], filt[-1])]
    for (cin, cout) in chans:
        key, ku = jax.random.split(key)
        up = make_convlayer_params(ku, cin, cout)
        dec = []
        for _ in range(1 + mid_layers):
            key, kd = jax.random.split(key)
            dec.append(make_convlayer_params(kd, cout, cout))
        params.append({
            'up': up, 'dec': dec,
            'up_w2d': up['w2d'], 'up_b': up['b'],
            'dec_w2d': jnp.stack([p['w2d'] for p in dec]),
            'dec_b': jnp.stack([p['b'] for p in dec]),
        })
    return params


@functools.partial(jax.jit, static_argnames=("use_pallas",))
def decoder_sh_forward(x_nchw, down_indices_nchw, params, use_pallas=True):
    """Mirrors DecoderSH.forward; accepts / returns NCHW (up_layer, dec_layer) lists."""
    if use_pallas:
        return decoder_pallas(x_nchw, down_indices_nchw, params)
    up_layer, dec_layer = [], []
    logits = x_nchw.astype(jnp.float32)
    for i, blk in enumerate(params):
        idx = down_indices_nchw[-(i + 1)].astype(jnp.int32)
        up = _max_unpool2x2_ref(logits, idx)                 # UpSampleBlock.unpool
        logits = _conv_bn_relu_ref(up, blk['up'])            # UpSampleBlock.conv_layer
        for p in blk['dec']:                                 # dec_blocks[i] (Sequential)
            logits = _conv_bn_relu_ref(logits, p)
        up_layer.append(up)
        dec_layer.append(logits)
    return up_layer, dec_layer


def make_maxpool_indices(key, N, C, H, W):
    """Indices consistent with MaxPool2d(2,2,return_indices=True): each index points inside
    its own 2x2 block of the (2H, 2W) unpooled plane (flat index over that plane)."""
    ka, kb = jax.random.split(key)
    a = jax.random.randint(ka, (N, C, H, W), 0, 2)
    b = jax.random.randint(kb, (N, C, H, W), 0, 2)
    h = jnp.arange(H)[None, None, :, None]
    w = jnp.arange(W)[None, None, None, :]
    return ((2 * h + a) * (2 * W) + (2 * w + b)).astype(jnp.int32)


def _check_unpool_indices(idx):
    """Host-side guard for the MaxPool2d(2,2) window semantics the kernel relies on."""
    idx = np.asarray(idx)
    _, _, h, w = idx.shape
    y, x = np.meshgrid(np.arange(h), np.arange(w), indexing='ij')
    r, c = idx // (2 * w), idx % (2 * w)
    assert ((r // 2 == y) & (c // 2 == x)).all(), \
        "MaxUnpool indices must follow MaxPool2d(2,2,return_indices=True) semantics"


# ------------------------------ main ------------------------------

if __name__ == "__main__":
    filt = [8, 4]          # DecoderSH(filter=[8, 4], mid_layers=1)
    mid_layers = 1
    N, H0, W0 = 2, 8, 8

    root = jax.random.PRNGKey(0)
    kp, kx, ki0, ki1 = jax.random.split(root, 4)

    params = make_decoder_params(kp, filt, mid_layers)
    x = jax.random.normal(kx, (N, filt[0], H0, W0), jnp.float32)          # NCHW

    # down_indices[-(i+1)] must match logits' shape at step i.
    idx_step0 = make_maxpool_indices(ki0, N, filt[0], H0, W0)             # (2, 8,  8,  8)
    idx_step1 = make_maxpool_indices(ki1, N, filt[1], 2 * H0, 2 * W0)     # (2, 4, 16, 16)
    down_indices = [idx_step1, idx_step0]
    _check_unpool_indices(idx_step0)
    _check_unpool_indices(idx_step1)

    up_k, dec_k = decoder_sh_forward(x, down_indices, params, use_pallas=True)
    jax.block_until_ready(up_k)
    jax.block_until_ready(dec_k)

    up_r, dec_r = decoder_sh_forward(x, down_indices, params, use_pallas=False)
    # Tolerance bounds bf16-operand (f32-accumulated) MXU rounding over a 6-conv chain vs.
    # the f32 HIGHEST-precision reference; structural (tap/offset/unpool) bugs give O(1)
    # errors and fail far outside this band.
    for a, b in zip(up_k + dec_k, up_r + dec_r):
        np.testing.assert_allclose(np.asarray(a), np.asarray(b), atol=5e-2, rtol=5e-2)

    print("KERNEL_OK")
</pallas_src>

<mosaic_0001>
module attributes {stable_mosaic.version = 11 : i64} {
  func.func @kernel(%arg0: i32, %arg1: memref<1x8x64xf32, #tpu.memory_space<vmem>>, %arg2: memref<64x256xbf16, #tpu.memory_space<vmem>>, %arg3: memref<1x8x256xf32, #tpu.memory_space<vmem>>, %arg4: memref<4x72xbf16, #tpu.memory_space<vmem>>, %arg5: memref<4x1xf32, #tpu.memory_space<vmem>>, %arg6: memref<2x4x72xbf16, #tpu.memory_space<vmem>>, %arg7: memref<2x4x1xf32, #tpu.memory_space<vmem>>, %arg8: memref<256x1024xbf16, #tpu.memory_space<vmem>>, %arg9: memref<1x4x1024xf32, #tpu.memory_space<vmem>>, %arg10: memref<4x72xbf16, #tpu.memory_space<vmem>>, %arg11: memref<4x1xf32, #tpu.memory_space<vmem>>, %arg12: memref<2x4x72xbf16, #tpu.memory_space<vmem>>, %arg13: memref<2x4x1xf32, #tpu.memory_space<vmem>>, %arg14: memref<1x8x256xf32, #tpu.memory_space<vmem>>, %arg15: memref<1x4x256xf32, #tpu.memory_space<vmem>>, %arg16: memref<1x4x1024xf32, #tpu.memory_space<vmem>>, %arg17: memref<1x4x1024xf32, #tpu.memory_space<vmem>>, %arg18: memref<72x1280xf32, #tpu.memory_space<vmem>>) attributes {dimension_semantics = [#tpu.dimension_semantics<parallel>], iteration_bounds = array<i64: 2>, scalar_prefetch = 0 : i64, scratch_operands = 1 : i64, tpu.core_type = #tpu.core_type<tc>, window_params = [{transform_indices = @transform_0, window_bounds = array<i64: 1, 8, 64>}, {pipeline_mode = #tpu.pipeline_mode<synchronous>, transform_indices = @transform_1, window_bounds = array<i64: 64, 256>}, {transform_indices = @transform_2, window_bounds = array<i64: 1, 8, 256>}, {pipeline_mode = #tpu.pipeline_mode<synchronous>, transform_indices = @transform_3, window_bounds = array<i64: 4, 72>}, {pipeline_mode = #tpu.pipeline_mode<synchronous>, transform_indices = @transform_4, window_bounds = array<i64: 4, 1>}, {pipeline_mode = #tpu.pipeline_mode<synchronous>, transform_indices = @transform_5, window_bounds = array<i64: 2, 4, 72>}, {pipeline_mode = #tpu.pipeline_mode<synchronous>, transform_indices = @transform_6, window_bounds = array<i64: 2, 4, 1>}, {pipeline_mode = #tpu.pipeline_mode<synchronous>, transform_indices = @transform_7, window_bounds = array<i64: 256, 1024>}, {transform_indices = @transform_8, window_bounds = array<i64: 1, 4, 1024>}, {pipeline_mode = #tpu.pipeline_mode<synchronous>, transform_indices = @transform_9, window_bounds = array<i64: 4, 72>}, {pipeline_mode = #tpu.pipeline_mode<synchronous>, transform_indices = @transform_10, window_bounds = array<i64: 4, 1>}, {pipeline_mode = #tpu.pipeline_mode<synchronous>, transform_indices = @transform_11, window_bounds = array<i64: 2, 4, 72>}, {pipeline_mode = #tpu.pipeline_mode<synchronous>, transform_indices = @transform_12, window_bounds = array<i64: 2, 4, 1>}, {transform_indices = @transform_13, window_bounds = array<i64: 1, 8, 256>}, {transform_indices = @transform_14, window_bounds = array<i64: 1, 4, 256>}, {transform_indices = @transform_15, window_bounds = array<i64: 1, 4, 1024>}, {transform_indices = @transform_16, window_bounds = array<i64: 1, 4, 1024>}]} {
    %c0 = arith.constant 0 : index
    %c0_0 = arith.constant 0 : index
    %c0_1 = arith.constant 0 : index
    %0 = vector.load %arg1[%c0, %c0_0, %c0_1] : memref<1x8x64xf32, #tpu.memory_space<vmem>>, vector<1x8x64xf32>
    %1 = vector.shape_cast %0 : vector<1x8x64xf32> to vector<8x64xf32>
    %2 = arith.truncf %1 : vector<8x64xf32> to vector<8x64xbf16>
    %c0_2 = arith.constant 0 : index
    %c0_3 = arith.constant 0 : index
    %3 = vector.load %arg2[%c0_2, %c0_3] : memref<64x256xbf16, #tpu.memory_space<vmem>>, vector<64x256xbf16>
    %cst = arith.constant dense<0.000000e+00> : vector<8x256xf32>
    %4 = tpu.matmul %2, %3, %cst {dimension_numbers = #tpu.dot_dimension_numbers<[1], [0], [0], [1], [0, 0, 1, 1], [], []>} : vector<8x64xbf16>, vector<64x256xbf16>, vector<8x256xf32> -> vector<8x256xf32>
    %c0_4 = arith.constant 0 : index
    %c0_5 = arith.constant 0 : index
    %c0_6 = arith.constant 0 : index
    %5 = vector.load %arg3[%c0_4, %c0_5, %c0_6] : memref<1x8x256xf32, #tpu.memory_space<vmem>>, vector<1x8x256xf32>
    %6 = vector.shape_cast %5 : vector<1x8x256xf32> to vector<8x256xf32>
    %7 = arith.mulf %4, %6 : vector<8x256xf32>
    %c0_7 = arith.constant 0 : index
    %c0_8 = arith.constant 0 : index
    %c0_9 = arith.constant 0 : index
    %8 = vector.load %arg14[%c0_7, %c0_8, %c0_9] : memref<1x8x256xf32, #tpu.memory_space<vmem>>, vector<1x8x256xf32>
    %9 = vector.shape_cast %8 : vector<1x8x256xf32> to vector<8x256xf32>
    %10 = vector.shape_cast %7 : vector<8x256xf32> to vector<1x8x256xf32>
    tpu.vector_store %arg14[%c0_7, %c0_8, %c0_9], %10 {strides = array<i32>} : memref<1x8x256xf32, #tpu.memory_space<vmem>>, vector<1x8x256xf32>,
    %11 = tpu.iota {dimensions = array<i32: 1>} : vector<1x256xi32>
    %c16_i32 = arith.constant 16 : i32
    %c0_i32 = arith.constant 0 : i32
    %12 = arith.cmpi eq, %c16_i32, %c0_i32 : i32
    %c1_i32 = arith.constant 1 : i32
    %13 = arith.select %12, %c1_i32, %c16_i32 : i32
    %14 = vector.broadcast %13 : i32 to vector<1x256xi32>
    %15 = arith.remsi %11, %14 : vector<1x256xi32>
    %c0_i32_10 = arith.constant 0 : i32
    %16 = vector.broadcast %c0_i32_10 : i32 to vector<1x256xi32>
    %17 = arith.cmpi ne, %15, %16 : vector<1x256xi32>
    %c0_i32_11 = arith.constant 0 : i32
    %18 = vector.broadcast %c0_i32_11 : i32 to vector<1x256xi32>
    %19 = arith.cmpi slt, %15, %18 : vector<1x256xi32>
    %c0_i32_12 = arith.constant 0 : i32
    %20 = arith.cmpi slt, %13, %c0_i32_12 : i32
    %21 = vector.broadcast %20 : i1 to vector<1x256xi1>
    %22 = vector.broadcast %21 : vector<1x256xi1> to vector<1x256xi1>
    %23 = arith.xori %19, %22 : vector<1x256xi1>
    %24 = arith.andi %23, %17 : vector<1x256xi1>
    %25 = vector.broadcast %13 : i32 to vector<1x256xi32>
    %26 = arith.addi %15, %25 : vector<1x256xi32>
    %27 = arith.select %24, %26, %15 : vector<1x256xi1>, vector<1x256xi32>
    %c0_i32_13 = arith.constant 0 : i32
    %28 = vector.broadcast %c0_i32_13 : i32 to vector<1x256xi32>
    %29 = arith.cmpi ne, %27, %28 : vector<1x256xi32>
    %cst_14 = arith.constant 1.000000e+00 : f32
    %cst_15 = arith.constant 0.000000e+00 : f32
    %30 = vector.broadcast %cst_14 : f32 to vector<1x256xf32>
    %31 = vector.broadcast %cst_15 : f32 to vector<1x256xf32>
    %32 = arith.select %29, %30, %31 : vector<1x256xi1>, vector<1x256xf32>
    %c15_i32 = arith.constant 15 : i32
    %33 = vector.broadcast %c15_i32 : i32 to vector<1x256xi32>
    %34 = arith.cmpi ne, %27, %33 : vector<1x256xi32>
    %cst_16 = arith.constant 1.000000e+00 : f32
    %cst_17 = arith.constant 0.000000e+00 : f32
    %35 = vector.broadcast %cst_16 : f32 to vector<1x256xf32>
    %36 = vector.broadcast %cst_17 : f32 to vector<1x256xf32>
    %37 = arith.select %34, %35, %36 : vector<1x256xi1>, vector<1x256xf32>
    %cst_18 = arith.constant 0.000000e+00 : f32
    %38 = vector.broadcast %cst_18 : f32 to vector<72x1280xf32>
    %c0_19 = arith.constant 0 : index
    %c0_20 = arith.constant 0 : index
    %39 = vector.load %arg18[%c0_19, %c0_20] : memref<72x1280xf32, #tpu.memory_space<vmem>>, vector<72x1280xf32>
    tpu.vector_store %arg18[%c0_19, %c0_20], %38 {strides = array<i32>} : memref<72x1280xf32, #tpu.memory_space<vmem>>, vector<72x1280xf32>,
    %c0_21 = arith.constant 0 : index
    %c0_22 = arith.constant 0 : index
    %40 = vector.load %arg4[%c0_21, %c0_22] : memref<4x72xbf16, #tpu.memory_space<vmem>>, vector<4x72xbf16>
    %c0_23 = arith.constant 0 : index
    %c0_24 = arith.constant 0 : index
    %41 = vector.load %arg5[%c0_23, %c0_24] : memref<4x1xf32, #tpu.memory_space<vmem>>, vector<4x1xf32>
    %c0_25 = arith.constant 0 : index
    %c0_26 = arith.constant 0 : index
    %c0_27 = arith.constant 0 : index
    %42 = vector.load %arg6[%c0_25, %c0_26, %c0_27] : memref<2x4x72xbf16, #tpu.memory_space<vmem>>, vector<1x4x72xbf16>
    %43 = vector.shape_cast %42 : vector<1x4x72xbf16> to vector<4x72xbf16>
    %c0_28 = arith.constant 0 : index
    %c0_29 = arith.constant 0 : index
    %c0_30 = arith.constant 0 : index
    %44 = vector.load %arg7[%c0_28, %c0_29, %c0_30] : memref<2x4x1xf32, #tpu.memory_space<vmem>>, vector<1x4x1xf32>
    %45 = vector.shape_cast %44 : vector<1x4x1xf32> to vector<4x1xf32>
    %c1 = arith.constant 1 : index
    %c0_31 = arith.constant 0 : index
    %c0_32 = arith.constant 0 : index
    %46 = vector.load %arg6[%c1, %c0_31, %c0_32] : memref<2x4x72xbf16, #tpu.memory_space<vmem>>, vector<1x4x72xbf16>
    %47 = vector.shape_cast %46 : vector<1x4x72xbf16> to vector<4x72xbf16>
    %c1_33 = arith.constant 1 : index
    %c0_34 = arith.constant 0 : index
    %c0_35 = arith.constant 0 : index
    %48 = vector.load %arg7[%c1_33, %c0_34, %c0_35] : memref<2x4x1xf32, #tpu.memory_space<vmem>>, vector<1x4x1xf32>
    %49 = vector.shape_cast %48 : vector<1x4x1xf32> to vector<4x1xf32>
    %50 = vector.broadcast %32 : vector<1x256xf32> to vector<8x256xf32>
    %51 = arith.mulf %7, %50 : vector<8x256xf32>
    %52 = vector.broadcast %37 : vector<1x256xf32> to vector<8x256xf32>
    %53 = arith.mulf %7, %52 : vector<8x256xf32>
    %c0_36 = arith.constant 0 : index
    %c145 = arith.constant 145 : index
    %54 = vector.load %arg18[%c0_36, %c145] : memref<72x1280xf32, #tpu.memory_space<vmem>>, vector<8x256xf32>
    tpu.vector_store %arg18[%c0_36, %c145], %53 {strides = array<i32>} : memref<72x1280xf32, #tpu.memory_space<vmem>>, vector<8x256xf32>,
    %c8 = arith.constant 8 : index
    %c144 = arith.constant 144 : index
    %55 = vector.load %arg18[%c8, %c144] : memref<72x1280xf32, #tpu.memory_space<vmem>>, vector<8x256xf32>
    tpu.vector_store %arg18[%c8, %c144], %7 {strides = array<i32>} : memref<72x1280xf32, #tpu.memory_space<vmem>>, vector<8x256xf32>,
    %c16 = arith.constant 16 : index
    %c143 = arith.constant 143 : index
    %56 = vector.load %arg18[%c16, %c143] : memref<72x1280xf32, #tpu.memory_space<vmem>>, vector<8x256xf32>
    tpu.vector_store %arg18[%c16, %c143], %51 {strides = array<i32>} : memref<72x1280xf32, #tpu.memory_space<vmem>>, vector<8x256xf32>,
    %c24 = arith.constant 24 : index
    %c129 = arith.constant 129 : index
    %57 = vector.load %arg18[%c24, %c129] : memref<72x1280xf32, #tpu.memory_space<vmem>>, vector<8x256xf32>
    tpu.vector_store %arg18[%c24, %c129], %53 {strides = array<i32>} : memref<72x1280xf32, #tpu.memory_space<vmem>>, vector<8x256xf32>,
    %c32 = arith.constant 32 : index
    %c128 = arith.constant 128 : index
    %58 = vector.load %arg18[%c32, %c128] : memref<72x1280xf32, #tpu.memory_space<vmem>>, vector<8x256xf32>
    tpu.vector_store %arg18[%c32, %c128], %7 {strides = array<i32>} : memref<72x1280xf32, #tpu.memory_space<vmem>>, vector<8x256xf32>,
    %c40 = arith.constant 40 : index
    %c127 = arith.constant 127 : index
    %59 = vector.load %arg18[%c40, %c127] : memref<72x1280xf32, #tpu.memory_space<vmem>>, vector<8x256xf32>
    tpu.vector_store %arg18[%c40, %c127], %51 {strides = array<i32>} : memref<72x1280xf32, #tpu.memory_space<vmem>>, vector<8x256xf32>,
    %c48 = arith.constant 48 : index
    %c113 = arith.constant 113 : index
    %60 = vector.load %arg18[%c48, %c113] : memref<72x1280xf32, #tpu.memory_space<vmem>>, vector<8x256xf32>
    tpu.vector_store %arg18[%c48, %c113], %53 {strides = array<i32>} : memref<72x1280xf32, #tpu.memory_space<vmem>>, vector<8x256xf32>,
    %c56 = arith.constant 56 : index
    %c112 = arith.constant 112 : index
    %61 = vector.load %arg18[%c56, %c112] : memref<72x1280xf32, #tpu.memory_space<vmem>>, vector<8x256xf32>
    tpu.vector_store %arg18[%c56, %c112], %7 {strides = array<i32>} : memref<72x1280xf32, #tpu.memory_space<vmem>>, vector<8x256xf32>,
    %c64 = arith.constant 64 : index
    %c111 = arith.constant 111 : index
    %62 = vector.load %arg18[%c64, %c111] : memref<72x1280xf32, #tpu.memory_space<vmem>>, vector<8x256xf32>
    tpu.vector_store %arg18[%c64, %c111], %51 {strides = array<i32>} : memref<72x1280xf32, #tpu.memory_space<vmem>>, vector<8x256xf32>,
    %c0_37 = arith.constant 0 : index
    %c128_38 = arith.constant 128 : index
    %63 = vector.load %arg18[%c0_37, %c128_38] : memref<72x1280xf32, #tpu.memory_space<vmem>>, vector<72x256xf32>
    %64 = arith.truncf %63 : vector<72x256xf32> to vector<72x256xbf16>
    %cst_39 = arith.constant dense<0.000000e+00> : vector<4x256xf32>
    %65 = tpu.matmul %40, %64, %cst_39 {dimension_numbers = #tpu.dot_dimension_numbers<[1], [0], [0], [1], [0, 0, 1, 1], [], []>} : vector<4x72xbf16>, vector<72x256xbf16>, vector<4x256xf32> -> vector<4x256xf32>
    %66 = vector.broadcast %41 : vector<4x1xf32> to vector<4x256xf32>
    %67 = arith.addf %65, %66 : vector<4x256xf32>
    %cst_40 = arith.constant 0.000000e+00 : f32
    %68 = vector.broadcast %cst_40 : f32 to vector<4x256xf32>
    %69 = arith.maximumf %67, %68 : vector<4x256xf32>
    %70 = vector.broadcast %32 : vector<1x256xf32> to vector<4x256xf32>
    %71 = arith.mulf %69, %70 : vector<4x256xf32>
    %72 = vector.broadcast %37 : vector<1x256xf32> to vector<4x256xf32>
    %73 = arith.mulf %69, %72 : vector<4x256xf32>
    %c0_41 = arith.constant 0 : index
    %c145_42 = arith.constant 145 : index
    %74 = vector.load %arg18[%c0_41, %c145_42] : memref<72x1280xf32, #tpu.memory_space<vmem>>, vector<4x256xf32>
    tpu.vector_store %arg18[%c0_41, %c145_42], %73 {strides = array<i32>} : memref<72x1280xf32, #tpu.memory_space<vmem>>, vector<4x256xf32>,
    %c8_43 = arith.constant 8 : index
    %c144_44 = arith.constant 144 : index
    %75 = vector.load %arg18[%c8_43, %c144_44] : memref<72x1280xf32, #tpu.memory_space<vmem>>, vector<4x256xf32>
    tpu.vector_store %arg18[%c8_43, %c144_44], %69 {strides = array<i32>} : memref<72x1280xf32, #tpu.memory_space<vmem>>, vector<4x256xf32>,
    %c16_45 = arith.constant 16 : index
    %c143_46 = arith.constant 143 : index
    %76 = vector.load %arg18[%c16_45, %c143_46] : memref<72x1280xf32, #tpu.memory_space<vmem>>, vector<4x256xf32>
    tpu.vector_store %arg18[%c16_45, %c143_46], %71 {strides = array<i32>} : memref<72x1280xf32, #tpu.memory_space<vmem>>, vector<4x256xf32>,
    %c24_47 = arith.constant 24 : index
    %c129_48 = arith.constant 129 : index
    %77 = vector.load %arg18[%c24_47, %c129_48] : memref<72x1280xf32, #tpu.memory_space<vmem>>, vector<4x256xf32>
    tpu.vector_store %arg18[%c24_47, %c129_48], %73 {strides = array<i32>} : memref<72x1280xf32, #tpu.memory_space<vmem>>, vector<4x256xf32>,
    %c32_49 = arith.constant 32 : index
    %c128_50 = arith.constant 128 : index
    %78 = vector.load %arg18[%c32_49, %c128_50] : memref<72x1280xf32, #tpu.memory_space<vmem>>, vector<4x256xf32>
    tpu.vector_store %arg18[%c32_49, %c128_50], %69 {strides = array<i32>} : memref<72x1280xf32, #tpu.memory_space<vmem>>, vector<4x256xf32>,
    %c40_51 = arith.constant 40 : index
    %c127_52 = arith.constant 127 : index
    %79 = vector.load %arg18[%c40_51, %c127_52] : memref<72x1280xf32, #tpu.memory_space<vmem>>, vector<4x256xf32>
    tpu.vector_store %arg18[%c40_51, %c127_52], %71 {strides = array<i32>} : memref<72x1280xf32, #tpu.memory_space<vmem>>, vector<4x256xf32>,
    %c48_53 = arith.constant 48 : index
    %c113_54 = arith.constant 113 : index
    %80 = vector.load %arg18[%c48_53, %c113_54] : memref<72x1280xf32, #tpu.memory_space<vmem>>, vector<4x256xf32>
    tpu.vector_store %arg18[%c48_53, %c113_54], %73 {strides = array<i32>} : memref<72x1280xf32, #tpu.memory_space<vmem>>, vector<4x256xf32>,
    %c56_55 = arith.constant 56 : index
    %c112_56 = arith.constant 112 : index
    %81 = vector.load %arg18[%c56_55, %c112_56] : memref<72x1280xf32, #tpu.memory_space<vmem>>, vector<4x256xf32>
    tpu.vector_store %arg18[%c56_55, %c112_56], %69 {strides = array<i32>} : memref<72x1280xf32, #tpu.memory_space<vmem>>, vector<4x256xf32>,
    %c64_57 = arith.constant 64 : index
    %c111_58 = arith.constant 111 : index
    %82 = vector.load %arg18[%c64_57, %c111_58] : memref<72x1280xf32, #tpu.memory_space<vmem>>, vector<4x256xf32>
    tpu.vector_store %arg18[%c64_57, %c111_58], %71 {strides = array<i32>} : memref<72x1280xf32, #tpu.memory_space<vmem>>, vector<4x256xf32>,
    %c0_59 = arith.constant 0 : index
    %c128_60 = arith.constant 128 : index
    %83 = vector.load %arg18[%c0_59, %c128_60] : memref<72x1280xf32, #tpu.memory_space<vmem>>, vector<72x256xf32>
    %84 = arith.truncf %83 : vector<72x256xf32> to vector<72x256xbf16>
    %cst_61 = arith.constant dense<0.000000e+00> : vector<4x256xf32>
    %85 = tpu.matmul %43, %84, %cst_61 {dimension_numbers = #tpu.dot_dimension_numbers<[1], [0], [0], [1], [0, 0, 1, 1], [], []>} : vector<4x72xbf16>, vector<72x256xbf16>, vector<4x256xf32> -> vector<4x256xf32>
    %86 = vector.broadcast %45 : vector<4x1xf32> to vector<4x256xf32>
    %87 = arith.addf %85, %86 : vector<4x256xf32>
    %cst_62 = arith.constant 0.000000e+00 : f32
    %88 = vector.broadcast %cst_62 : f32 to vector<4x256xf32>
    %89 = arith.maximumf %87, %88 : vector<4x256xf32>
    %90 = vector.broadcast %32 : vector<1x256xf32> to vector<4x256xf32>
    %91 = arith.mulf %89, %90 : vector<4x256xf32>
    %92 = vector.broadcast %37 : vector<1x256xf32> to vector<4x256xf32>
    %93 = arith.mulf %89, %92 : vector<4x256xf32>
    %c0_63 = arith.constant 0 : index
    %c145_64 = arith.constant 145 : index
    %94 = vector.load %arg18[%c0_63, %c145_64] : memref<72x1280xf32, #tpu.memory_space<vmem>>, vector<4x256xf32>
    tpu.vector_store %arg18[%c0_63, %c145_64], %93 {strides = array<i32>} : memref<72x1280xf32, #tpu.memory_space<vmem>>, vector<4x256xf32>,
    %c8_65 = arith.constant 8 : index
    %c144_66 = arith.constant 144 : index
    %95 = vector.load %arg18[%c8_65, %c144_66] : memref<72x1280xf32, #tpu.memory_space<vmem>>, vector<4x256xf32>
    tpu.vector_store %arg18[%c8_65, %c144_66], %89 {strides = array<i32>} : memref<72x1280xf32, #tpu.memory_space<vmem>>, vector<4x256xf32>,
    %c16_67 = arith.constant 16 : index
    %c143_68 = arith.constant 143 : index
    %96 = vector.load %arg18[%c16_67, %c143_68] : memref<72x1280xf32, #tpu.memory_space<vmem>>, vector<4x256xf32>
    tpu.vector_store %arg18[%c16_67, %c143_68], %91 {strides = array<i32>} : memref<72x1280xf32, #tpu.memory_space<vmem>>, vector<4x256xf32>,
    %c24_69 = arith.constant 24 : index
    %c129_70 = arith.constant 129 : index
    %97 = vector.load %arg18[%c24_69, %c129_70] : memref<72x1280xf32, #tpu.memory_space<vmem>>, vector<4x256xf32>
    tpu.vector_store %arg18[%c24_69, %c129_70], %93 {strides = array<i32>} : memref<72x1280xf32, #tpu.memory_space<vmem>>, vector<4x256xf32>,
    %c32_71 = arith.constant 32 : index
    %c128_72 = arith.constant 128 : index
    %98 = vector.load %arg18[%c32_71, %c128_72] : memref<72x1280xf32, #tpu.memory_space<vmem>>, vector<4x256xf32>
    tpu.vector_store %arg18[%c32_71, %c128_72], %89 {strides = array<i32>} : memref<72x1280xf32, #tpu.memory_space<vmem>>, vector<4x256xf32>,
    %c40_73 = arith.constant 40 : index
    %c127_74 = arith.constant 127 : index
    %99 = vector.load %arg18[%c40_73, %c127_74] : memref<72x1280xf32, #tpu.memory_space<vmem>>, vector<4x256xf32>
    tpu.vector_store %arg18[%c40_73, %c127_74], %91 {strides = array<i32>} : memref<72x1280xf32, #tpu.memory_space<vmem>>, vector<4x256xf32>,
    %c48_75 = arith.constant 48 : index
    %c113_76 = arith.constant 113 : index
    %100 = vector.load %arg18[%c48_75, %c113_76] : memref<72x1280xf32, #tpu.memory_space<vmem>>, vector<4x256xf32>
    tpu.vector_store %arg18[%c48_75, %c113_76], %93 {strides = array<i32>} : memref<72x1280xf32, #tpu.memory_space<vmem>>, vector<4x256xf32>,
    %c56_77 = arith.constant 56 : index
    %c112_78 = arith.constant 112 : index
    %101 = vector.load %arg18[%c56_77, %c112_78] : memref<72x1280xf32, #tpu.memory_space<vmem>>, vector<4x256xf32>
    tpu.vector_store %arg18[%c56_77, %c112_78], %89 {strides = array<i32>} : memref<72x1280xf32, #tpu.memory_space<vmem>>, vector<4x256xf32>,
    %c64_79 = arith.constant 64 : index
    %c111_80 = arith.constant 111 : index
    %102 = vector.load %arg18[%c64_79, %c111_80] : memref<72x1280xf32, #tpu.memory_space<vmem>>, vector<4x256xf32>
    tpu.vector_store %arg18[%c64_79, %c111_80], %91 {strides = array<i32>} : memref<72x1280xf32, #tpu.memory_space<vmem>>, vector<4x256xf32>,
    %c0_81 = arith.constant 0 : index
    %c128_82 = arith.constant 128 : index
    %103 = vector.load %arg18[%c0_81, %c128_82] : memref<72x1280xf32, #tpu.memory_space<vmem>>, vector<72x256xf32>
    %104 = arith.truncf %103 : vector<72x256xf32> to vector<72x256xbf16>
    %cst_83 = arith.constant dense<0.000000e+00> : vector<4x256xf32>
    %105 = tpu.matmul %47, %104, %cst_83 {dimension_numbers = #tpu.dot_dimension_numbers<[1], [0], [0], [1], [0, 0, 1, 1], [], []>} : vector<4x72xbf16>, vector<72x256xbf16>, vector<4x256xf32> -> vector<4x256xf32>
    %106 = vector.broadcast %49 : vector<4x1xf32> to vector<4x256xf32>
    %107 = arith.addf %105, %106 : vector<4x256xf32>
    %cst_84 = arith.constant 0.000000e+00 : f32
    %108 = vector.broadcast %cst_84 : f32 to vector<4x256xf32>
    %109 = arith.maximumf %107, %108 : vector<4x256xf32>
    %c0_85 = arith.constant 0 : index
    %c0_86 = arith.constant 0 : index
    %c0_87 = arith.constant 0 : index
    %110 = vector.load %arg15[%c0_85, %c0_86, %c0_87] : memref<1x4x256xf32, #tpu.memory_space<vmem>>, vector<1x4x256xf32>
    %111 = vector.shape_cast %110 : vector<1x4x256xf32> to vector<4x256xf32>
    %112 = vector.shape_cast %109 : vector<4x256xf32> to vector<1x4x256xf32>
    tpu.vector_store %arg15[%c0_85, %c0_86, %c0_87], %112 {strides = array<i32>} : memref<1x4x256xf32, #tpu.memory_space<vmem>>, vector<1x4x256xf32>,
    %113 = arith.truncf %109 : vector<4x256xf32> to vector<4x256xbf16>
    %c0_88 = arith.constant 0 : index
    %c0_89 = arith.constant 0 : index
    %114 = vector.load %arg8[%c0_88, %c0_89] : memref<256x1024xbf16, #tpu.memory_space<vmem>>, vector<256x1024xbf16>
    %cst_90 = arith.constant dense<0.000000e+00> : vector<4x1024xf32>
    %115 = tpu.matmul %113, %114, %cst_90 {dimension_numbers = #tpu.dot_dimension_numbers<[1], [0], [0], [1], [0, 0, 1, 1], [], []>} : vector<4x256xbf16>, vector<256x1024xbf16>, vector<4x1024xf32> -> vector<4x1024xf32>
    %c0_91 = arith.constant 0 : index
    %c0_92 = arith.constant 0 : index
    %c0_93 = arith.constant 0 : index
    %116 = vector.load %arg9[%c0_91, %c0_92, %c0_93] : memref<1x4x1024xf32, #tpu.memory_space<vmem>>, vector<1x4x1024xf32>
    %117 = vector.shape_cast %116 : vector<1x4x1024xf32> to vector<4x1024xf32>
    %118 = arith.mulf %115, %117 : vector<4x1024xf32>
    %c0_94 = arith.constant 0 : index
    %c0_95 = arith.constant 0 : index
    %c0_96 = arith.constant 0 : index
    %119 = vector.load %arg16[%c0_94, %c0_95, %c0_96] : memref<1x4x1024xf32, #tpu.memory_space<vmem>>, vector<1x4x1024xf32>
    %120 = vector.shape_cast %119 : vector<1x4x1024xf32> to vector<4x1024xf32>
    %121 = vector.shape_cast %118 : vector<4x1024xf32> to vector<1x4x1024xf32>
    tpu.vector_store %arg16[%c0_94, %c0_95, %c0_96], %121 {strides = array<i32>} : memref<1x4x1024xf32, #tpu.memory_space<vmem>>, vector<1x4x1024xf32>,
    %122 = tpu.iota {dimensions = array<i32: 1>} : vector<1x1024xi32>
    %c32_i32 = arith.constant 32 : i32
    %c0_i32_97 = arith.constant 0 : i32
    %123 = arith.cmpi eq, %c32_i32, %c0_i32_97 : i32
    %c1_i32_98 = arith.constant 1 : i32
    %124 = arith.select %123, %c1_i32_98, %c32_i32 : i32
    %125 = vector.broadcast %124 : i32 to vector<1x1024xi32>
    %126 = arith.remsi %122, %125 : vector<1x1024xi32>
    %c0_i32_99 = arith.constant 0 : i32
    %127 = vector.broadcast %c0_i32_99 : i32 to vector<1x1024xi32>
    %128 = arith.cmpi ne, %126, %127 : vector<1x1024xi32>
    %c0_i32_100 = arith.constant 0 : i32
    %129 = vector.broadcast %c0_i32_100 : i32 to vector<1x1024xi32>
    %130 = arith.cmpi slt, %126, %129 : vector<1x1024xi32>
    %c0_i32_101 = arith.constant 0 : i32
    %131 = arith.cmpi slt, %124, %c0_i32_101 : i32
    %132 = vector.broadcast %131 : i1 to vector<1x1024xi1>
    %133 = vector.broadcast %132 : vector<1x1024xi1> to vector<1x1024xi1>
    %134 = arith.xori %130, %133 : vector<1x1024xi1>
    %135 = arith.andi %134, %128 : vector<1x1024xi1>
    %136 = vector.broadcast %124 : i32 to vector<1x1024xi32>
    %137 = arith.addi %126, %136 : vector<1x1024xi32>
    %138 = arith.select %135, %137, %126 : vector<1x1024xi1>, vector<1x1024xi32>
    %c0_i32_102 = arith.constant 0 : i32
    %139 = vector.broadcast %c0_i32_102 : i32 to vector<1x1024xi32>
    %140 = arith.cmpi ne, %138, %139 : vector<1x1024xi32>
    %cst_103 = arith.constant 1.000000e+00 : f32
    %cst_104 = arith.constant 0.000000e+00 : f32
    %141 = vector.broadcast %cst_103 : f32 to vector<1x1024xf32>
    %142 = vector.broadcast %cst_104 : f32 to vector<1x1024xf32>
    %143 = arith.select %140, %141, %142 : vector<1x1024xi1>, vector<1x1024xf32>
    %c31_i32 = arith.constant 31 : i32
    %144 = vector.broadcast %c31_i32 : i32 to vector<1x1024xi32>
    %145 = arith.cmpi ne, %138, %144 : vector<1x1024xi32>
    %cst_105 = arith.constant 1.000000e+00 : f32
    %cst_106 = arith.constant 0.000000e+00 : f32
    %146 = vector.broadcast %cst_105 : f32 to vector<1x1024xf32>
    %147 = vector.broadcast %cst_106 : f32 to vector<1x1024xf32>
    %148 = arith.select %145, %146, %147 : vector<1x1024xi1>, vector<1x1024xf32>
    %cst_107 = arith.constant 0.000000e+00 : f32
    %149 = vector.broadcast %cst_107 : f32 to vector<72x1280xf32>
    %c0_108 = arith.constant 0 : index
    %c0_109 = arith.constant 0 : index
    %150 = vector.load %arg18[%c0_108, %c0_109] : memref<72x1280xf32, #tpu.memory_space<vmem>>, vector<72x1280xf32>
    tpu.vector_store %arg18[%c0_108, %c0_109], %149 {strides = array<i32>} : memref<72x1280xf32, #tpu.memory_space<vmem>>, vector<72x1280xf32>,
    %c0_110 = arith.constant 0 : index
    %c0_111 = arith.constant 0 : index
    %151 = vector.load %arg10[%c0_110, %c0_111] : memref<4x72xbf16, #tpu.memory_space<vmem>>, vector<4x72xbf16>
    %c0_112 = arith.constant 0 : index
    %c0_113 = arith.constant 0 : index
    %152 = vector.load %arg11[%c0_112, %c0_113] : memref<4x1xf32, #tpu.memory_space<vmem>>, vector<4x1xf32>
    %c0_114 = arith.constant 0 : index
    %c0_115 = arith.constant 0 : index
    %c0_116 = arith.constant 0 : index
    %153 = vector.load %arg12[%c0_114, %c0_115, %c0_116] : memref<2x4x72xbf16, #tpu.memory_space<vmem>>, vector<1x4x72xbf16>
    %154 = vector.shape_cast %153 : vector<1x4x72xbf16> to vector<4x72xbf16>
    %c0_117 = arith.constant 0 : index
    %c0_118 = arith.constant 0 : index
    %c0_119 = arith.constant 0 : index
    %155 = vector.load %arg13[%c0_117, %c0_118, %c0_119] : memref<2x4x1xf32, #tpu.memory_space<vmem>>, vector<1x4x1xf32>
    %156 = vector.shape_cast %155 : vector<1x4x1xf32> to vector<4x1xf32>
    %c1_120 = arith.constant 1 : index
    %c0_121 = arith.constant 0 : index
    %c0_122 = arith.constant 0 : index
    %157 = vector.load %arg12[%c1_120, %c0_121, %c0_122] : memref<2x4x72xbf16, #tpu.memory_space<vmem>>, vector<1x4x72xbf16>
    %158 = vector.shape_cast %157 : vector<1x4x72xbf16> to vector<4x72xbf16>
    %c1_123 = arith.constant 1 : index
    %c0_124 = arith.constant 0 : index
    %c0_125 = arith.constant 0 : index
    %159 = vector.load %arg13[%c1_123, %c0_124, %c0_125] : memref<2x4x1xf32, #tpu.memory_space<vmem>>, vector<1x4x1xf32>
    %160 = vector.shape_cast %159 : vector<1x4x1xf32> to vector<4x1xf32>
    %161 = vector.broadcast %143 : vector<1x1024xf32> to vector<4x1024xf32>
    %162 = arith.mulf %118, %161 : vector<4x1024xf32>
    %163 = vector.broadcast %148 : vector<1x1024xf32> to vector<4x1024xf32>
    %164 = arith.mulf %118, %163 : vector<4x1024xf32>
    %c0_126 = arith.constant 0 : index
    %c161 = arith.constant 161 : index
    %165 = vector.load %arg18[%c0_126, %c161] : memref<72x1280xf32, #tpu.memory_space<vmem>>, vector<4x1024xf32>
    tpu.vector_store %arg18[%c0_126, %c161], %164 {strides = array<i32>} : memref<72x1280xf32, #tpu.memory_space<vmem>>, vector<4x1024xf32>,
    %c8_127 = arith.constant 8 : index
    %c160 = arith.constant 160 : index
    %166 = vector.load %arg18[%c8_127, %c160] : memref<72x1280xf32, #tpu.memory_space<vmem>>, vector<4x1024xf32>
    tpu.vector_store %arg18[%c8_127, %c160], %118 {strides = array<i32>} : memref<72x1280xf32, #tpu.memory_space<vmem>>, vector<4x1024xf32>,
    %c16_128 = arith.constant 16 : index
    %c159 = arith.constant 159 : index
    %167 = vector.load %arg18[%c16_128, %c159] : memref<72x1280xf32, #tpu.memory_space<vmem>>, vector<4x1024xf32>
    tpu.vector_store %arg18[%c16_128, %c159], %162 {strides = array<i32>} : memref<72x1280xf32, #tpu.memory_space<vmem>>, vector<4x1024xf32>,
    %c24_129 = arith.constant 24 : index
    %c129_130 = arith.constant 129 : index
    %168 = vector.load %arg18[%c24_129, %c129_130] : memref<72x1280xf32, #tpu.memory_space<vmem>>, vector<4x1024xf32>
    tpu.vector_store %arg18[%c24_129, %c129_130], %164 {strides = array<i32>} : memref<72x1280xf32, #tpu.memory_space<vmem>>, vector<4x1024xf32>,
    %c32_131 = arith.constant 32 : index
    %c128_132 = arith.constant 128 : index
    %169 = vector.load %arg18[%c32_131, %c128_132] : memref<72x1280xf32, #tpu.memory_space<vmem>>, vector<4x1024xf32>
    tpu.vector_store %arg18[%c32_131, %c128_132], %118 {strides = array<i32>} : memref<72x1280xf32, #tpu.memory_space<vmem>>, vector<4x1024xf32>,
    %c40_133 = arith.constant 40 : index
    %c127_134 = arith.constant 127 : index
    %170 = vector.load %arg18[%c40_133, %c127_134] : memref<72x1280xf32, #tpu.memory_space<vmem>>, vector<4x1024xf32>
    tpu.vector_store %arg18[%c40_133, %c127_134], %162 {strides = array<i32>} : memref<72x1280xf32, #tpu.memory_space<vmem>>, vector<4x1024xf32>,
    %c48_135 = arith.constant 48 : index
    %c97 = arith.constant 97 : index
    %171 = vector.load %arg18[%c48_135, %c97] : memref<72x1280xf32, #tpu.memory_space<vmem>>, vector<4x1024xf32>
    tpu.vector_store %arg18[%c48_135, %c97], %164 {strides = array<i32>} : memref<72x1280xf32, #tpu.memory_space<vmem>>, vector<4x1024xf32>,
    %c56_136 = arith.constant 56 : index
    %c96 = arith.constant 96 : index
    %172 = vector.load %arg18[%c56_136, %c96] : memref<72x1280xf32, #tpu.memory_space<vmem>>, vector<4x1024xf32>
    tpu.vector_store %arg18[%c56_136, %c96], %118 {strides = array<i32>} : memref<72x1280xf32, #tpu.memory_space<vmem>>, vector<4x1024xf32>,
    %c64_137 = arith.constant 64 : index
    %c95 = arith.constant 95 : index
    %173 = vector.load %arg18[%c64_137, %c95] : memref<72x1280xf32, #tpu.memory_space<vmem>>, vector<4x1024xf32>
    tpu.vector_store %arg18[%c64_137, %c95], %162 {strides = array<i32>} : memref<72x1280xf32, #tpu.memory_space<vmem>>, vector<4x1024xf32>,
    %c0_138 = arith.constant 0 : index
    %c128_139 = arith.constant 128 : index
    %174 = vector.load %arg18[%c0_138, %c128_139] : memref<72x1280xf32, #tpu.memory_space<vmem>>, vector<72x1024xf32>
    %175 = arith.truncf %174 : vector<72x1024xf32> to vector<72x1024xbf16>
    %cst_140 = arith.constant dense<0.000000e+00> : vector<4x1024xf32>
    %176 = tpu.matmul %151, %175, %cst_140 {dimension_numbers = #tpu.dot_dimension_numbers<[1], [0], [0], [1], [0, 0, 1, 1], [], []>} : vector<4x72xbf16>, vector<72x1024xbf16>, vector<4x1024xf32> -> vector<4x1024xf32>
    %177 = vector.broadcast %152 : vector<4x1xf32> to vector<4x1024xf32>
    %178 = arith.addf %176, %177 : vector<4x1024xf32>
    %cst_141 = arith.constant 0.000000e+00 : f32
    %179 = vector.broadcast %cst_141 : f32 to vector<4x1024xf32>
    %180 = arith.maximumf %178, %179 : vector<4x1024xf32>
    %181 = vector.broadcast %143 : vector<1x1024xf32> to vector<4x1024xf32>
    %182 = arith.mulf %180, %181 : vector<4x1024xf32>
    %183 = vector.broadcast %148 : vector<1x1024xf32> to vector<4x1024xf32>
    %184 = arith.mulf %180, %183 : vector<4x1024xf32>
    %c0_142 = arith.constant 0 : index
    %c161_143 = arith.constant 161 : index
    %185 = vector.load %arg18[%c0_142, %c161_143] : memref<72x1280xf32, #tpu.memory_space<vmem>>, vector<4x1024xf32>
    tpu.vector_store %arg18[%c0_142, %c161_143], %184 {strides = array<i32>} : memref<72x1280xf32, #tpu.memory_space<vmem>>, vector<4x1024xf32>,
    %c8_144 = arith.constant 8 : index
    %c160_145 = arith.constant 160 : index
    %186 = vector.load %arg18[%c8_144, %c160_145] : memref<72x1280xf32, #tpu.memory_space<vmem>>, vector<4x1024xf32>
    tpu.vector_store %arg18[%c8_144, %c160_145], %180 {strides = array<i32>} : memref<72x1280xf32, #tpu.memory_space<vmem>>, vector<4x1024xf32>,
    %c16_146 = arith.constant 16 : index
    %c159_147 = arith.constant 159 : index
    %187 = vector.load %arg18[%c16_146, %c159_147] : memref<72x1280xf32, #tpu.memory_space<vmem>>, vector<4x1024xf32>
    tpu.vector_store %arg18[%c16_146, %c159_147], %182 {strides = array<i32>} : memref<72x1280xf32, #tpu.memory_space<vmem>>, vector<4x1024xf32>,
    %c24_148 = arith.constant 24 : index
    %c129_149 = arith.constant 129 : index
    %188 = vector.load %arg18[%c24_148, %c129_149] : memref<72x1280xf32, #tpu.memory_space<vmem>>, vector<4x1024xf32>
    tpu.vector_store %arg18[%c24_148, %c129_149], %184 {strides = array<i32>} : memref<72x1280xf32, #tpu.memory_space<vmem>>, vector<4x1024xf32>,
    %c32_150 = arith.constant 32 : index
    %c128_151 = arith.constant 128 : index
    %189 = vector.load %arg18[%c32_150, %c128_151] : memref<72x1280xf32, #tpu.memory_space<vmem>>, vector<4x1024xf32>
    tpu.vector_store %arg18[%c32_150, %c128_151], %180 {strides = array<i32>} : memref<72x1280xf32, #tpu.memory_space<vmem>>, vector<4x1024xf32>,
    %c40_152 = arith.constant 40 : index
    %c127_153 = arith.constant 127 : index
    %190 = vector.load %arg18[%c40_152, %c127_153] : memref<72x1280xf32, #tpu.memory_space<vmem>>, vector<4x1024xf32>
    tpu.vector_store %arg18[%c40_152, %c127_153], %182 {strides = array<i32>} : memref<72x1280xf32, #tpu.memory_space<vmem>>, vector<4x1024xf32>,
    %c48_154 = arith.constant 48 : index
    %c97_155 = arith.constant 97 : index
    %191 = vector.load %arg18[%c48_154, %c97_155] : memref<72x1280xf32, #tpu.memory_space<vmem>>, vector<4x1024xf32>
    tpu.vector_store %arg18[%c48_154, %c97_155], %184 {strides = array<i32>} : memref<72x1280xf32, #tpu.memory_space<vmem>>, vector<4x1024xf32>,
    %c56_156 = arith.constant 56 : index
    %c96_157 = arith.constant 96 : index
    %192 = vector.load %arg18[%c56_156, %c96_157] : memref<72x1280xf32, #tpu.memory_space<vmem>>, vector<4x1024xf32>
    tpu.vector_store %arg18[%c56_156, %c96_157], %180 {strides = array<i32>} : memref<72x1280xf32, #tpu.memory_space<vmem>>, vector<4x1024xf32>,
    %c64_158 = arith.constant 64 : index
    %c95_159 = arith.constant 95 : index
    %193 = vector.load %arg18[%c64_158, %c95_159] : memref<72x1280xf32, #tpu.memory_space<vmem>>, vector<4x1024xf32>
    tpu.vector_store %arg18[%c64_158, %c95_159], %182 {strides = array<i32>} : memref<72x1280xf32, #tpu.memory_space<vmem>>, vector<4x1024xf32>,
    %c0_160 = arith.constant 0 : index
    %c128_161 = arith.constant 128 : index
    %194 = vector.load %arg18[%c0_160, %c128_161] : memref<72x1280xf32, #tpu.memory_space<vmem>>, vector<72x1024xf32>
    %195 = arith.truncf %194 : vector<72x1024xf32> to vector<72x1024xbf16>
    %cst_162 = arith.constant dense<0.000000e+00> : vector<4x1024xf32>
    %196 = tpu.matmul %154, %195, %cst_162 {dimension_numbers = #tpu.dot_dimension_numbers<[1], [0], [0], [1], [0, 0, 1, 1], [], []>} : vector<4x72xbf16>, vector<72x1024xbf16>, vector<4x1024xf32> -> vector<4x1024xf32>
    %197 = vector.broadcast %156 : vector<4x1xf32> to vector<4x1024xf32>
    %198 = arith.addf %196, %197 : vector<4x1024xf32>
    %cst_163 = arith.constant 0.000000e+00 : f32
    %199 = vector.broadcast %cst_163 : f32 to vector<4x1024xf32>
    %200 = arith.maximumf %198, %199 : vector<4x1024xf32>
    %201 = vector.broadcast %143 : vector<1x1024xf32> to vector<4x1024xf32>
    %202 = arith.mulf %200, %201 : vector<4x1024xf32>
    %203 = vector.broadcast %148 : vector<1x1024xf32> to vector<4x1024xf32>
    %204 = arith.mulf %200, %203 : vector<4x1024xf32>
    %c0_164 = arith.constant 0 : index
    %c161_165 = arith.constant 161 : index
    %205 = vector.load %arg18[%c0_164, %c161_165] : memref<72x1280xf32, #tpu.memory_space<vmem>>, vector<4x1024xf32>
    tpu.vector_store %arg18[%c0_164, %c161_165], %204 {strides = array<i32>} : memref<72x1280xf32, #tpu.memory_space<vmem>>, vector<4x1024xf32>,
    %c8_166 = arith.constant 8 : index
    %c160_167 = arith.constant 160 : index
    %206 = vector.load %arg18[%c8_166, %c160_167] : memref<72x1280xf32, #tpu.memory_space<vmem>>, vector<4x1024xf32>
    tpu.vector_store %arg18[%c8_166, %c160_167], %200 {strides = array<i32>} : memref<72x1280xf32, #tpu.memory_space<vmem>>, vector<4x1024xf32>,
    %c16_168 = arith.constant 16 : index
    %c159_169 = arith.constant 159 : index
    %207 = vector.load %arg18[%c16_168, %c159_169] : memref<72x1280xf32, #tpu.memory_space<vmem>>, vector<4x1024xf32>
    tpu.vector_store %arg18[%c16_168, %c159_169], %202 {strides = array<i32>} : memref<72x1280xf32, #tpu.memory_space<vmem>>, vector<4x1024xf32>,
    %c24_170 = arith.constant 24 : index
    %c129_171 = arith.constant 129 : index
    %208 = vector.load %arg18[%c24_170, %c129_171] : memref<72x1280xf32, #tpu.memory_space<vmem>>, vector<4x1024xf32>
    tpu.vector_store %arg18[%c24_170, %c129_171], %204 {strides = array<i32>} : memref<72x1280xf32, #tpu.memory_space<vmem>>, vector<4x1024xf32>,
    %c32_172 = arith.constant 32 : index
    %c128_173 = arith.constant 128 : index
    %209 = vector.load %arg18[%c32_172, %c128_173] : memref<72x1280xf32, #tpu.memory_space<vmem>>, vector<4x1024xf32>
    tpu.vector_store %arg18[%c32_172, %c128_173], %200 {strides = array<i32>} : memref<72x1280xf32, #tpu.memory_space<vmem>>, vector<4x1024xf32>,
    %c40_174 = arith.constant 40 : index
    %c127_175 = arith.constant 127 : index
    %210 = vector.load %arg18[%c40_174, %c127_175] : memref<72x1280xf32, #tpu.memory_space<vmem>>, vector<4x1024xf32>
    tpu.vector_store %arg18[%c40_174, %c127_175], %202 {strides = array<i32>} : memref<72x1280xf32, #tpu.memory_space<vmem>>, vector<4x1024xf32>,
    %c48_176 = arith.constant 48 : index
    %c97_177 = arith.constant 97 : index
    %211 = vector.load %arg18[%c48_176, %c97_177] : memref<72x1280xf32, #tpu.memory_space<vmem>>, vector<4x1024xf32>
    tpu.vector_store %arg18[%c48_176, %c97_177], %204 {strides = array<i32>} : memref<72x1280xf32, #tpu.memory_space<vmem>>, vector<4x1024xf32>,
    %c56_178 = arith.constant 56 : index
    %c96_179 = arith.constant 96 : index
    %212 = vector.load %arg18[%c56_178, %c96_179] : memref<72x1280xf32, #tpu.memory_space<vmem>>, vector<4x1024xf32>
    tpu.vector_store %arg18[%c56_178, %c96_179], %200 {strides = array<i32>} : memref<72x1280xf32, #tpu.memory_space<vmem>>, vector<4x1024xf32>,
    %c64_180 = arith.constant 64 : index
    %c95_181 = arith.constant 95 : index
    %213 = vector.load %arg18[%c64_180, %c95_181] : memref<72x1280xf32, #tpu.memory_space<vmem>>, vector<4x1024xf32>
    tpu.vector_store %arg18[%c64_180, %c95_181], %202 {strides = array<i32>} : memref<72x1280xf32, #tpu.memory_space<vmem>>, vector<4x1024xf32>,
    %c0_182 = arith.constant 0 : index
    %c128_183 = arith.constant 128 : index
    %214 = vector.load %arg18[%c0_182, %c128_183] : memref<72x1280xf32, #tpu.memory_space<vmem>>, vector<72x1024xf32>
    %215 = arith.truncf %214 : vector<72x1024xf32> to vector<72x1024xbf16>
    %cst_184 = arith.constant dense<0.000000e+00> : vector<4x1024xf32>
    %216 = tpu.matmul %158, %215, %cst_184 {dimension_numbers = #tpu.dot_dimension_numbers<[1], [0], [0], [1], [0, 0, 1, 1], [], []>} : vector<4x72xbf16>, vector<72x1024xbf16>, vector<4x1024xf32> -> vector<4x1024xf32>
    %217 = vector.broadcast %160 : vector<4x1xf32> to vector<4x1024xf32>
    %218 = arith.addf %216, %217 : vector<4x1024xf32>
    %cst_185 = arith.constant 0.000000e+00 : f32
    %219 = vector.broadcast %cst_185 : f32 to vector<4x1024xf32>
    %220 = arith.maximumf %218, %219 : vector<4x1024xf32>
    %c0_186 = arith.constant 0 : index
    %c0_187 = arith.constant 0 : index
    %c0_188 = arith.constant 0 : index
    %221 = vector.load %arg17[%c0_186, %c0_187, %c0_188] : memref<1x4x1024xf32, #tpu.memory_space<vmem>>, vector<1x4x1024xf32>
    %222 = vector.shape_cast %221 : vector<1x4x1024xf32> to vector<4x1024xf32>
    %223 = vector.shape_cast %220 : vector<4x1024xf32> to vector<1x4x1024xf32>
    tpu.vector_store %arg17[%c0_186, %c0_187, %c0_188], %223 {strides = array<i32>} : memref<1x4x1024xf32, #tpu.memory_space<vmem>>, vector<1x4x1024xf32>,
    return
  }
  func.func @transform_0(%arg0: i32) -> (i32, i32, i32) {
    %c0_i32 = arith.constant 0 : i32
    %c0_i32_0 = arith.constant 0 : i32
    %c0_i32_1 = arith.constant 0 : i32
    return %arg0, %c0_i32, %c0_i32_0 : i32, i32, i32
  }
  func.func @transform_1(%arg0: i32) -> (i32, i32) {
    %c0_i32 = arith.constant 0 : i32
    %c0_i32_0 = arith.constant 0 : i32
    %c0_i32_1 = arith.constant 0 : i32
    return %c0_i32, %c0_i32_0 : i32, i32
  }
  func.func @transform_2(%arg0: i32) -> (i32, i32, i32) {
    %c0_i32 = arith.constant 0 : i32
    %c0_i32_0 = arith.constant 0 : i32
    %c0_i32_1 = arith.constant 0 : i32
    return %arg0, %c0_i32, %c0_i32_0 : i32, i32, i32
  }
  func.func @transform_3(%arg0: i32) -> (i32, i32) {
    %c0_i32 = arith.constant 0 : i32
    %c0_i32_0 = arith.constant 0 : i32
    %c0_i32_1 = arith.constant 0 : i32
    return %c0_i32, %c0_i32_0 : i32, i32
  }
  func.func @transform_4(%arg0: i32) -> (i32, i32) {
    %c0_i32 = arith.constant 0 : i32
    %c0_i32_0 = arith.constant 0 : i32
    %c0_i32_1 = arith.constant 0 : i32
    return %c0_i32, %c0_i32_0 : i32, i32
  }
  func.func @transform_5(%arg0: i32) -> (i32, i32, i32) {
    %c0_i32 = arith.constant 0 : i32
    %c0_i32_0 = arith.constant 0 : i32
    %c0_i32_1 = arith.constant 0 : i32
    %c0_i32_2 = arith.constant 0 : i32
    return %c0_i32, %c0_i32_0, %c0_i32_1 : i32, i32, i32
  }
  func.func @transform_6(%arg0: i32) -> (i32, i32, i32) {
    %c0_i32 = arith.constant 0 : i32
    %c0_i32_0 = arith.constant 0 : i32
    %c0_i32_1 = arith.constant 0 : i32
    %c0_i32_2 = arith.constant 0 : i32
    return %c0_i32, %c0_i32_0, %c0_i32_1 : i32, i32, i32
  }
  func.func @transform_7(%arg0: i32) -> (i32, i32) {
    %c0_i32 = arith.constant 0 : i32
    %c0_i32_0 = arith.constant 0 : i32
    %c0_i32_1 = arith.constant 0 : i32
    return %c0_i32, %c0_i32_0 : i32, i32
  }
  func.func @transform_8(%arg0: i32) -> (i32, i32, i32) {
    %c0_i32 = arith.constant 0 : i32
    %c0_i32_0 = arith.constant 0 : i32
    %c0_i32_1 = arith.constant 0 : i32
    return %arg0, %c0_i32, %c0_i32_0 : i32, i32, i32
  }
  func.func @transform_9(%arg0: i32) -> (i32, i32) {
    %c0_i32 = arith.constant 0 : i32
    %c0_i32_0 = arith.constant 0 : i32
    %c0_i32_1 = arith.constant 0 : i32
    return %c0_i32, %c0_i32_0 : i32, i32
  }
  func.func @transform_10(%arg0: i32) -> (i32, i32) {
    %c0_i32 = arith.constant 0 : i32
    %c0_i32_0 = arith.constant 0 : i32
    %c0_i32_1 = arith.constant 0 : i32
    return %c0_i32, %c0_i32_0 : i32, i32
  }
  func.func @transform_11(%arg0: i32) -> (i32, i32, i32) {
    %c0_i32 = arith.constant 0 : i32
    %c0_i32_0 = arith.constant 0 : i32
    %c0_i32_1 = arith.constant 0 : i32
    %c0_i32_2 = arith.constant 0 : i32
    return %c0_i32, %c0_i32_0, %c0_i32_1 : i32, i32, i32
  }
  func.func @transform_12(%arg0: i32) -> (i32, i32, i32) {
    %c0_i32 = arith.constant 0 : i32
    %c0_i32_0 = arith.constant 0 : i32
    %c0_i32_1 = arith.constant 0 : i32
    %c0_i32_2 = arith.constant 0 : i32
    return %c0_i32, %c0_i32_0, %c0_i32_1 : i32, i32, i32
  }
  func.func @transform_13(%arg0: i32) -> (i32, i32, i32) {
    %c0_i32 = arith.constant 0 : i32
    %c0_i32_0 = arith.constant 0 : i32
    %c0_i32_1 = arith.constant 0 : i32
    return %arg0, %c0_i32, %c0_i32_0 : i32, i32, i32
  }
  func.func @transform_14(%arg0: i32) -> (i32, i32, i32) {
    %c0_i32 = arith.constant 0 : i32
    %c0_i32_0 = arith.constant 0 : i32
    %c0_i32_1 = arith.constant 0 : i32
    return %arg0, %c0_i32, %c0_i32_0 : i32, i32, i32
  }
  func.func @transform_15(%arg0: i32) -> (i32, i32, i32) {
    %c0_i32 = arith.constant 0 : i32
    %c0_i32_0 = arith.constant 0 : i32
    %c0_i32_1 = arith.constant 0 : i32
    return %arg0, %c0_i32, %c0_i32_0 : i32, i32, i32
  }
  func.func @transform_16(%arg0: i32) -> (i32, i32, i32) {
    %c0_i32 = arith.constant 0 : i32
    %c0_i32_0 = arith.constant 0 : i32
    %c0_i32_1 = arith.constant 0 : i32
    return %arg0, %c0_i32, %c0_i32_0 : i32, i32, i32
  }
}

</mosaic_0001>

<bundles_post_ra>
// kernel: decoder_sh_forward.1
= control target key start
LH: loop header
LB: loop body
LE: loop exit
PB: predicated region body
PF: predicated region fallthrough
CT: control target
= control target key end

     0   :  { %s5627_s21 = smov 0   ;;  %s7813_s0 = inlined_call_operand.vmem [shape: f32[2,8,64], index: 0, kind: input, shape index: {}]   ;;  %s7814_s1 = inlined_call_operand.vmem [shape: bf16[64,256], index: 1, kind: input, shape index: {}]   ;;  %s7815_s2 = inlined_call_operand.vmem [shape: f32[2,8,256], index: 2, kind: input, shape index: {}]   ;;  %s7816_s3 = inlined_call_operand.vmem [shape: bf16[4,72], index: 3, kind: input, shape index: {}]   ;;  %s7817_s4 = inlined_call_operand.vmem [shape: f32[4,1], index: 4, kind: input, shape index: {}]   ;;  %s7818_s5 = inlined_call_operand.vmem [shape: bf16[2,4,72], index: 5, kind: input, shape index: {}]   ;;  %s7819_s6 = inlined_call_operand.vmem [shape: f32[2,4,1], index: 6, kind: input, shape index: {}]   ;;  %s7820_s7 = inlined_call_operand.vmem [shape: bf16[256,1024], index: 7, kind: input, shape index: {}]   ;;  %s7821_s8 = inlined_call_operand.vmem [shape: f32[2,4,1024], index: 8, kind: input, shape index: {}]   ;;  %s7822_s9 = inlined_call_operand.vmem [shape: bf16[4,72], index: 9, kind: input, shape index: {}]   ;;  %s7823_s10 = inlined_call_operand.vmem [shape: f32[4,1], index: 10, kind: input, shape index: {}]   ;;  %s7824_s11 = inlined_call_operand.vmem [shape: bf16[2,4,72], index: 11, kind: input, shape index: {}]   ;;  %s7825_s12 = inlined_call_operand.vmem [shape: f32[2,4,1], index: 12, kind: input, shape index: {}]   ;;  %s7826_s13 = inlined_call_operand.vmem [shape: f32[2,8,256], index: 13, kind: output, shape index: {0}]   ;;  %s7827_s14 = inlined_call_operand.vmem [shape: f32[2,4,256], index: 14, kind: output, shape index: {1}]   ;;  %s7828_s15 = inlined_call_operand.vmem [shape: f32[2,4,1024], index: 15, kind: output, shape index: {2}]   ;;  %s7829_s16 = inlined_call_operand.vmem [shape: f32[2,4,1024], index: 16, kind: output, shape index: {3}]  }
   0x1   :  { %7844 = sst [smem:[#allocation3_spill]] %s7813_s0 }
   0x2 LB: > { %s4747_s22 = sadd.s32 4294967295, %s5524_s21   ;;  %p4751_p0 = scmp.ge.s32.totalorder %s5524_s21, 1  ;;  %s5524_s21 = sphi %s5627_s21, %s27_s21  }
   0x3   : > { %p488_p1 = scmp.lt.s32.totalorder %s5524_s21, 3 }
   0x5   : > { %p489_p2 = pnand %p4751_p0, %p488_p1 }
   0x6   : > { %p562_p3 = scmp.lt.s32.totalorder (!%p489_p2), %s4747_s22, 1  ;;  %s7845_s18 = sld [smem:[#allocation3_spill]] (!%p489_p2) }
   0x7   : > { %492 = sbr.rel (%p489_p2) target bundleno = 2272 (0x8e0), region = 72  ;;  %s5528_s20 = smov (!%p489_p2), 113  }
   0x8   : > { %s5529_s23 = smov (!%p489_p2), 111   ;;  %s7838_s26 = smov (!%p489_p2), 1  }
   0x9   : > { %s5533_s27 = smov (!%p489_p2), 16   ;;  %s5540_s0 = smov (!%p489_p2), 33  }
   0xa   : > { %s7854_s17 = smov (!%p489_p2), 127  }
   0xc   : > { %v4791_v0 = vld [vmem:[%s7814_s1 + $0x30] sm:$0xf]  ;;  %v5360_v1 = vld [vmem:[%s7814_s1 + $0x34] sm:$0xf0]  ;;  %v5359_v2 = vld [vmem:[%s7814_s1 + $0x34] sm:$0xf]  ;;  %v683_v31 = vlaneseq }
   0xd   : > { %v4792_v3 = vor.u32 %v5360_v1, %v4791_v0  ;;  %v4793_v4 = vld [vmem:[%s7814_s1 + $0x38] sm:$0xf0]  ;;  %v4783_v5 = vld [vmem:[%s7814_s1 + $0x20] sm:$0xf]  ;;  %v5358_v6 = vld [vmem:[%s7814_s1 + $0x24] sm:$0xf0] }
   0xe   : > { %v4796_v7 = vor.u32 %v5359_v2, %v4793_v4  ;;  %v5357_v8 = vld [vmem:[%s7814_s1 + $0x24] sm:$0xf]  ;;  %v4785_v9 = vld [vmem:[%s7814_s1 + $0x28] sm:$0xf0]  ;;  %v4784_v10 = vor.u32 %v5358_v6, %v4783_v5  ;;  %v4775_v12 = vld [vmem:[%s7814_s1 + $0x10] sm:$0xf] }
   0xf   : > { %655 = vmatpush.bf16.msra.mxu0 %v4792_v3  ;;  %v4788_v11 = vor.u32 %v5357_v8, %v4785_v9  ;;  %v5356_v13 = vld [vmem:[%s7814_s1 + $0x14] sm:$0xf0]  ;;  %v5355_v14 = vld [vmem:[%s7814_s1 + $0x14] sm:$0xf]  ;;  %v4777_v15 = vld [vmem:[%s7814_s1 + $0x18] sm:$0xf0] }
  0x10   : > { %668 = vmatpush.bf16.msra.mxu1 %v4796_v7  ;;  %v4776_v16 = vor.u32 %v5356_v13, %v4775_v12  ;;  %s7861_s22 = smov (!%p562_p3, %s4747_s22), 1  ;;  %v4780_v17 = vor.u32 %v5355_v14, %v4777_v15  ;;  %v4767_v18 = vld [vmem:[%s7814_s1] sm:$0xf]  ;;  %v5354_v19 = vld [vmem:[%s7814_s1 + $0x4] sm:$0xf0]  ;;  %vm647_vm0 = vcmask 523264  }
  0x11   : > { %v5353_v20 = vld [vmem:[%s7814_s1 + $0x4] sm:$0xf]  ;;  %v4769_v21 = vld [vmem:[%s7814_s1 + $0x8] sm:$0xf0]  ;;  %s7840_s29 = sshll.u32 %s7861_s22, 3  ;;  %s5687_s30 = sshll.u32 %s7861_s22, 5  ;;  %v4768_v22 = vor.u32 %v5354_v19, %v4767_v18 }
  0x12   : > { %s565_s19 = scalar_lea.vmem %s7845_s18, %s7840_s29  ;;  %s575_s24 = scalar_lea.vmem %s7821_s8, %s5687_s30  ;;  %v4772_v26 = vor.u32 %v5353_v20, %v4769_v21  ;;  %v5526_v30 = vmov 0.0   ;;  %v5713_v32 = vand.u32 127, %v683_v31  ;;  %vm7830_vm5 = vcmask 916480   ;;  %v809_v3 = vld [vmem:[%s7817_s4] sm:$0xf] }
  0x13   : > { %656 = vmatpush.bf16.msra.mxu0 %v4784_v10  ;;  %v597_v23 = vld [vmem:[%s565_s19] sm:$0xff]  ;;  %v2345_v25 = vld [vmem:[%s575_s24 + $0x8] sm:$0xff]  ;;  %v2346_v27 = vld [vmem:[%s575_s24 + $0x10] sm:$0xff]  ;;  %719 = vst [vmem:[#allocation2 + $0x8] sm:$0xff] %v5526_v30  ;;  %s5347_s25 = sshll.u32 %s7861_s22, 4  ;;  %s5527_s19 = smov 112  }
  0x14   : > { %669 = vmatpush.bf16.msra.mxu1 %v4788_v11  ;;  %v2344_v24 = vld [vmem:[%s575_s24] sm:$0xff]  ;;  %v2347_v28 = vld [vmem:[%s575_s24 + $0x18] sm:$0xff]  ;;  %2354 = vst [vmem:[#allocation1 + $0x10] ss:$2 sm:$0xff] %v2345_v25  ;;  %v598_v29 = vpack.c.bf16 %v597_v23, %v597_v23  ;;  %v690_v33 = vand.u32 15, %v5713_v32  ;;  %s570_s28 = scalar_lea.vmem %s7815_s2, %s5347_s25  ;;  %v5725_v34 = vadd.s32 128, %v5713_v32  ;;  %s580_s18 = scalar_lea.vmem %s7826_s13, %s5347_s25 }
  0x15   : > { %2352 = vst [vmem:[#allocation1] ss:$2 sm:$0xff] %v2344_v24  ;;  %v677_v35 = vld [vmem:[%s570_s28] sm:$0xff]  ;;  %v678_v36 = vld [vmem:[%s570_s28 + $0x8] sm:$0xff]  ;;  %s5530_s24 = smov 15   ;;  %s7836_s25 = smov 127  }
  0x16   : > { %2356 = vst [vmem:[#allocation1 + $0x20] ss:$2 sm:$0xff] %v2346_v27  ;;  %vm714_vm1 = vcmp.ne.s32.totalorder %v690_v33, 15  ;;  %vm710_vm2 = vcmp.ne.s32.totalorder %v690_v33, 0  ;;  %v697_v37 = vand.u32 15, %v5725_v34  ;;  %s5534_s28 = smov 17  }
  0x17   : > { %657 = vmatpush.bf16.msra.mxu0 %v4776_v16  ;;  %2358 = vst [vmem:[#allocation1 + $0x30] ss:$2 sm:$0xff] %v2347_v28  ;;  %v5736_v39 = vsel %vm714_vm1, 1.0, %v5526_v30  ;;  %v5739_v40 = vsel %vm710_vm2, 1.0, %v5526_v30  ;;  %vm861_vm6 = vcmask 1047672   ;;  %vm869_vm7 = vcmask 7168  }
  0x18   : > { %670 = vmatpush.bf16.msra.mxu1 %v4780_v17  ;;  %721 = vst [vmem:[#allocation2 + $0x18] sm:$0xff] %v5526_v30  ;;  %vm715_vm3 = vcmp.ne.s32.totalorder %v697_v37, 15  ;;  %vm711_vm4 = vcmp.ne.s32.totalorder %v697_v37, 0  ;;  %vm846_vm8 = vcmask 1047680   ;;  %vm7832_vm9 = vcmask 924672  }
  0x19   : > { %729 = vst [vmem:[#allocation2 + $0x58] sm:$0xff] %v5526_v30  ;;  %v5759_v46 = vsel %vm715_vm3, 1.0, %v5526_v30  ;;  %v5762_v47 = vsel %vm711_vm4, 1.0, %v5526_v30  ;;  %vm7831_vm10 = vcmask 908288   ;;  %vm969_vm11 = vcmask 1043456  }
  0x1a   : > { %731 = vst [vmem:[#allocation2 + $0x68] sm:$0xff] %v5526_v30  ;;  %vm884_vm12 = vcmask 1039360   ;;  %v5535_v6 = vmov 0   ;;  %vm874_vm13 = vcmask 1047560   ;;  %vm856_vm14 = vcmask 121856  }
  0x1b   : > { %658 = vmatpush.bf16.msra.mxu0 %v4768_v22  ;;  %739 = vst [vmem:[#allocation2 + $0xa8] sm:$0xff] %v5526_v30  ;;  %5513 = vset.pattern.permute.xlu1 %v5535_v6  ;;  %vm826_vm15 = vcmask 138240   ;;  %vm841_vm1 = vcmask 130048   ;;  %v808_v37 = vld [vmem:[%s7816_s3] sm:$0x3]  ;;  %vm965_vm2 = vcmask 588800  }
  0x1c   : > { %671 = vmatpush.bf16.msra.mxu1 %v4772_v26  ;;  %741 = vst [vmem:[#allocation2 + $0xb8] sm:$0xff] %v5526_v30  ;;  %5514 = vset.pattern.permute.xlu0 %v5535_v6  ;;  %vm1092_vm3 = vcmask 920576   ;;  %vm1051_vm4 = vcmask 117760  }
  0x1d   : > { %749 = vst [vmem:[#allocation2 + $0xf8] sm:$0xff] %v5526_v30  ;;  %5515 = vset.pattern.permute.xlu2 %v5535_v6 }
  0x1e   : > { %4797 = vmatmul.msk.bf16.vlgmr.msra.gmra.mxu0 %vm647_vm0, %v598_v29  ;;  %751 = vst [vmem:[#allocation2 + $0x108] sm:$0xff] %v5526_v30 }
  0x1f   : > { %4798 = vmatmul.msk.bf16.vlgmr.msra.gmra.mxu1 %vm647_vm0, %v598_v29  ;;  %770 = vst [vmem:[#allocation2 + $0x1a0] sm:$0xff] %v5526_v30  ;;  %vm831_vm0 = vcmask 1047688  }
  0x20   : > { %780 = vst [vmem:[#allocation2 + $0x1f0] sm:$0xff] %v5526_v30 }
  0x21   : > { %790 = vst [vmem:[#allocation2 + $0x240] sm:$0xff] %v5526_v30 }
  0x22   : > { %800 = vst [vmem:[#allocation2 + $0x290] sm:$0xff] %v5526_v30 }
  0x23   : > { %2541 = vst [vmem:[#allocation2] sm:$0xff] %v5526_v30 }
  0x24   : > { %2545 = vst [vmem:[#allocation2 + $0x20] sm:$0xff] %v5526_v30 }
  0x25   : > { %2546 = vst [vmem:[#allocation2 + $0x28] sm:$0xff] %v5526_v30 }
  0x26   : > { %2547 = vst [vmem:[#allocation2 + $0x30] sm:$0xff] %v5526_v30 }
  0x27   : > { %2548 = vst [vmem:[#allocation2 + $0x38] sm:$0xff] %v5526_v30 }
  0x28   : > { %2549 = vst [vmem:[#allocation2 + $0x40] sm:$0xff] %v5526_v30 }
  0x29   : > { %2555 = vst [vmem:[#allocation2 + $0x70] sm:$0xff] %v5526_v30 }
  0x2a   : > { %2556 = vst [vmem:[#allocation2 + $0x78] sm:$0xff] %v5526_v30 }
  0x2b   : > { %2557 = vst [vmem:[#allocation2 + $0x80] sm:$0xff] %v5526_v30 }
  0x2c   : > { %2558 = vst [vmem:[#allocation2 + $0x88] sm:$0xff] %v5526_v30 }
  0x2d   : > { %2559 = vst [vmem:[#allocation2 + $0x90] sm:$0xff] %v5526_v30 }
  0x2e   : > { %2565 = vst [vmem:[#allocation2 + $0xc0] sm:$0xff] %v5526_v30 }
  0x2f   : > { %2566 = vst [vmem:[#allocation2 + $0xc8] sm:$0xff] %v5526_v30 }
  0x30   : > { %2567 = vst [vmem:[#allocation2 + $0xd0] sm:$0xff] %v5526_v30 }
  0x31   : > { %2568 = vst [vmem:[#allocation2 + $0xd8] sm:$0xff] %v5526_v30 }
  0x32   : > { %2569 = vst [vmem:[#allocation2 + $0xe0] sm:$0xff] %v5526_v30 }
  0x33   : > { %2575 = vst [vmem:[#allocation2 + $0x110] sm:$0xff] %v5526_v30 }
  0x34   : > { %2576 = vst [vmem:[#allocation2 + $0x118] sm:$0xff] %v5526_v30 }
  0x35   : > { %2577 = vst [vmem:[#allocation2 + $0x120] sm:$0xff] %v5526_v30 }
  0x36   : > { %2578 = vst [vmem:[#allocation2 + $0x128] sm:$0xff] %v5526_v30 }
  0x37   : > { %2579 = vst [vmem:[#allocation2 + $0x130] sm:$0xff] %v5526_v30 }
  0x38   : > { %2584 = vst [vmem:[#allocation2 + $0x158] sm:$0xff] %v5526_v30 }
  0x39   : > { %2585 = vst [vmem:[#allocation2 + $0x160] sm:$0xff] %v5526_v30 }
  0x3a   : > { %2586 = vst [vmem:[#allocation2 + $0x168] sm:$0xff] %v5526_v30 }
  0x3b   : > { %2587 = vst [vmem:[#allocation2 + $0x170] sm:$0xff] %v5526_v30 }
  0x3c   : > { %2588 = vst [vmem:[#allocation2 + $0x178] sm:$0xff] %v5526_v30 }
  0x3d   : > { %2589 = vst [vmem:[#allocation2 + $0x180] sm:$0xff] %v5526_v30 }
  0x3e   : > { %2594 = vst [vmem:[#allocation2 + $0x1a8] sm:$0xff] %v5526_v30 }
  0x3f   : > { %2595 = vst [vmem:[#allocation2 + $0x1b0] sm:$0xff] %v5526_v30 }
  0x40   : > { %2596 = vst [vmem:[#allocation2 + $0x1b8] sm:$0xff] %v5526_v30 }
  0x41   : > { %2597 = vst [vmem:[#allocation2 + $0x1c0] sm:$0xff] %v5526_v30 }
  0x42   : > { %2598 = vst [vmem:[#allocation2 + $0x1c8] sm:$0xff] %v5526_v30 }
  0x43   : > { %2599 = vst [vmem:[#allocation2 + $0x1d0] sm:$0xff] %v5526_v30 }
  0x44   : > { %2604 = vst [vmem:[#allocation2 + $0x1f8] sm:$0xff] %v5526_v30 }
  0x45   : > { %2605 = vst [vmem:[#allocation2 + $0x200] sm:$0xff] %v5526_v30 }
  0x46   : > { %2606 = vst [vmem:[#allocation2 + $0x208] sm:$0xff] %v5526_v30 }
  0x47   : > { %2607 = vst [vmem:[#allocation2 + $0x210] sm:$0xff] %v5526_v30 }
  0x48   : > { %2608 = vst [vmem:[#allocation2 + $0x218] sm:$0xff] %v5526_v30 }
  0x49   : > { %2609 = vst [vmem:[#allocation2 + $0x220] sm:$0xff] %v5526_v30 }
  0x4a   : > { %2614 = vst [vmem:[#allocation2 + $0x248] sm:$0xff] %v5526_v30 }
  0x4b   : > { %2615 = vst [vmem:[#allocation2 + $0x250] sm:$0xff] %v5526_v30 }
  0x4c   : > { %2616 = vst [vmem:[#allocation2 + $0x258] sm:$0xff] %v5526_v30 }
  0x4d   : > { %2617 = vst [vmem:[#allocation2 + $0x260] sm:$0xff] %v5526_v30 }
  0x4e   : > { %2618 = vst [vmem:[#allocation2 + $0x268] sm:$0xff] %v5526_v30 }
  0x4f   : > { %2619 = vst [vmem:[#allocation2 + $0x270] sm:$0xff] %v5526_v30 }
  0x50   : > { %2624 = vst [vmem:[#allocation2 + $0x298] sm:$0xff] %v5526_v30 }
  0x51   : > { %2625 = vst [vmem:[#allocation2 + $0x2a0] sm:$0xff] %v5526_v30 }
  0x52   : > { %2626 = vst [vmem:[#allocation2 + $0x2a8] sm:$0xff] %v5526_v30 }
  0x53   : > { %2627 = vst [vmem:[#allocation2 + $0x2b0] sm:$0xff] %v5526_v30 }
  0x54   : > { %2628 = vst [vmem:[#allocation2 + $0x2b8] sm:$0xff] %v5526_v30 }
  0x55   : > { %2629 = vst [vmem:[#allocation2 + $0x2c0] sm:$0xff] %v5526_v30 }
  0x9b   : > { %v660_v38 = vpop.f32.mrf.mxu0 }
  0x9c   : > { %v5741_v41 = vmul.f32 %v677_v35, %v660_v38  ;;  %v673_v42 = vpop.f32.mrf.mxu1 }
  0x9d   : > { %v5743_v43 = vmul.f32 %v678_v36, %v673_v42 }
  0x9e   : > { %681 = vst [vmem:[%s580_s18] sm:$0xff] %v5741_v41  ;;  %906 = vrot.lane.b32.xlu2 %v5741_v41, %s5527_s19  ;;  %v818_v44 = vmul.f32 %v5736_v39, %v5741_v41  ;;  %v816_v45 = vmul.f32 %v5739_v40, %v5741_v41 }
  0x9f   : > { %878 = vst [vmem:[#allocation2 + $0x148] sm:$0xff] %v5741_v41  ;;  %v819_v50 = vmul.f32 %v5759_v46, %v5743_v43  ;;  %v817_v51 = vmul.f32 %v5762_v47, %v5743_v43 }
  0xa0   : > { %682 = vst [vmem:[%s580_s18 + $0x8] sm:$0xff] %v5743_v43  ;;  %893 = vrot.lane.b32.xlu1 %v818_v44, %s5528_s20  ;;  %919 = vrot.lane.b32.xlu0 %v816_v45, %s5529_s23  ;;  %s7852_s18 = sshll.u32 %s7861_s22, 3  ;;  %s5539_s22 = smov 32  }
  0xa1   : > { %879 = vst [vmem:[#allocation2 + $0x150] sm:$0xff] %v5743_v43 }
  0xa3   : > { %v662_v48 = vpop.f32.mrf.mxu0 }
  0xa4   : > { %v675_v49 = vpop.f32.mrf.mxu1 }
  0xa6   : > { %908 = vrot.lane.b32.xlu2 %v5743_v43, %s5527_s19 }
  0xa8   : > { %895 = vrot.lane.b32.xlu1 %v819_v50, %s5528_s20  ;;  %921 = vrot.lane.b32.xlu0 %v817_v51, %s5529_s23 }
  0xae   : > { %852 = vrot.lane.b32.xlu2 %v816_v45, %s5530_s24 }
  0xb0   : > { %882 = vrot.lane.b32.xlu1 %v817_v51, %s7836_s25  ;;  %880 = vrot.lane.b32.xlu0 %v816_v45, %s7836_s25 }
  0xb6   : > { %867 = vrot.lane.b32.xlu2 %v819_v50, %s7838_s26 }
  0xb8   : > { %865 = vrot.lane.b32.xlu1 %v818_v44, %s7838_s26  ;;  %854 = vrot.lane.b32.xlu0 %v817_v51, %s5530_s24 }
  0xbe   : > { %837 = vrot.lane.b32.xlu2 %v5741_v41, %s5533_s27 }
  0xc0   : > { %824 = vrot.lane.b32.xlu1 %v819_v50, %s5534_s28  ;;  %822 = vrot.lane.b32.xlu0 %v818_v44, %s5534_s28 }
  0xc8   : > { %839 = vrot.lane.b32.xlu0 %v5743_v43, %s5533_s27  ;;  %962 = vperm.xlu1 %5513, %v809_v3  }
  0xf8   : > { %v907_v52 = vpop.permute.xlu2 %906 }
 0x100   : > { %v909_v53 = vpop.permute.xlu2 %908 }
 0x101   : > { %v911_v54 = vsel %vm7830_vm5, %v907_v52, %v909_v53  ;;  %918 = vst.msk [vmem:[#allocation2 + $0x240] sm:$0xff] %vm7830_vm5, %v909_v53 }
 0x102   : > { %917 = vst [vmem:[#allocation2 + $0x238] sm:$0xff] %v911_v54 }
 0x108   : > { %v853_v55 = vpop.permute.xlu2 %852  ;;  %v947_v14 = vld [vmem:[#allocation2 + $0x240] sm:$0xff] }
 0x109   : > { %862 = vst.msk [vmem:[#allocation2 + $0xa8] sm:$0xff] %vm861_vm6, %v853_v55  ;;  %vm1105_vm6 = vcmask 912384  }
 0x110   : > { %v868_v56 = vpop.permute.xlu2 %867  ;;  %v936_v23 = vld [vmem:[#allocation2 + $0xa8] sm:$0xff] }
 0x111   : > { %877 = vst.msk [vmem:[#allocation2 + $0x108] sm:$0xff] %vm869_vm7, %v868_v56 }
 0x112   : > { %v894_v57 = vpop.permute.xlu1 %893  ;;  %v920_v58 = vpop.permute.xlu0 %919 }
 0x118   : > { %v5826_v59 = vpop.permute.xlu2 %837 }
 0x119   : > { %847 = vst.msk [vmem:[#allocation2 + $0x58] sm:$0xff] %vm846_vm8, %v5826_v59  ;;  %vm1118_vm8 = vcmask 904192  }
 0x11a   : > { %v896_v60 = vpop.permute.xlu1 %895  ;;  %v922_v61 = vpop.permute.xlu0 %921 }
 0x11b   : > { %v898_v62 = vsel %vm7832_vm9, %v894_v57, %v896_v60  ;;  %905 = vst.msk [vmem:[#allocation2 + $0x1f0] sm:$0xff] %vm7832_vm9, %v896_v60  ;;  %v924_v63 = vsel %vm7831_vm10, %v920_v58, %v922_v61 }
 0x11c   : > { %904 = vst [vmem:[#allocation2 + $0x1e8] sm:$0xff] %v898_v62  ;;  %v958_v0 = vpack.c.bf16 %v924_v63, %v924_v63  ;;  %v956_v2 = vpack.c.bf16 %v911_v54, %v898_v62 }
 0x11d   : > { %930 = vst [vmem:[#allocation2 + $0x288] sm:$0xff] %v924_v63 }
 0x11e   : > { %931 = vst.msk [vmem:[#allocation2 + $0x290] sm:$0xff] %vm7831_vm10, %v922_v61  ;;  %v971_v1 = vsel %vm969_vm11, %v958_v0, 0 }
 0x11f   : > { %979 = vmatpush.bf16.msra.mxu2 %v971_v1 }
 0x120   : > { %v934_v33 = vld [vmem:[#allocation2 + $0x58] sm:$0xff] }
 0x122   : > { %v883_v4 = vpop.permute.xlu1 %882  ;;  %v881_v5 = vpop.permute.xlu0 %880  ;;  %v945_v12 = vld [vmem:[#allocation2 + $0x1f0] sm:$0xff] }
 0x123   : > { %892 = vst.msk [vmem:[#allocation2 + $0x1a0] sm:$0xff] %vm884_vm12, %v883_v4  ;;  %v885_v7 = vsel %vm884_vm12, %v881_v5, %v883_v4  ;;  %980 = vmatpush.bf16.msra.mxu2 %v956_v2  ;;  %v957_v18 = vpack.c.bf16 %v947_v14, %v945_v12 }
 0x124   : > { %v954_v8 = vpack.c.bf16 %v885_v7, %v5741_v41  ;;  %891 = vst [vmem:[#allocation2 + $0x198] sm:$0xff] %v885_v7 }
 0x125   : > { %v949_v9 = vld [vmem:[#allocation2 + $0x290] sm:$0xff] }
 0x126   : > { %v959_v10 = vpack.c.bf16 %v949_v9, %v949_v9  ;;  %v811_v9 = vld [vmem:[%s7819_s6] sm:$0xf] }
 0x127   : > { %981 = vmatpush.bf16.msra.mxu2 %v954_v8 }
 0x128   : > { %v974_v11 = vsel %vm969_vm11, %v959_v10, 0 }
 0x129   : > { %992 = vmatpush.bf16.msra.mxu3 %v974_v11 }
 0x12a   : > { %v866_v13 = vpop.permute.xlu1 %865  ;;  %v855_v15 = vpop.permute.xlu0 %854  ;;  %v943_v16 = vld [vmem:[#allocation2 + $0x1a0] sm:$0xff] }
 0x12b   : > { %v870_v17 = vsel %vm869_vm7, %v866_v13, %v868_v56  ;;  %875 = vst.msk [vmem:[#allocation2 + $0xf8] sm:$0xff] %vm874_vm13, %v866_v13  ;;  %v857_v19 = vsel %vm856_vm14, %v853_v55, %v855_v15  ;;  %v955_v20 = vpack.c.bf16 %v943_v16, %v5743_v43  ;;  %vm7835_vm13 = vcmask 3072  }
 0x12c   : > { %876 = vst [vmem:[#allocation2 + $0x100] sm:$0xff] %v870_v17  ;;  %v953_v27 = vpack.c.bf16 %v870_v17, %v857_v19 }
 0x12d   : > { %993 = vmatpush.bf16.msra.mxu3 %v957_v18  ;;  %863 = vst [vmem:[#allocation2 + $0xb0] sm:$0xff] %v857_v19 }
 0x12e   : > { %864 = vst.msk [vmem:[#allocation2 + $0xb8] sm:$0xff] %vm856_vm14, %v855_v15 }
 0x131   : > { %994 = vmatpush.bf16.msra.mxu3 %v955_v20 }
 0x132   : > { %v825_v21 = vpop.permute.xlu1 %824  ;;  %v823_v22 = vpop.permute.xlu0 %822  ;;  %v938_v24 = vld [vmem:[#allocation2 + $0xf8] sm:$0xff] }
 0x133   : > { %834 = vst.msk [vmem:[#allocation2 + $0x18] sm:$0xff] %vm826_vm15, %v825_v21  ;;  %v827_v25 = vsel %vm826_vm15, %v823_v22, %v825_v21  ;;  %v952_v26 = vpack.c.bf16 %v938_v24, %v936_v23 }
 0x134   : > { %832 = vst.msk [vmem:[#allocation2 + $0x8] sm:$0xff] %vm831_vm0, %v823_v22  ;;  %vm7833_vm0 = vcmask 1043592  }
 0x135   : > { %833 = vst [vmem:[#allocation2 + $0x10] sm:$0xff] %v827_v25  ;;  %982 = vmatpush.bf16.msra.mxu2 %v952_v26  ;;  %995 = vmatpush.bf16.msra.mxu3 %v953_v27 }
 0x13a   : > { %v840_v28 = vpop.permute.xlu0 %839  ;;  %v963_v38 = vpop.permute.xlu1 %962 }
 0x13b   : > { %v842_v29 = vsel %vm841_vm1, %v5826_v59, %v840_v28  ;;  %849 = vst.msk [vmem:[#allocation2 + $0x68] sm:$0xff] %vm841_vm1, %v840_v28  ;;  %v932_v31 = vld [vmem:[#allocation2 + $0x8] sm:$0xff] }
 0x13c   : > { %848 = vst [vmem:[#allocation2 + $0x60] sm:$0xff] %v842_v29  ;;  %v950_v35 = vpack.c.bf16 %v934_v33, %v932_v31  ;;  %v951_v36 = vpack.c.bf16 %v842_v29, %v827_v25 }
 0x13e   : > { %983 = vmatpush.bf16.msra.mxu2 %v950_v35  ;;  %996 = vmatpush.bf16.msra.mxu3 %v951_v36 }
 0x141   : > { %4801 = vmatmul.msk.bf16.vlgmr.msra.gmra.mxu2 %vm965_vm2, %v808_v37  ;;  %4802 = vmatmul.msk.bf16.vlgmr.msra.gmra.mxu3 %vm965_vm2, %v808_v37 }
 0x1c4   : > { %v985_v41 = vpop.f32.mrf.mxu2  ;;  %v998_v42 = vpop.f32.mrf.mxu3 }
 0x1c5   : > { %v986_v43 = vadd.f32 %v985_v41, %v963_v38  ;;  %v999_v44 = vadd.f32 %v998_v42, %v963_v38 }
 0x1c7   : > { %v1002_v45 = vmax.f32 %v986_v43, 0.0  ;;  %v1003_v48 = vmax.f32 %v999_v44, 0.0 }
 0x1c9   : > { %1066 = vst [vmem:[#allocation2 + $0x148] sm:$0xf] %v1002_v45  ;;  %1094 = vrot.lane.b32.xlu0 %v1002_v45, %s5527_s19  ;;  %1096 = vrot.lane.b32.xlu1 %v1003_v48, %s5527_s19  ;;  %v1007_v49 = vmul.f32 %v1003_v48, %v5759_v46  ;;  %v1005_v52 = vmul.f32 %v1003_v48, %v5762_v47 }
 0x1ca   : > { %1067 = vst [vmem:[#allocation2 + $0x150] sm:$0xf] %v1003_v48  ;;  %v1006_v53 = vmul.f32 %v1002_v45, %v5736_v39  ;;  %v1004_v54 = vmul.f32 %v1002_v45, %v5739_v40 }
 0x1cb   : > { %1083 = vrot.lane.b32.xlu2 %v1007_v49, %s5528_s20 }
 0x1cc   : > { %v987_v50 = vpop.f32.mrf.mxu2  ;;  %v1000_v51 = vpop.f32.mrf.mxu3 }
 0x1d0   : > { %v1128_v28 = vld [vmem:[#allocation2 + $0x148] sm:$0xff] }
 0x1d1   : > { %1109 = vrot.lane.b32.xlu0 %v1005_v52, %s5529_s23  ;;  %1055 = vrot.lane.b32.xlu1 %v1007_v49, %s7838_s26  ;;  %v1129_v18 = vld [vmem:[#allocation2 + $0x150] sm:$0xff] }
 0x1d3   : > { %1042 = vrot.lane.b32.xlu2 %v1005_v52, %s5530_s24 }
 0x1d9   : > { %1070 = vrot.lane.b32.xlu0 %v1005_v52, %s7836_s25  ;;  %1081 = vrot.lane.b32.xlu1 %v1006_v53, %s5528_s20 }
 0x1db   : > { %1107 = vrot.lane.b32.xlu2 %v1004_v54, %s5529_s23 }
 0x1e1   : > { %1053 = vrot.lane.b32.xlu0 %v1006_v53, %s7838_s26  ;;  %1040 = vrot.lane.b32.xlu1 %v1004_v54, %s5530_s24 }
 0x1e3   : > { %1068 = vrot.lane.b32.xlu2 %v1004_v54, %s7836_s25 }
 0x1e9   : > { %1012 = vrot.lane.b32.xlu0 %v1007_v49, %s5534_s28  ;;  %1025 = vrot.lane.b32.xlu1 %v1002_v45, %s5533_s27 }
 0x1eb   : > { %1010 = vrot.lane.b32.xlu2 %v1006_v53, %s5534_s28  ;;  %v810_v53 = vld [vmem:[%s7818_s5] sm:$0x3] }
 0x1f1   : > { %1150 = vperm.xlu0 %5514, %v811_v9  }
 0x1f3   : > { %1027 = vrot.lane.b32.xlu2 %v1003_v48, %s5533_s27 }
 0x225   : > { %v1084_v55 = vpop.permute.xlu2 %1083 }
 0x226   : > { %1093 = vst.msk [vmem:[#allocation2 + $0x1f0] sm:$0xf] %vm1092_vm3, %v1084_v55 }
 0x22d   : > { %v1043_v56 = vpop.permute.xlu2 %1042  ;;  %v1133_v15 = vld [vmem:[#allocation2 + $0x1f0] sm:$0xff] }
 0x22e   : > { %1052 = vst.msk [vmem:[#allocation2 + $0xb8] sm:$0xf] %vm1051_vm4, %v1043_v56 }
 0x235   : > { %v1108_v57 = vpop.permute.xlu2 %1107 }
 0x23b   : > { %v1095_v58 = vpop.permute.xlu0 %1094  ;;  %v1097_v59 = vpop.permute.xlu1 %1096 }
 0x23c   : > { %v1098_v60 = vsel %vm7830_vm5, %v1095_v58, %v1097_v59  ;;  %1106 = vst.msk [vmem:[#allocation2 + $0x240] sm:$0xf] %vm1105_vm6, %v1097_v59  ;;  %vm1079_vm5 = vcmask 1035264  }
 0x23d   : > { %1104 = vst [vmem:[#allocation2 + $0x238] sm:$0xf] %v1098_v60  ;;  %v1069_v61 = vpop.permute.xlu2 %1068 }
 0x243   : > { %v1110_v62 = vpop.permute.xlu0 %1109  ;;  %v1056_v63 = vpop.permute.xlu1 %1055  ;;  %v1135_v13 = vld [vmem:[#allocation2 + $0x240] sm:$0xff] }
 0x244   : > { %v1111_v0 = vsel %vm7831_vm10, %v1108_v57, %v1110_v62  ;;  %1119 = vst.msk [vmem:[#allocation2 + $0x290] sm:$0xf] %vm1118_vm8, %v1110_v62  ;;  %vm7834_vm10 = vcmask 125952   ;;  %v1145_v16 = vpack.c.bf16 %v1135_v13, %v1133_v15  ;;  %v1134_v25 = vld [vmem:[#allocation2 + $0x238] sm:$0xff] }
 0x245   : > { %1117 = vst [vmem:[#allocation2 + $0x288] sm:$0xf] %v1111_v0  ;;  %v1011_v1 = vpop.permute.xlu2 %1010 }
 0x246   : > { %1065 = vst.msk [vmem:[#allocation2 + $0x108] sm:$0xf] %vm7835_vm13, %v1056_v63  ;;  %vm1033_vm13 = vcmask 1043584  }
 0x247   : > { %1019 = vst.msk [vmem:[#allocation2 + $0x8] sm:$0xf] %vm7833_vm0, %v1011_v1  ;;  %vm1048_vm0 = vcmask 1043576  }
 0x24b   : > { %v1071_v2 = vpop.permute.xlu0 %1070  ;;  %v1137_v3 = vld [vmem:[#allocation2 + $0x290] sm:$0xff]  ;;  %v1082_v4 = vpop.permute.xlu1 %1081 }
 0x24c   : > { %v1072_v5 = vsel %vm884_vm12, %v1069_v61, %v1071_v2  ;;  %1080 = vst.msk [vmem:[#allocation2 + $0x1a0] sm:$0xf] %vm1079_vm5, %v1071_v2  ;;  %v1147_v6 = vpack.c.bf16 %v1137_v3, %v1137_v3  ;;  %v1136_v7 = vld [vmem:[#allocation2 + $0x288] sm:$0xff]  ;;  %v1085_v8 = vsel %vm7832_vm9, %v1082_v4, %v1084_v55  ;;  %vm1061_vm9 = vcmask 1043464  }
 0x24d   : > { %1078 = vst [vmem:[#allocation2 + $0x198] sm:$0xf] %v1072_v5  ;;  %v1146_v10 = vpack.c.bf16 %v1136_v7, %v1136_v7  ;;  %v1028_v11 = vpop.permute.xlu2 %1027 }
 0x24e   : > { %v1160_v12 = vsel %vm969_vm11, %v1147_v6, 0  ;;  %1091 = vst [vmem:[#allocation2 + $0x1e8] sm:$0xf] %v1085_v8  ;;  %v1120_v48 = vld [vmem:[#allocation2 + $0x8] sm:$0xff] }
 0x24f   : > { %1178 = vmatpush.bf16.msrb.mxu1 %v1160_v12  ;;  %v1157_v14 = vsel %vm969_vm11, %v1146_v10, 0  ;;  %1037 = vst.msk [vmem:[#allocation2 + $0x68] sm:$0xf] %vm7834_vm10, %v1028_v11  ;;  %vm1021_vm10 = vcmask 134144  }
 0x250   : > { %1165 = vmatpush.bf16.msrb.mxu0 %v1157_v14 }
 0x253   : > { %1179 = vmatpush.bf16.msrb.mxu1 %v1145_v16  ;;  %v1054_v17 = vpop.permute.xlu0 %1053  ;;  %v1131_v19 = vld [vmem:[#allocation2 + $0x1a0] sm:$0xff]  ;;  %v1041_v20 = vpop.permute.xlu1 %1040 }
 0x254   : > { %v1057_v21 = vsel %vm869_vm7, %v1054_v17, %v1056_v63  ;;  %1062 = vst.msk [vmem:[#allocation2 + $0xf8] sm:$0xf] %vm1061_vm9, %v1054_v17  ;;  %v1143_v22 = vpack.c.bf16 %v1131_v19, %v1129_v18  ;;  %v1044_v23 = vsel %vm856_vm14, %v1041_v20, %v1043_v56  ;;  %v1130_v27 = vld [vmem:[#allocation2 + $0x198] sm:$0xff] }
 0x255   : > { %1063 = vst [vmem:[#allocation2 + $0x100] sm:$0xf] %v1057_v21  ;;  %v1132_v24 = vld [vmem:[#allocation2 + $0x1e8] sm:$0xff]  ;;  %v1142_v33 = vpack.c.bf16 %v1130_v27, %v1128_v28  ;;  %v5033_v28 = vld [vmem:[%s7820_s7 + $0x1c0] sm:$0xf] }
 0x256   : > { %1049 = vst.msk [vmem:[#allocation2 + $0xa8] sm:$0xf] %vm1048_vm0, %v1041_v20  ;;  %v1144_v26 = vpack.c.bf16 %v1134_v25, %v1132_v24 }
 0x257   : > { %1180 = vmatpush.bf16.msrb.mxu1 %v1143_v22  ;;  %1050 = vst [vmem:[#allocation2 + $0xb0] sm:$0xf] %v1044_v23 }
 0x258   : > { %1166 = vmatpush.bf16.msrb.mxu0 %v1144_v26 }
 0x25b   : > { %v1013_v29 = vpop.permute.xlu0 %1012  ;;  %v1026_v31 = vpop.permute.xlu1 %1025  ;;  %v1126_v35 = vld [vmem:[#allocation2 + $0xf8] sm:$0xff] }
 0x25c   : > { %v1014_v36 = vsel %vm826_vm15, %v1011_v1, %v1013_v29  ;;  %1022 = vst.msk [vmem:[#allocation2 + $0x18] sm:$0xf] %vm1021_vm10, %v1013_v29  ;;  %v1029_v37 = vsel %vm841_vm1, %v1026_v31, %v1028_v11  ;;  %v1127_v38 = vld [vmem:[#allocation2 + $0x100] sm:$0xff]  ;;  %1167 = vmatpush.bf16.msrb.mxu0 %v1142_v33  ;;  %v5421_v29 = vld [vmem:[%s7820_s7 + $0x1dc] sm:$0xf0] }
 0x25d   : > { %1020 = vst [vmem:[#allocation2 + $0x10] sm:$0xf] %v1014_v36  ;;  %v1124_v41 = vld [vmem:[#allocation2 + $0xa8] sm:$0xff] }
 0x25e   : > { %1034 = vst.msk [vmem:[#allocation2 + $0x58] sm:$0xf] %vm1033_vm13, %v1026_v31  ;;  %v1140_v42 = vpack.c.bf16 %v1126_v35, %v1124_v41  ;;  %v1125_v43 = vld [vmem:[#allocation2 + $0xb0] sm:$0xff]  ;;  %v5034_v35 = vor.u32 %v5421_v29, %v5033_v28  ;;  %v5485_v41 = vld [vmem:[%s7820_s7 + $0x3dc] sm:$0xf0] }
 0x25f   : > { %1035 = vst [vmem:[#allocation2 + $0x60] sm:$0xf] %v1029_v37  ;;  %v1141_v44 = vpack.c.bf16 %v1127_v38, %v1125_v43  ;;  %v5289_v37 = vld [vmem:[%s7820_s7 + $0x3c0] sm:$0xf] }
 0x260   : > { %1168 = vmatpush.bf16.msrb.mxu0 %v1140_v42  ;;  %v5290_v43 = vor.u32 %v5485_v41, %v5289_v37  ;;  %v4841_v29 = vld [vmem:[%s7820_s7 + $0x40] sm:$0xf] }
 0x261   : > { %1181 = vmatpush.bf16.msrb.mxu1 %v1141_v44  ;;  %v5001_v44 = vld [vmem:[%s7820_s7 + $0x180] sm:$0xf] }
 0x262   : > { %v5097_v41 = vld [vmem:[%s7820_s7 + $0x240] sm:$0xf] }
 0x263   : > { %v1151_v54 = vpop.permute.xlu0 %1150 }
 0x264   : > { %v1121_v45 = vld [vmem:[#allocation2 + $0x10] sm:$0xff] }
 0x265   : > { %v1122_v49 = vld [vmem:[#allocation2 + $0x58] sm:$0xff] }
 0x266   : > { %v1138_v50 = vpack.c.bf16 %v1122_v49, %v1120_v48  ;;  %v1123_v51 = vld [vmem:[#allocation2 + $0x60] sm:$0xff] }
 0x267   : > { %v1139_v52 = vpack.c.bf16 %v1123_v51, %v1121_v45  ;;  %v5413_v45 = vld [vmem:[%s7820_s7 + $0x19c] sm:$0xf0] }
 0x268   : > { %1169 = vmatpush.bf16.msrb.mxu0 %v1138_v50  ;;  %v5002_v49 = vor.u32 %v5413_v45, %v5001_v44  ;;  %v5257_v50 = vld [vmem:[%s7820_s7 + $0x380] sm:$0xf] }
 0x269   : > { %1182 = vmatpush.bf16.msrb.mxu1 %v1139_v52  ;;  %v5477_v52 = vld [vmem:[%s7820_s7 + $0x39c] sm:$0xf0] }
 0x26b   : > { %4803 = vmatmul.msk.bf16.vlgmr.msrb.gmra.mxu0 %vm965_vm2, %v810_v53 }
 0x26c   : > { %4804 = vmatmul.msk.bf16.vlgmr.msrb.gmra.mxu1 %vm965_vm2, %v810_v53  ;;  %2136 = vmatpush.bf16.msra.mxu0 %v5034_v35  ;;  %v5373_v35 = vld [vmem:[%s7820_s7 + $0x5c] sm:$0xf0] }
 0x26d   : > { %2149 = vmatpush.bf16.msra.mxu1 %v5290_v43 }
 0x270   : > { %2137 = vmatpush.bf16.msra.mxu0 %v5002_v49  ;;  %v5259_v49 = vld [vmem:[%s7820_s7 + $0x3a0] sm:$0xf0] }
 0x2e8   : > { %v1171_v55 = vpop.f32.mrf.mxu0 }
 0x2e9   : > { %v1172_v56 = vadd.f32 %v1171_v55, %v1151_v54  ;;  %v1184_v57 = vpop.f32.mrf.mxu1  ;;  %v4969_v55 = vld [vmem:[%s7820_s7 + $0x140] sm:$0xf] }
 0x2ea   : > { %v1185_v58 = vadd.f32 %v1184_v57, %v1151_v54  ;;  %v5258_v54 = vor.u32 %v5477_v52, %v5257_v50  ;;  %v5405_v57 = vld [vmem:[%s7820_s7 + $0x15c] sm:$0xf0] }
 0x2eb   : > { %v1188_v59 = vmax.f32 %v1172_v56, 0.0  ;;  %v4809_v52 = vld [vmem:[%s7820_s7] sm:$0xf] }
 0x2ec   : > { %v1189_v60 = vmax.f32 %v1185_v58, 0.0  ;;  %2150 = vmatpush.bf16.msra.mxu1 %v5258_v54  ;;  %v4799_v54 = vld [vmem:[%s7818_s5 + $0x2] sm:$0x3] }
 0x2ed   : > { %1244 = vst [vmem:[#allocation2 + $0x148] sm:$0xf] %v1188_v59  ;;  %1268 = vrot.lane.b32.xlu0 %v1188_v59, %s5527_s19  ;;  %v1190_v3 = vmul.f32 %v1188_v59, %v5739_v40 }
 0x2ee   : > { %1245 = vst [vmem:[#allocation2 + $0x150] sm:$0xf] %v1189_v60  ;;  %1270 = vrot.lane.b32.xlu1 %v1189_v60, %s5527_s19  ;;  %v1191_v61 = vmul.f32 %v1189_v60, %v5762_v47  ;;  %v1193_v0 = vmul.f32 %v1189_v60, %v5759_v46  ;;  %v1192_v47 = vmul.f32 %v1188_v59, %v5736_v39  ;;  %v4800_v46 = vld [vmem:[%s7819_s6 + $0x4] sm:$0xf]  ;;  %s5541_s19 = smov 31  }
 0x2f0   : > { %1281 = vrot.lane.b32.xlu2 %v1191_v61, %s5529_s23  ;;  %v1173_v62 = vpop.f32.mrf.mxu0 }
 0x2f1   : > { %v1186_v63 = vpop.f32.mrf.mxu1  ;;  %v5469_v62 = vld [vmem:[%s7820_s7 + $0x35c] sm:$0xf0] }
 0x2f4   : > { %v5910_v1 = vld [vmem:[#allocation2 + $0x148] sm:$0xff] }
 0x2f5   : > { %1248 = vrot.lane.b32.xlu0 %v1191_v61, %s7836_s25  ;;  %v5913_v2 = vld [vmem:[#allocation2 + $0x150] sm:$0xff]  ;;  %2582 = vst [vmem:[#allocation2 + $0x148] sm:$0xff] %v5526_v30 }
 0x2f6   : > { %1235 = vrot.lane.b32.xlu1 %v1193_v0, %s7838_s26  ;;  %2583 = vst [vmem:[#allocation2 + $0x150] sm:$0xff] %v5526_v30 }
 0x2f8   : > { %1259 = vrot.lane.b32.xlu2 %v1193_v0, %s5528_s20 }
 0x2fd   : > { %1233 = vrot.lane.b32.xlu0 %v1192_v47, %s7838_s26  ;;  %s5536_s26 = smov 96  }
 0x2fe   : > { %1279 = vrot.lane.b32.xlu1 %v1190_v3, %s5529_s23  ;;  %s5537_s23 = smov 97  }
 0x300   : > { %1224 = vrot.lane.b32.xlu2 %v1191_v61, %s5530_s24 }
 0x305   : > { %1198 = vrot.lane.b32.xlu0 %v1193_v0, %s5534_s28 }
 0x306   : > { %1257 = vrot.lane.b32.xlu1 %v1192_v47, %s5528_s20  ;;  %s585_s20 = scalar_lea.vmem %s7827_s14, %s7852_s18 }
 0x308   : > { %1246 = vrot.lane.b32.xlu2 %v1190_v3, %s7836_s25 }
 0x30d   : > { %1320 = vperm.xlu0 %5514, %v4800_v46   ;;  %v5397_v46 = vld [vmem:[%s7820_s7 + $0x11c] sm:$0xf0] }
 0x30e   : > { %1222 = vrot.lane.b32.xlu1 %v1190_v3, %s5530_s24  ;;  %s5538_s24 = smov 95  }
 0x310   : > { %1196 = vrot.lane.b32.xlu2 %v1192_v47, %s5534_s28  ;;  %s7853_s28 = smov 1  }
 0x316   : > { %1209 = vrot.lane.b32.xlu1 %v1188_v59, %s5533_s27  ;;  %v4970_v59 = vor.u32 %v5405_v57, %v4969_v55 }
 0x318   : > { %1211 = vrot.lane.b32.xlu2 %v1189_v60, %s5533_s27  ;;  %v5225_v60 = vld [vmem:[%s7820_s7 + $0x340] sm:$0xf]  ;;  %2138 = vmatpush.bf16.msra.mxu0 %v4970_v59  ;;  %v4971_v59 = vld [vmem:[%s7820_s7 + $0x160] sm:$0xf0] }
 0x319   : > { %v5226_v0 = vor.u32 %v5469_v62, %v5225_v60  ;;  %v5429_v60 = vld [vmem:[%s7820_s7 + $0x21c] sm:$0xf0]  ;;  %v5465_v62 = vld [vmem:[%s7820_s7 + $0x344] sm:$0xf] }
 0x31b   : > { %2151 = vmatpush.bf16.msra.mxu1 %v5226_v0  ;;  %v5041_v0 = vld [vmem:[%s7820_s7 + $0x1c8] sm:$0xf] }
 0x34a   : > { %v1282_v39 = vpop.permute.xlu2 %1281 }
 0x34b   : > { %1289 = vst.msk [vmem:[#allocation2 + $0x290] sm:$0xf] %vm1118_vm8, %v1282_v39  ;;  %vm7846_vm8 = vcmask 916480  }
 0x352   : > { %v1260_v40 = vpop.permute.xlu2 %1259  ;;  %v1307_v4 = vld [vmem:[#allocation2 + $0x290] sm:$0xff] }
 0x353   : > { %1267 = vst.msk [vmem:[#allocation2 + $0x1f0] sm:$0xf] %vm1092_vm3, %v1260_v40  ;;  %v1317_v5 = vpack.c.bf16 %v1307_v4, %v1307_v4  ;;  %vm7847_vm3 = vcmask 3072   ;;  %v5193_v4 = vld [vmem:[%s7820_s7 + $0x300] sm:$0xf] }
 0x354   : > { %2623 = vst [vmem:[#allocation2 + $0x290] sm:$0xff] %v5526_v30 }
 0x355   : > { %v1330_v6 = vsel %vm969_vm11, %v1317_v5, 0  ;;  %v5516_v5 = vld [vmem:[#allocation2] sm:$0xff] }
 0x356   : > { %1348 = vmatpush.bf16.msrb.mxu3 %v1330_v6  ;;  %v5461_v6 = vld [vmem:[%s7820_s7 + $0x31c] sm:$0xf0] }
 0x35a   : > { %v5938_v7 = vpop.permute.xlu2 %1224  ;;  %v1303_v8 = vld [vmem:[#allocation2 + $0x1f0] sm:$0xff] }
 0x35b   : > { %1232 = vst.msk [vmem:[#allocation2 + $0xb8] sm:$0xf] %vm1051_vm4, %v5938_v7  ;;  %vm7848_vm4 = vcmask 1043592  }
 0x35c   : > { %2564 = vst [vmem:[#allocation2 + $0xb8] sm:$0xff] %v5526_v30 }
 0x35d   : > { %2603 = vst [vmem:[#allocation2 + $0x1f0] sm:$0xff] %v5526_v30 }
 0x35f   : > { %v1269_v9 = vpop.permute.xlu0 %1268 }
 0x360   : > { %v1271_v10 = vpop.permute.xlu1 %1270 }
 0x361   : > { %v1272_v11 = vsel %vm7846_vm8, %v1269_v9, %v1271_v10  ;;  %1278 = vst.msk [vmem:[#allocation2 + $0x240] sm:$0xf] %vm1105_vm6, %v1271_v10  ;;  %vm7849_vm6 = vcmask 908288   ;;  %vm7850_vm8 = vcmask 125952  }
 0x362   : > { %1277 = vst [vmem:[#allocation2 + $0x238] sm:$0xf] %v1272_v11  ;;  %v1247_v12 = vpop.permute.xlu2 %1246 }
 0x367   : > { %v1249_v13 = vpop.permute.xlu0 %1248 }
 0x368   : > { %v1250_v14 = vsel %vm884_vm12, %v1247_v12, %v1249_v13  ;;  %1256 = vst.msk [vmem:[#allocation2 + $0x1a0] sm:$0xf] %vm1079_vm5, %v1249_v13  ;;  %v1236_v15 = vpop.permute.xlu1 %1235  ;;  %v1305_v17 = vld [vmem:[#allocation2 + $0x240] sm:$0xff] }
 0x369   : > { %1255 = vst [vmem:[#allocation2 + $0x198] sm:$0xf] %v1250_v14  ;;  %v1315_v18 = vpack.c.bf16 %v1305_v17, %v1303_v8  ;;  %v5952_v19 = vld [vmem:[#allocation2 + $0x238] sm:$0xff] }
 0x36a   : > { %1243 = vst.msk [vmem:[#allocation2 + $0x108] sm:$0xf] %vm7847_vm3, %v1236_v15  ;;  %v1197_v16 = vpop.permute.xlu2 %1196  ;;  %vm7851_vm3 = vcmask 924672   ;;  %v5389_v8 = vld [vmem:[%s7820_s7 + $0xdc] sm:$0xf0] }
 0x36b   : > { %2574 = vst [vmem:[#allocation2 + $0x108] sm:$0xff] %v5526_v30  ;;  %1349 = vmatpush.bf16.msrb.mxu3 %v1315_v18 }
 0x36c   : > { %1204 = vst.msk [vmem:[#allocation2 + $0x8] sm:$0xf] %vm7848_vm4, %v1197_v16 }
 0x36d   : > { %2613 = vst [vmem:[#allocation2 + $0x240] sm:$0xff] %v5526_v30 }
 0x36e   : > { %2612 = vst [vmem:[#allocation2 + $0x238] sm:$0xff] %v5526_v30 }
 0x36f   : > { %v1234_v20 = vpop.permute.xlu0 %1233  ;;  %v1301_v21 = vld [vmem:[#allocation2 + $0x1a0] sm:$0xff] }
 0x370   : > { %v1237_v22 = vsel %vm869_vm7, %v1234_v20, %v1236_v15  ;;  %1241 = vst.msk [vmem:[#allocation2 + $0xf8] sm:$0xf] %vm1061_vm9, %v1234_v20  ;;  %v1280_v23 = vpop.permute.xlu1 %1279  ;;  %v1313_v24 = vpack.c.bf16 %v1301_v21, %v5913_v2  ;;  %v1300_v51 = vld [vmem:[#allocation2 + $0x198] sm:$0xff] }
 0x371   : > { %1242 = vst [vmem:[#allocation2 + $0x100] sm:$0xf] %v1237_v22  ;;  %v1283_v25 = vsel %vm7849_vm6, %v1280_v23, %v1282_v39  ;;  %v4937_v2 = vld [vmem:[%s7820_s7 + $0x100] sm:$0xf]  ;;  %v1312_v9 = vpack.c.bf16 %v1300_v51, %v5910_v1  ;;  %v5417_v20 = vld [vmem:[%s7820_s7 + $0x1c4] sm:$0xf] }
 0x372   : > { %1350 = vmatpush.bf16.msrb.mxu3 %v1313_v24  ;;  %1288 = vst [vmem:[#allocation2 + $0x288] sm:$0xf] %v1283_v25  ;;  %v5959_v26 = vpop.permute.xlu2 %1211  ;;  %v5161_v15 = vld [vmem:[%s7820_s7 + $0x2c0] sm:$0xf]  ;;  %v5035_v22 = vld [vmem:[%s7820_s7 + $0x1e0] sm:$0xf0] }
 0x373   : > { %2593 = vst [vmem:[#allocation2 + $0x1a0] sm:$0xff] %v5526_v30  ;;  %v6020_v3 = vld [vmem:[#allocation2 + $0x8] sm:$0xff]  ;;  %v5453_v1 = vld [vmem:[%s7820_s7 + $0x2dc] sm:$0xf0]  ;;  %v5038_v37 = vor.u32 %v5417_v20, %v5035_v22  ;;  %v5470_v20 = vld [vmem:[%s7820_s7 + $0x364] sm:$0xf0] }
 0x374   : > { %1219 = vst.msk [vmem:[#allocation2 + $0x68] sm:$0xf] %vm7850_vm8, %v5959_v26  ;;  %v5162_v18 = vor.u32 %v5453_v1, %v5161_v15  ;;  %v5381_v21 = vld [vmem:[%s7820_s7 + $0x9c] sm:$0xf0]  ;;  %v4977_v15 = vld [vmem:[%s7820_s7 + $0x148] sm:$0xf] }
 0x375   : > { %2554 = vst [vmem:[#allocation2 + $0x68] sm:$0xff] %v5526_v30  ;;  %v5129_v24 = vld [vmem:[%s7820_s7 + $0x280] sm:$0xf]  ;;  %v4907_v22 = vld [vmem:[%s7820_s7 + $0xe0] sm:$0xf0] }
 0x376   : > { %2592 = vst [vmem:[#allocation2 + $0x198] sm:$0xff] %v5526_v30  ;;  %v5445_v25 = vld [vmem:[%s7820_s7 + $0x29c] sm:$0xf0] }
 0x377   : > { %v1199_v27 = vpop.permute.xlu0 %1198  ;;  %v5996_v53 = vld [vmem:[#allocation2 + $0xf8] sm:$0xff]  ;;  %2542 = vst [vmem:[#allocation2 + $0x8] sm:$0xff] %v5526_v30  ;;  %v5130_v28 = vor.u32 %v5445_v25, %v5129_v24  ;;  %v5398_v24 = vld [vmem:[%s7820_s7 + $0x124] sm:$0xf0] }
 0x378   : > { %v1200_v31 = vsel %vm826_vm15, %v1197_v16, %v1199_v27  ;;  %1206 = vst.msk [vmem:[#allocation2 + $0x18] sm:$0xf] %vm1021_vm10, %v1199_v27  ;;  %v1258_v33 = vpop.permute.xlu1 %1257  ;;  %v1297_v61 = vld [vmem:[#allocation2 + $0x100] sm:$0xff]  ;;  %v5291_v27 = vld [vmem:[%s7820_s7 + $0x3e0] sm:$0xf0] }
 0x379   : > { %1205 = vst [vmem:[#allocation2 + $0x10] sm:$0xf] %v1200_v31  ;;  %v1261_v36 = vsel %vm7851_vm3, %v1258_v33, %v1260_v40  ;;  %v1306_v38 = vld [vmem:[#allocation2 + $0x288] sm:$0xff]  ;;  %v4938_v40 = vor.u32 %v5397_v46, %v4937_v2  ;;  %v5409_v31 = vld [vmem:[%s7820_s7 + $0x184] sm:$0xf] }
 0x37a   : > { %2544 = vst [vmem:[#allocation2 + $0x18] sm:$0xff] %v5526_v30  ;;  %v1316_v42 = vpack.c.bf16 %v1306_v38, %v1306_v38  ;;  %v5003_v33 = vld [vmem:[%s7820_s7 + $0x1a0] sm:$0xf0]  ;;  %v4842_v38 = vor.u32 %v5373_v35, %v4841_v29  ;;  %v5422_v2 = vld [vmem:[%s7820_s7 + $0x1e4] sm:$0xf0] }
 0x37b   : > { %1266 = vst [vmem:[#allocation2 + $0x1e8] sm:$0xf] %v1261_v36  ;;  %2139 = vmatpush.bf16.msra.mxu0 %v4938_v40  ;;  %v5006_v57 = vor.u32 %v5409_v31, %v5003_v33  ;;  %v5297_v46 = vld [vmem:[%s7820_s7 + $0x3c8] sm:$0xf]  ;;  %v5449_v25 = vld [vmem:[%s7820_s7 + $0x2c4] sm:$0xf] }
 0x37c   : > { %v1327_v48 = vsel %vm969_vm11, %v1316_v42, 0  ;;  %2622 = vst [vmem:[#allocation2 + $0x288] sm:$0xff] %v5526_v30  ;;  %v5437_v42 = vld [vmem:[%s7820_s7 + $0x25c] sm:$0xf0]  ;;  %v5462_v29 = vld [vmem:[%s7820_s7 + $0x324] sm:$0xf0] }
 0x37d   : > { %1335 = vmatpush.bf16.msrb.mxu2 %v1327_v48  ;;  %2572 = vst [vmem:[#allocation2 + $0xf8] sm:$0xff] %v5526_v30  ;;  %v5473_v48 = vld [vmem:[%s7820_s7 + $0x384] sm:$0xf]  ;;  %v5098_v50 = vor.u32 %v5437_v42, %v5097_v41  ;;  %v5390_v41 = vld [vmem:[%s7820_s7 + $0xe4] sm:$0xf0] }
 0x37e   : > { %2573 = vst [vmem:[#allocation2 + $0x100] sm:$0xff] %v5526_v30  ;;  %v5377_v33 = vld [vmem:[%s7820_s7 + $0x84] sm:$0xf] }
 0x37f   : > { %v5441_v42 = vld [vmem:[%s7820_s7 + $0x284] sm:$0xf] }
 0x380   : > { %v1223_v56 = vpop.permute.xlu1 %1222  ;;  %v6026_v39 = vld [vmem:[#allocation2 + $0x10] sm:$0xff] }
 0x381   : > { %v1226_v58 = vsel %vm856_vm14, %v1223_v56, %v5938_v7  ;;  %1230 = vst.msk [vmem:[#allocation2 + $0xa8] sm:$0xf] %vm1048_vm0, %v1223_v56  ;;  %v5194_v7 = vor.u32 %v5461_v6, %v5193_v4  ;;  %v5065_v56 = vld [vmem:[%s7820_s7 + $0x200] sm:$0xf]  ;;  %v5009_v4 = vld [vmem:[%s7820_s7 + $0x188] sm:$0xf] }
 0x382   : > { %1231 = vst [vmem:[#allocation2 + $0xb0] sm:$0xf] %v1226_v58  ;;  %v1302_v63 = vld [vmem:[#allocation2 + $0x1e8] sm:$0xff]  ;;  %v5401_v58 = vld [vmem:[%s7820_s7 + $0x144] sm:$0xf] }
 0x383   : > { %v1314_v47 = vpack.c.bf16 %v5952_v19, %v1302_v63  ;;  %2602 = vst [vmem:[#allocation2 + $0x1e8] sm:$0xff] %v5526_v30  ;;  %v4905_v30 = vld [vmem:[%s7820_s7 + $0xc0] sm:$0xf]  ;;  %2152 = vmatpush.bf16.msra.mxu1 %v5194_v7  ;;  %v5066_v63 = vor.u32 %v5429_v60, %v5065_v56  ;;  %v5393_v6 = vld [vmem:[%s7820_s7 + $0x104] sm:$0xf] }
 0x384   : > { %2543 = vst [vmem:[#allocation2 + $0x10] sm:$0xff] %v5516_v5  ;;  %v4906_v12 = vor.u32 %v5389_v8, %v4905_v30  ;;  %v4873_v19 = vld [vmem:[%s7820_s7 + $0x80] sm:$0xf]  ;;  %v4939_v7 = vld [vmem:[%s7820_s7 + $0x120] sm:$0xf0] }
 0x385   : > { %1336 = vmatpush.bf16.msrb.mxu2 %v1314_v47  ;;  %v4874_v23 = vor.u32 %v5381_v21, %v4873_v19  ;;  %v5227_v47 = vld [vmem:[%s7820_s7 + $0x360] sm:$0xf0]  ;;  %v5414_v30 = vld [vmem:[%s7820_s7 + $0x1a4] sm:$0xf0]  ;;  %v4942_v1 = vor.u32 %v5393_v6, %v4939_v7 }
 0x386   : > { %2140 = vmatpush.bf16.msra.mxu0 %v4906_v12  ;;  %v5230_v8 = vor.u32 %v5465_v62, %v5227_v47  ;;  %v5478_v12 = vld [vmem:[%s7820_s7 + $0x3a4] sm:$0xf0]  ;;  %v5433_v56 = vld [vmem:[%s7820_s7 + $0x244] sm:$0xf] }
 0x387   : > { %2153 = vmatpush.bf16.msra.mxu1 %v5162_v18  ;;  %v5385_v18 = vld [vmem:[%s7820_s7 + $0xc4] sm:$0xf]  ;;  %v5446_v60 = vld [vmem:[%s7820_s7 + $0x2a4] sm:$0xf0] }
 0x388   : > { %v1210_v10 = vpop.permute.xlu1 %1209  ;;  %v1294_v11 = vld [vmem:[#allocation2 + $0xa8] sm:$0xff]  ;;  %v4910_v31 = vor.u32 %v5385_v18, %v4907_v22  ;;  %v5425_v47 = vld [vmem:[%s7820_s7 + $0x204] sm:$0xf]  ;;  %v5458_v22 = vld [vmem:[%s7820_s7 + $0x30c] sm:$0xf] }
 0x389   : > { %v1213_v13 = vsel %vm841_vm1, %v1210_v10, %v5959_v26  ;;  %1217 = vst.msk [vmem:[#allocation2 + $0x58] sm:$0xf] %vm1033_vm13, %v1210_v10  ;;  %v1295_v14 = vld [vmem:[#allocation2 + $0xb0] sm:$0xff]  ;;  %1337 = vmatpush.bf16.msrb.mxu2 %v1312_v9  ;;  %v1310_v16 = vpack.c.bf16 %v5996_v53, %v1294_v11  ;;  %v5481_v26 = vld [vmem:[%s7820_s7 + $0x3c4] sm:$0xf]  ;;  %v5010_v10 = vor.u32 %v5414_v30, %v5009_v4 }
 0x38a   : > { %1218 = vst [vmem:[#allocation2 + $0x60] sm:$0xf] %v1213_v13  ;;  %v1311_v17 = vpack.c.bf16 %v1297_v61, %v1295_v14  ;;  %2141 = vmatpush.bf16.msra.mxu0 %v4874_v23  ;;  %v5294_v45 = vor.u32 %v5481_v26, %v5291_v27  ;;  %v5365_v53 = vld [vmem:[%s7820_s7 + $0x1c] sm:$0xf0]  ;;  %v5262_v61 = vor.u32 %v5473_v48, %v5259_v49  ;;  %v5457_v9 = vld [vmem:[%s7820_s7 + $0x304] sm:$0xf] }
 0x38b   : > { %2562 = vst [vmem:[#allocation2 + $0xa8] sm:$0xff] %v5516_v5  ;;  %2154 = vmatpush.bf16.msra.mxu1 %v5130_v28  ;;  %v4810_v55 = vor.u32 %v5365_v53, %v4809_v52  ;;  %v5265_v11 = vld [vmem:[%s7820_s7 + $0x388] sm:$0xf]  ;;  %v5195_v13 = vld [vmem:[%s7820_s7 + $0x320] sm:$0xf0] }
 0x38c   : > { %1351 = vmatpush.bf16.msrb.mxu3 %v1311_v17  ;;  %2563 = vst [vmem:[#allocation2 + $0xb0] sm:$0xff] %v5516_v5  ;;  %v5266_v14 = vor.u32 %v5478_v12, %v5265_v11  ;;  %v5233_v17 = vld [vmem:[%s7820_s7 + $0x348] sm:$0xf]  ;;  %v5198_v21 = vor.u32 %v5457_v9, %v5195_v13  ;;  %v5163_v26 = vld [vmem:[%s7820_s7 + $0x2e0] sm:$0xf0] }
 0x38d   : > { %1338 = vmatpush.bf16.msrb.mxu2 %v1310_v16  ;;  %v5406_v16 = vld [vmem:[%s7820_s7 + $0x164] sm:$0xf0]  ;;  %v5234_v27 = vor.u32 %v5470_v20, %v5233_v17  ;;  %v4843_v53 = vld [vmem:[%s7820_s7 + $0x60] sm:$0xf0]  ;;  %v5482_v4 = vld [vmem:[%s7820_s7 + $0x3cc] sm:$0xf] }
 0x38e   : > { %2142 = vmatpush.bf16.msra.mxu0 %v4842_v38  ;;  %v4978_v19 = vor.u32 %v5406_v16, %v4977_v15  ;;  %v4945_v23 = vld [vmem:[%s7820_s7 + $0x108] sm:$0xf]  ;;  %v5410_v9 = vld [vmem:[%s7820_s7 + $0x18c] sm:$0xf] }
 0x38f   : > { %2155 = vmatpush.bf16.msra.mxu1 %v5098_v50  ;;  %v5201_v28 = vld [vmem:[%s7820_s7 + $0x308] sm:$0xf]  ;;  %v4946_v35 = vor.u32 %v5398_v24, %v4945_v23  ;;  %v5369_v50 = vld [vmem:[%s7820_s7 + $0x44] sm:$0xf]  ;;  %v5474_v11 = vld [vmem:[%s7820_s7 + $0x38c] sm:$0xf] }
 0x390   : > { %v1292_v36 = vld [vmem:[#allocation2 + $0x58] sm:$0xff]  ;;  %v4913_v38 = vld [vmem:[%s7820_s7 + $0xc8] sm:$0xf]  ;;  %v5267_v12 = vld [vmem:[%s7820_s7 + $0x3a8] sm:$0xf0] }
 0x391   : > { %v1308_v43 = vpack.c.bf16 %v1292_v36, %v6020_v3  ;;  %2552 = vst [vmem:[#allocation2 + $0x58] sm:$0xff] %v5516_v5  ;;  %v1293_v44 = vld [vmem:[#allocation2 + $0x60] sm:$0xff]  ;;  %v5042_v3 = vor.u32 %v5422_v2, %v5041_v0  ;;  %v5166_v36 = vor.u32 %v5449_v25, %v5163_v26  ;;  %v5361_v0 = vld [vmem:[%s7820_s7 + $0x4] sm:$0xf] }
 0x392   : > { %v1309_v51 = vpack.c.bf16 %v1293_v44, %v6026_v39  ;;  %2553 = vst [vmem:[#allocation2 + $0x60] sm:$0xff] %v5516_v5  ;;  %v5486_v39 = vld [vmem:[%s7820_s7 + $0x3e4] sm:$0xf0]  ;;  %2143 = vmatpush.bf16.msra.mxu0 %v4810_v55  ;;  %v4974_v5 = vor.u32 %v5401_v58, %v4971_v59  ;;  %v5202_v44 = vor.u32 %v5462_v29, %v5201_v28  ;;  %v4811_v2 = vld [vmem:[%s7820_s7 + $0x20] sm:$0xf0] }
 0x393   : > { %1339 = vmatpush.bf16.msrb.mxu2 %v1308_v43  ;;  %v5298_v40 = vor.u32 %v5486_v39, %v5297_v46  ;;  %2156 = vmatpush.bf16.msra.mxu1 %v5066_v63  ;;  %v5131_v43 = vld [vmem:[%s7820_s7 + $0x2a0] sm:$0xf0]  ;;  %v5454_v48 = vld [vmem:[%s7820_s7 + $0x2e4] sm:$0xf0]  ;;  %v5418_v46 = vld [vmem:[%s7820_s7 + $0x1cc] sm:$0xf]  ;;  %v4814_v6 = vor.u32 %v5361_v0, %v4811_v2 }
 0x394   : > { %1352 = vmatpush.bf16.msrb.mxu3 %v1309_v51  ;;  %v4914_v51 = vor.u32 %v5390_v41, %v4913_v38  ;;  %v5134_v52 = vor.u32 %v5441_v42, %v5131_v43  ;;  %v5382_v55 = vld [vmem:[%s7820_s7 + $0xa4] sm:$0xf0]  ;;  %v5043_v39 = vld [vmem:[%s7820_s7 + $0x1e8] sm:$0xf0] }
 0x395   : > { %v5137_v59 = vld [vmem:[%s7820_s7 + $0x288] sm:$0xf]  ;;  %v5046_v30 = vor.u32 %v5418_v46, %v5043_v39  ;;  %v5402_v15 = vld [vmem:[%s7820_s7 + $0x14c] sm:$0xf]  ;;  %v1321_v39 = vpop.permute.xlu0 %1320 }
 0x396   : > { %4805 = vmatmul.msk.bf16.vlgmr.msrb.gmra.mxu2 %vm965_vm2, %v4799_v54  ;;  %2188 = vmatpush.bf16.msrb.mxu0 %v5042_v3  ;;  %v5067_v3 = vld [vmem:[%s7820_s7 + $0x220] sm:$0xf0]  ;;  %v4979_v16 = vld [vmem:[%s7820_s7 + $0x168] sm:$0xf0]  ;;  %v4849_v43 = vld [vmem:[%s7820_s7 + $0x48] sm:$0xf] }
 0x397   : > { %2162 = vmatpush.bf16.msra.mxu2 %v5038_v37  ;;  %4806 = vmatmul.msk.bf16.vlgmr.msrb.gmra.mxu3 %vm965_vm2, %v4799_v54  ;;  %v4875_v37 = vld [vmem:[%s7820_s7 + $0xa0] sm:$0xf0]  ;;  %v4881_v54 = vld [vmem:[%s7820_s7 + $0x88] sm:$0xf]  ;;  %v5070_v7 = vor.u32 %v5425_v47, %v5067_v3  ;;  %v5466_v17 = vld [vmem:[%s7820_s7 + $0x34c] sm:$0xf]  ;;  %v4982_v18 = vor.u32 %v5402_v15, %v4979_v16 }
 0x398   : > { %2175 = vmatpush.bf16.msra.mxu3 %v5294_v45  ;;  %2201 = vmatpush.bf16.msrb.mxu1 %v5298_v40  ;;  %v5169_v45 = vld [vmem:[%s7820_s7 + $0x2c8] sm:$0xf]  ;;  %v4878_v49 = vor.u32 %v5377_v33, %v4875_v37  ;;  %v4882_v62 = vor.u32 %v5382_v55, %v4881_v54  ;;  %v5138_v40 = vor.u32 %v5446_v60, %v5137_v59  ;;  %v5394_v20 = vld [vmem:[%s7820_s7 + $0x10c] sm:$0xf] }
 0x399   : > { %v5170_v58 = vor.u32 %v5454_v48, %v5169_v45  ;;  %v5203_v23 = vld [vmem:[%s7820_s7 + $0x328] sm:$0xf0] }
 0x39a   : > { %2189 = vmatpush.bf16.msrb.mxu0 %v5010_v10  ;;  %v5011_v10 = vld [vmem:[%s7820_s7 + $0x1a8] sm:$0xf0]  ;;  %v5206_v25 = vor.u32 %v5458_v22, %v5203_v23 }
 0x39b   : > { %2163 = vmatpush.bf16.msra.mxu2 %v5006_v57  ;;  %v5099_v57 = vld [vmem:[%s7820_s7 + $0x260] sm:$0xf0]  ;;  %v5014_v13 = vor.u32 %v5410_v9, %v5011_v10  ;;  %v5386_v26 = vld [vmem:[%s7820_s7 + $0xcc] sm:$0xf]  ;;  %v5305_v10 = vld [vmem:[%s7820_s7 + $0x3d0] sm:$0xf] }
 0x39c   : > { %2176 = vmatpush.bf16.msra.mxu3 %v5262_v61  ;;  %2202 = vmatpush.bf16.msrb.mxu1 %v5266_v14  ;;  %v4846_v61 = vor.u32 %v5369_v50, %v4843_v53  ;;  %v5102_v63 = vor.u32 %v5433_v56, %v5099_v57  ;;  %v5270_v14 = vor.u32 %v5474_v11, %v5267_v12  ;;  %v5450_v28 = vld [vmem:[%s7820_s7 + $0x2cc] sm:$0xf]  ;;  %v5105_v50 = vld [vmem:[%s7820_s7 + $0x248] sm:$0xf]  ;;  %v5487_v11 = vld [vmem:[%s7820_s7 + $0x3ec] sm:$0xf0] }
 0x39d   : > { %v5171_v29 = vld [vmem:[%s7820_s7 + $0x2e8] sm:$0xf0]  ;;  %v4817_v57 = vld [vmem:[%s7820_s7 + $0x8] sm:$0xf] }
 0x39e   : > { %2190 = vmatpush.bf16.msrb.mxu0 %v4978_v19  ;;  %v5174_v33 = vor.u32 %v5450_v28, %v5171_v29  ;;  %v5442_v37 = vld [vmem:[%s7820_s7 + $0x28c] sm:$0xf]  ;;  %v5475_v28 = vld [vmem:[%s7820_s7 + $0x394] sm:$0xf] }
 0x39f   : > { %2164 = vmatpush.bf16.msra.mxu2 %v4974_v5  ;;  %v5299_v5 = vld [vmem:[%s7820_s7 + $0x3e8] sm:$0xf0]  ;;  %v5275_v29 = vld [vmem:[%s7820_s7 + $0x3b0] sm:$0xf0] }
 0x3a0   : > { %2177 = vmatpush.bf16.msra.mxu3 %v5230_v8  ;;  %2203 = vmatpush.bf16.msrb.mxu1 %v5234_v27  ;;  %v5302_v8 = vor.u32 %v5482_v4, %v5299_v5  ;;  %v4915_v27 = vld [vmem:[%s7820_s7 + $0xe8] sm:$0xf0]  ;;  %v5049_v4 = vld [vmem:[%s7820_s7 + $0x1d0] sm:$0xf] }
 0x3a1   : > { %v5139_v38 = vld [vmem:[%s7820_s7 + $0x2a8] sm:$0xf0] }
 0x3a2   : > { %2191 = vmatpush.bf16.msrb.mxu0 %v4946_v35  ;;  %v5378_v35 = vld [vmem:[%s7820_s7 + $0x8c] sm:$0xf]  ;;  %v5142_v42 = vor.u32 %v5442_v37, %v5139_v38  ;;  %v4985_v37 = vld [vmem:[%s7820_s7 + $0x150] sm:$0xf] }
 0x3a3   : > { %2165 = vmatpush.bf16.msra.mxu2 %v4942_v1  ;;  %v5235_v1 = vld [vmem:[%s7820_s7 + $0x368] sm:$0xf0] }
 0x3a4   : > { %2178 = vmatpush.bf16.msra.mxu3 %v5198_v21  ;;  %2204 = vmatpush.bf16.msrb.mxu1 %v5202_v44  ;;  %v5238_v19 = vor.u32 %v5466_v17, %v5235_v1  ;;  %v4947_v21 = vld [vmem:[%s7820_s7 + $0x128] sm:$0xf0]  ;;  %v5374_v44 = vld [vmem:[%s7820_s7 + $0x64] sm:$0xf0]  ;;  %v5017_v1 = vld [vmem:[%s7820_s7 + $0x190] sm:$0xf] }
 0x3a5   : > { %v4950_v24 = vor.u32 %v5394_v20, %v4947_v21  ;;  %v5370_v45 = vld [vmem:[%s7820_s7 + $0x4c] sm:$0xf]  ;;  %v4850_v48 = vor.u32 %v5374_v44, %v4849_v43  ;;  %v5411_v20 = vld [vmem:[%s7820_s7 + $0x194] sm:$0xf] }
 0x3a6   : > { %2192 = vmatpush.bf16.msrb.mxu0 %v4914_v51  ;;  %v5438_v51 = vld [vmem:[%s7820_s7 + $0x264] sm:$0xf0]  ;;  %v5434_v54 = vld [vmem:[%s7820_s7 + $0x24c] sm:$0xf]  ;;  %v5019_v21 = vld [vmem:[%s7820_s7 + $0x1b0] sm:$0xf0] }
 0x3a7   : > { %2166 = vmatpush.bf16.msra.mxu2 %v4910_v31  ;;  %v4918_v31 = vor.u32 %v5386_v26, %v4915_v27  ;;  %v5106_v53 = vor.u32 %v5438_v51, %v5105_v50  ;;  %v5107_v55 = vld [vmem:[%s7820_s7 + $0x268] sm:$0xf0]  ;;  %v5273_v26 = vld [vmem:[%s7820_s7 + $0x390] sm:$0xf]  ;;  %v4987_v43 = vld [vmem:[%s7820_s7 + $0x170] sm:$0xf0] }
 0x3a8   : > { %2179 = vmatpush.bf16.msra.mxu3 %v5166_v36  ;;  %2205 = vmatpush.bf16.msrb.mxu1 %v5170_v58  ;;  %v4883_v36 = vld [vmem:[%s7820_s7 + $0xa8] sm:$0xf0]  ;;  %v5110_v56 = vor.u32 %v5434_v54, %v5107_v55  ;;  %v5366_v58 = vld [vmem:[%s7820_s7 + $0x24] sm:$0xf0]  ;;  %v5479_v27 = vld [vmem:[%s7820_s7 + $0x3ac] sm:$0xf0] }
 0x3a9   : > { %v4886_v41 = vor.u32 %v5378_v35, %v4883_v36  ;;  %v5362_v59 = vld [vmem:[%s7820_s7 + $0xc] sm:$0xf]  ;;  %v4818_v60 = vor.u32 %v5366_v58, %v4817_v57  ;;  %v5022_v36 = vor.u32 %v5411_v20, %v5019_v21  ;;  %v5274_v44 = vor.u32 %v5479_v27, %v5273_v26  ;;  %v5467_v50 = vld [vmem:[%s7820_s7 + $0x354] sm:$0xf]  ;;  %v4953_v54 = vld [vmem:[%s7820_s7 + $0x110] sm:$0xf] }
 0x3aa   : > { %2193 = vmatpush.bf16.msrb.mxu0 %v4882_v62  ;;  %v5073_v62 = vld [vmem:[%s7820_s7 + $0x208] sm:$0xf]  ;;  %v5426_v47 = vld [vmem:[%s7820_s7 + $0x20c] sm:$0xf]  ;;  %v5243_v51 = vld [vmem:[%s7820_s7 + $0x370] sm:$0xf0] }
 0x3ab   : > { %2167 = vmatpush.bf16.msra.mxu2 %v4878_v49  ;;  %v4851_v49 = vld [vmem:[%s7820_s7 + $0x68] sm:$0xf0]  ;;  %v5399_v55 = vld [vmem:[%s7820_s7 + $0x12c] sm:$0xf0]  ;;  %v4955_v57 = vld [vmem:[%s7820_s7 + $0x130] sm:$0xf0] }
 0x3ac   : > { %2180 = vmatpush.bf16.msra.mxu3 %v5134_v52  ;;  %2206 = vmatpush.bf16.msrb.mxu1 %v5138_v40  ;;  %v4854_v52 = vor.u32 %v5370_v45, %v4851_v49  ;;  %v5075_v3 = vld [vmem:[%s7820_s7 + $0x228] sm:$0xf0]  ;;  %v5278_v45 = vor.u32 %v5475_v28, %v5275_v29  ;;  %v5471_v49 = vld [vmem:[%s7820_s7 + $0x36c] sm:$0xf0]  ;;  %v4859_v26 = vld [vmem:[%s7820_s7 + $0x70] sm:$0xf0] }
 0x3ad   : > { %v5078_v46 = vor.u32 %v5426_v47, %v5075_v3  ;;  %v4921_v47 = vld [vmem:[%s7820_s7 + $0xd0] sm:$0xf] }
 0x3ae   : > { %2194 = vmatpush.bf16.msrb.mxu0 %v4850_v48  ;;  %v5241_v48 = vld [vmem:[%s7820_s7 + $0x350] sm:$0xf] }
 0x3af   : > { %2168 = vmatpush.bf16.msra.mxu2 %v4846_v61  ;;  %v4819_v61 = vld [vmem:[%s7820_s7 + $0x28] sm:$0xf0]  ;;  %v5242_v58 = vor.u32 %v5471_v49, %v5241_v48  ;;  %v5391_v3 = vld [vmem:[%s7820_s7 + $0xec] sm:$0xf0]  ;;  %v5057_v48 = vld [vmem:[%s7820_s7 + $0x1d8] sm:$0xf] }
 0x3b0   : > { %2181 = vmatpush.bf16.msra.mxu3 %v5102_v63  ;;  %2207 = vmatpush.bf16.msrb.mxu1 %v5106_v53  ;;  %v5430_v63 = vld [vmem:[%s7820_s7 + $0x224] sm:$0xf0]  ;;  %v4822_v0 = vor.u32 %v5362_v59, %v4819_v61  ;;  %v5246_v59 = vor.u32 %v5467_v50, %v5243_v51  ;;  %v5463_v61 = vld [vmem:[%s7820_s7 + $0x32c] sm:$0xf0]  ;;  %v5424_v51 = vld [vmem:[%s7820_s7 + $0x1f4] sm:$0xf0] }
 0x3b1   : > { %v5074_v2 = vor.u32 %v5430_v63, %v5073_v62  ;;  %v5459_v62 = vld [vmem:[%s7820_s7 + $0x314] sm:$0xf]  ;;  %v5113_v29 = vld [vmem:[%s7820_s7 + $0x250] sm:$0xf] }
 0x3b2   : > { %2195 = vmatpush.bf16.msrb.mxu0 %v4818_v60  ;;  %v5209_v60 = vld [vmem:[%s7820_s7 + $0x310] sm:$0xf]  ;;  %v5211_v63 = vld [vmem:[%s7820_s7 + $0x330] sm:$0xf0] }
 0x3b3   : > { %2169 = vmatpush.bf16.msra.mxu2 %v4814_v6 }
 0x3b4   : > { %2182 = vmatpush.bf16.msra.mxu3 %v5070_v7  ;;  %2208 = vmatpush.bf16.msrb.mxu1 %v5074_v2  ;;  %v5423_v7 = vld [vmem:[%s7820_s7 + $0x1ec] sm:$0xf0] }
 0x3b5   : > { %v5050_v16 = vor.u32 %v5423_v7, %v5049_v4  ;;  %v5214_v4 = vor.u32 %v5459_v62, %v5211_v63  ;;  %v5451_v7 = vld [vmem:[%s7820_s7 + $0x2d4] sm:$0xf]  ;;  %v5058_v62 = vor.u32 %v5424_v51, %v5057_v48  ;;  %v5185_v48 = vld [vmem:[%s7820_s7 + $0x2d8] sm:$0xf]  ;;  %v5187_v51 = vld [vmem:[%s7820_s7 + $0x2f8] sm:$0xf0] }
 0x3b7   : > { %2214 = vmatpush.bf16.msrb.mxu2 %v5046_v30  ;;  %v5419_v30 = vld [vmem:[%s7820_s7 + $0x1d4] sm:$0xf] }
 0x3b8   : > { %2227 = vmatpush.bf16.msrb.mxu3 %v5302_v8  ;;  %v5051_v8 = vld [vmem:[%s7820_s7 + $0x1f0] sm:$0xf0] }
 0x3b9   : > { %v5054_v17 = vor.u32 %v5419_v30, %v5051_v8  ;;  %v5179_v30 = vld [vmem:[%s7820_s7 + $0x2f0] sm:$0xf0]  ;;  %v4922_v8 = vor.u32 %v5391_v3, %v4921_v47  ;;  %v5025_v47 = vld [vmem:[%s7820_s7 + $0x198] sm:$0xf] }
 0x3ba   : > { %v5416_v3 = vld [vmem:[%s7820_s7 + $0x1b4] sm:$0xf0] }
 0x3bb   : > { %2215 = vmatpush.bf16.msrb.mxu2 %v5014_v13  ;;  %v5483_v13 = vld [vmem:[%s7820_s7 + $0x3d4] sm:$0xf] }
 0x3bc   : > { %2228 = vmatpush.bf16.msrb.mxu3 %v5270_v14  ;;  %v5307_v14 = vld [vmem:[%s7820_s7 + $0x3f0] sm:$0xf0] }
 0x3bf   : > { %2216 = vmatpush.bf16.msrb.mxu2 %v4982_v18 }
 0x3c0   : > { %2229 = vmatpush.bf16.msrb.mxu3 %v5238_v19  ;;  %v5415_v19 = vld [vmem:[%s7820_s7 + $0x1ac] sm:$0xf0] }
 0x3c1   : > { %v5018_v35 = vor.u32 %v5415_v19, %v5017_v1  ;;  %v5443_v1 = vld [vmem:[%s7820_s7 + $0x294] sm:$0xf] }
 0x3c2   : > { %v5147_v19 = vld [vmem:[%s7820_s7 + $0x2b0] sm:$0xf0] }
 0x3c3   : > { %2217 = vmatpush.bf16.msrb.mxu2 %v4950_v24  ;;  %v5306_v24 = vor.u32 %v5487_v11, %v5305_v10  ;;  %v4889_v10 = vld [vmem:[%s7820_s7 + $0x90] sm:$0xf]  ;;  %v5150_v28 = vor.u32 %v5443_v1, %v5147_v19  ;;  %v5468_v1 = vld [vmem:[%s7820_s7 + $0x35c] sm:$0xf] }
 0x3c4   : > { %2230 = vmatpush.bf16.msrb.mxu3 %v5206_v25  ;;  %v5310_v25 = vor.u32 %v5483_v13, %v5307_v14  ;;  %v5383_v11 = vld [vmem:[%s7820_s7 + $0xac] sm:$0xf0]  ;;  %v4891_v13 = vld [vmem:[%s7820_s7 + $0xb0] sm:$0xf0]  ;;  %v5251_v19 = vld [vmem:[%s7820_s7 + $0x378] sm:$0xf0] }
 0x3c5   : > { %v4890_v20 = vor.u32 %v5383_v11, %v4889_v10  ;;  %v4993_v10 = vld [vmem:[%s7820_s7 + $0x158] sm:$0xf] }
 0x3c6   : > { %v5408_v11 = vld [vmem:[%s7820_s7 + $0x174] sm:$0xf0] }
 0x3c7   : > { %2218 = vmatpush.bf16.msrb.mxu2 %v4918_v31 }
 0x3c8   : > { %2231 = vmatpush.bf16.msrb.mxu3 %v5174_v33 }
 0x3cb   : > { %2219 = vmatpush.bf16.msrb.mxu2 %v4886_v41  ;;  %v5407_v41 = vld [vmem:[%s7820_s7 + $0x16c] sm:$0xf0] }
 0x3cc   : > { %2232 = vmatpush.bf16.msrb.mxu3 %v5142_v42  ;;  %v5403_v42 = vld [vmem:[%s7820_s7 + $0x154] sm:$0xf] }
 0x3cd   : > { %v4990_v53 = vor.u32 %v5403_v42, %v4987_v43  ;;  %v5363_v42 = vld [vmem:[%s7820_s7 + $0x14] sm:$0xf] }
 0x3ce   : > { %v4827_v43 = vld [vmem:[%s7820_s7 + $0x30] sm:$0xf0] }
 0x3cf   : > { %2220 = vmatpush.bf16.msrb.mxu2 %v4854_v52  ;;  %v4986_v52 = vor.u32 %v5407_v41, %v4985_v37  ;;  %v5367_v41 = vld [vmem:[%s7820_s7 + $0x2c] sm:$0xf0] }
 0x3d0   : > { %2233 = vmatpush.bf16.msrb.mxu3 %v5110_v56  ;;  %v5395_v56 = vld [vmem:[%s7820_s7 + $0x114] sm:$0xf] }
 0x3d1   : > { %v4958_v2 = vor.u32 %v5395_v56, %v4955_v57  ;;  %v5313_v56 = vld [vmem:[%s7820_s7 + $0x3d8] sm:$0xf] }
 0x3d3   : > { %2221 = vmatpush.bf16.msrb.mxu2 %v4822_v0  ;;  %v4954_v0 = vor.u32 %v5399_v55, %v4953_v54  ;;  %v5427_v54 = vld [vmem:[%s7820_s7 + $0x214] sm:$0xf] }
 0x3d4   : > { %2234 = vmatpush.bf16.msrb.mxu3 %v5078_v46  ;;  %v5387_v46 = vld [vmem:[%s7820_s7 + $0xd4] sm:$0xf] }
 0x3d5   : > { %v5083_v55 = vld [vmem:[%s7820_s7 + $0x230] sm:$0xf0] }
 0x419   : > { %v1341_v40 = vpop.f32.mrf.mxu2 }
 0x41a   : > { %v1342_v5 = vadd.f32 %v1341_v40, %v1321_v39  ;;  %v1354_v6 = vpop.f32.mrf.mxu3  ;;  %v5210_v40 = vor.u32 %v5463_v61, %v5209_v60  ;;  %v5484_v60 = vld [vmem:[%s7820_s7 + $0x3dc] sm:$0xf] }
 0x41b   : > { %v1355_v9 = vadd.f32 %v1354_v6, %v1321_v39  ;;  %v4923_v39 = vld [vmem:[%s7820_s7 + $0xf0] sm:$0xf0]  ;;  %v5455_v6 = vld [vmem:[%s7820_s7 + $0x2ec] sm:$0xf0]  ;;  %v5315_v61 = vld [vmem:[%s7820_s7 + $0x3f8] sm:$0xf0] }
 0x41c   : > { %v1358_v12 = vmax.f32 %v1342_v5, 0.0  ;;  %v5177_v5 = vld [vmem:[%s7820_s7 + $0x2d0] sm:$0xf] }
 0x41d   : > { %v1359_v15 = vmax.f32 %v1355_v9, 0.0  ;;  %v4926_v9 = vor.u32 %v5387_v46, %v4923_v39  ;;  %v5178_v14 = vor.u32 %v5455_v6, %v5177_v5  ;;  %v5318_v39 = vor.u32 %v5484_v60, %v5315_v61  ;;  %v5281_v5 = vld [vmem:[%s7820_s7 + $0x398] sm:$0xf] }
 0x41e   : > { %v6409_v18 = vpack.c.bf16 %v1358_v12, %v1358_v12  ;;  %v5480_v6 = vld [vmem:[%s7820_s7 + $0x3b4] sm:$0xf0] }
 0x41f   : > { %v1362_v22 = vrot.slane %v1359_v15, 4  ;;  %v6425_v23 = vpack.c.bf16 %v1359_v15, %v1359_v15  ;;  %v5182_v15 = vor.u32 %v5451_v7, %v5179_v30  ;;  %v5476_v7 = vld [vmem:[%s7820_s7 + $0x39c] sm:$0xf]  ;;  %v5153_v60 = vld [vmem:[%s7820_s7 + $0x298] sm:$0xf] }
 0x420   : > { %2144 = vmatmul.bf16.vlgmr.msra.gmra.mxu0 %v6409_v18  ;;  %2170 = vmatmul.bf16.vlgmr.msra.gmra.mxu2 %v6409_v18  ;;  %v5283_v30 = vld [vmem:[%s7820_s7 + $0x3b8] sm:$0xf0]  ;;  %v5448_v61 = vld [vmem:[%s7820_s7 + $0x2b4] sm:$0xf0] }
 0x421   : > { %v1363_v31 = vsel %vm969_vm11, %v1358_v12, %v1362_v22  ;;  %2240 = vmatpush.bf16.msra.mxu0 %v5050_v16  ;;  %2266 = vmatpush.bf16.msra.mxu2 %v5054_v17  ;;  %v1343_v33 = vpop.f32.mrf.mxu2  ;;  %v5379_v12 = vld [vmem:[%s7820_s7 + $0x94] sm:$0xf]  ;;  %v5145_v16 = vld [vmem:[%s7820_s7 + $0x290] sm:$0xf] }
 0x422   : > { %1365 = vst [vmem:[%s585_s20] sm:$0xff] %v1363_v31  ;;  %2157 = vmatmul.bf16.vlgmr.msra.gmra.mxu1 %v6425_v23  ;;  %2183 = vmatmul.bf16.vlgmr.msra.gmra.mxu3 %v6425_v23  ;;  %v1356_v38 = vpop.f32.mrf.mxu3  ;;  %v5447_v17 = vld [vmem:[%s7820_s7 + $0x2ac] sm:$0xf0]  ;;  %v4894_v21 = vor.u32 %v5379_v12, %v4891_v13  ;;  %v5435_v33 = vld [vmem:[%s7820_s7 + $0x254] sm:$0xf]  ;;  %v5282_v12 = vor.u32 %v5480_v6, %v5281_v5  ;;  %v5121_v5 = vld [vmem:[%s7820_s7 + $0x258] sm:$0xf]  ;;  %s6810_s20 = scalar_lea.vmem %s7828_s15, %s5687_s30 }
 0x423   : > { %2253 = vmatpush.bf16.msra.mxu1 %v5306_v24  ;;  %2279 = vmatpush.bf16.msra.mxu3 %v5310_v25  ;;  %v4857_v22 = vld [vmem:[%s7820_s7 + $0x50] sm:$0xf]  ;;  %v5371_v25 = vld [vmem:[%s7820_s7 + $0x54] sm:$0xf]  ;;  %v5146_v27 = vor.u32 %v5447_v17, %v5145_v16  ;;  %v5286_v13 = vor.u32 %v5476_v7, %v5283_v30  ;;  %v5249_v16 = vld [vmem:[%s7820_s7 + $0x358] sm:$0xf] }
 0x424   : > { %v5375_v24 = vld [vmem:[%s7820_s7 + $0x6c] sm:$0xf0]  ;;  %v4862_v38 = vor.u32 %v5371_v25, %v4859_v26  ;;  %v5472_v17 = vld [vmem:[%s7820_s7 + $0x374] sm:$0xf0]  ;;  %v5254_v26 = vor.u32 %v5468_v1, %v5251_v19  ;;  %v5436_v7 = vld [vmem:[%s7820_s7 + $0x25c] sm:$0xf] }
 0x425   : > { %2241 = vmatpush.bf16.msra.mxu0 %v5018_v35  ;;  %2267 = vmatpush.bf16.msra.mxu2 %v5022_v36  ;;  %v5439_v31 = vld [vmem:[%s7820_s7 + $0x26c] sm:$0xf0]  ;;  %v5115_v35 = vld [vmem:[%s7820_s7 + $0x270] sm:$0xf0]  ;;  %v4858_v37 = vor.u32 %v5375_v24, %v4857_v22  ;;  %v4961_v22 = vld [vmem:[%s7820_s7 + $0x118] sm:$0xf]  ;;  %v5250_v25 = vor.u32 %v5472_v17, %v5249_v16 }
 0x426   : > { %v4825_v36 = vld [vmem:[%s7820_s7 + $0x10] sm:$0xf]  ;;  %v5114_v49 = vor.u32 %v5439_v31, %v5113_v29  ;;  %v5118_v50 = vor.u32 %v5435_v33, %v5115_v35  ;;  %v5400_v24 = vld [vmem:[%s7820_s7 + $0x134] sm:$0xf0]  ;;  %v5460_v33 = vld [vmem:[%s7820_s7 + $0x31c] sm:$0xf] }
 0x427   : > { %2254 = vmatpush.bf16.msra.mxu1 %v5274_v44  ;;  %2280 = vmatpush.bf16.msra.mxu3 %v5278_v45  ;;  %v5081_v44 = vld [vmem:[%s7820_s7 + $0x210] sm:$0xf]  ;;  %v4826_v57 = vor.u32 %v5367_v41, %v4825_v36  ;;  %v5217_v29 = vld [vmem:[%s7820_s7 + $0x318] sm:$0xf]  ;;  %v5219_v35 = vld [vmem:[%s7820_s7 + $0x338] sm:$0xf0]  ;;  %v4962_v36 = vor.u32 %v5400_v24, %v4961_v22 }
 0x428   : > { %v5431_v45 = vld [vmem:[%s7820_s7 + $0x22c] sm:$0xf0]  ;;  %v5464_v31 = vld [vmem:[%s7820_s7 + $0x334] sm:$0xf0]  ;;  %v5123_v30 = vld [vmem:[%s7820_s7 + $0x278] sm:$0xf0] }
 0x429   : > { %2242 = vmatpush.bf16.msra.mxu0 %v4986_v52  ;;  %2268 = vmatpush.bf16.msra.mxu2 %v4990_v53  ;;  %v5420_v52 = vld [vmem:[%s7820_s7 + $0x1dc] sm:$0xf]  ;;  %v5392_v41 = vld [vmem:[%s7820_s7 + $0xf4] sm:$0xf0] }
 0x42a   : > { %v5059_v53 = vld [vmem:[%s7820_s7 + $0x1f8] sm:$0xf0]  ;;  %v5440_v6 = vld [vmem:[%s7820_s7 + $0x274] sm:$0xf0] }
 0x42b   : > { %2255 = vmatpush.bf16.msra.mxu1 %v5242_v58  ;;  %2281 = vmatpush.bf16.msra.mxu3 %v5246_v59  ;;  %v4830_v58 = vor.u32 %v5363_v42, %v4827_v43  ;;  %v5488_v59 = vld [vmem:[%s7820_s7 + $0x3f4] sm:$0xf0]  ;;  %v5062_v63 = vor.u32 %v5420_v52, %v5059_v53  ;;  %v5218_v42 = vor.u32 %v5464_v31, %v5217_v29  ;;  %v5428_v1 = vld [vmem:[%s7820_s7 + $0x21c] sm:$0xf]  ;;  %v6793_v31 = vld [vmem:[#allocation2] sm:$0xff] }
 0x42c   : > { %v5314_v46 = vor.u32 %v5488_v59, %v5313_v56  ;;  %v5222_v43 = vor.u32 %v5460_v33, %v5219_v35  ;;  %v4899_v59 = vld [vmem:[%s7820_s7 + $0xb8] sm:$0xf0]  ;;  %v5089_v16 = vld [vmem:[%s7820_s7 + $0x218] sm:$0xf] }
 0x42d   : > { %2243 = vmatpush.bf16.msra.mxu0 %v4954_v0  ;;  %2269 = vmatpush.bf16.msra.mxu2 %v4958_v2  ;;  %v5082_v0 = vor.u32 %v5431_v45, %v5081_v44  ;;  %v5086_v2 = vor.u32 %v5427_v54, %v5083_v55  ;;  %v5388_v44 = vld [vmem:[%s7820_s7 + $0xdc] sm:$0xf]  ;;  %v4897_v54 = vld [vmem:[%s7820_s7 + $0x98] sm:$0xf] }
 0x42e   : > { %v4931_v45 = vld [vmem:[%s7820_s7 + $0xf8] sm:$0xf0]  ;;  %v5384_v55 = vld [vmem:[%s7820_s7 + $0xb4] sm:$0xf0] }
 0x42f   : > { %2256 = vmatpush.bf16.msra.mxu1 %v5210_v40  ;;  %2282 = vmatpush.bf16.msra.mxu3 %v5214_v4  ;;  %v5412_v40 = vld [vmem:[%s7820_s7 + $0x19c] sm:$0xf]  ;;  %v4934_v53 = vor.u32 %v5388_v44, %v4931_v45  ;;  %v5432_v17 = vld [vmem:[%s7820_s7 + $0x234] sm:$0xf0] }
 0x430   : > { %2196 = vmatmul.bf16.vlgmr.msrb.gmra.mxu0 %v6409_v18  ;;  %2222 = vmatmul.bf16.vlgmr.msrb.gmra.mxu2 %v6409_v18  ;;  %v5027_v4 = vld [vmem:[%s7820_s7 + $0x1b8] sm:$0xf0]  ;;  %v5090_v22 = vor.u32 %v5432_v17, %v5089_v16 }
 0x431   : > { %2244 = vmatpush.bf16.msra.mxu0 %v4922_v8  ;;  %2270 = vmatpush.bf16.msra.mxu2 %v4926_v9  ;;  %v5026_v8 = vor.u32 %v5416_v3, %v5025_v47  ;;  %v5030_v9 = vor.u32 %v5412_v40, %v5027_v4  ;;  %v4865_v47 = vld [vmem:[%s7820_s7 + $0x58] sm:$0xf]  ;;  %v5372_v40 = vld [vmem:[%s7820_s7 + $0x5c] sm:$0xf] }
 0x432   : > { %2209 = vmatmul.bf16.vlgmr.msrb.gmra.mxu1 %v6425_v23  ;;  %2235 = vmatmul.bf16.vlgmr.msrb.gmra.mxu3 %v6425_v23  ;;  %v5376_v3 = vld [vmem:[%s7820_s7 + $0x74] sm:$0xf0]  ;;  %v4867_v4 = vld [vmem:[%s7820_s7 + $0x78] sm:$0xf0] }
 0x433   : > { %2257 = vmatpush.bf16.msra.mxu1 %v5178_v14  ;;  %2283 = vmatpush.bf16.msra.mxu3 %v5182_v15  ;;  %v5404_v14 = vld [vmem:[%s7820_s7 + $0x15c] sm:$0xf] }
 0x434   : > { %v4995_v15 = vld [vmem:[%s7820_s7 + $0x178] sm:$0xf0] }
 0x435   : > { %2245 = vmatpush.bf16.msra.mxu0 %v4890_v20  ;;  %2271 = vmatpush.bf16.msra.mxu2 %v4894_v21  ;;  %v4994_v20 = vor.u32 %v5408_v11, %v4993_v10  ;;  %v4998_v21 = vor.u32 %v5404_v14, %v4995_v15  ;;  %v4833_v10 = vld [vmem:[%s7820_s7 + $0x18] sm:$0xf]  ;;  %v5364_v14 = vld [vmem:[%s7820_s7 + $0x1c] sm:$0xf] }
 0x436   : > { %v5368_v11 = vld [vmem:[%s7820_s7 + $0x34] sm:$0xf0]  ;;  %v4835_v15 = vld [vmem:[%s7820_s7 + $0x38] sm:$0xf0] }
 0x437   : > { %2258 = vmatpush.bf16.msra.mxu1 %v5146_v27  ;;  %2284 = vmatpush.bf16.msra.mxu3 %v5150_v28  ;;  %v5396_v27 = vld [vmem:[%s7820_s7 + $0x11c] sm:$0xf] }
 0x438   : > { %v4963_v28 = vld [vmem:[%s7820_s7 + $0x138] sm:$0xf0] }
 0x439   : > { %2246 = vmatpush.bf16.msra.mxu0 %v4858_v37  ;;  %2272 = vmatpush.bf16.msra.mxu2 %v4862_v38  ;;  %v4966_v37 = vor.u32 %v5396_v27, %v4963_v28  ;;  %v4929_v38 = vld [vmem:[%s7820_s7 + $0xd8] sm:$0xf]  ;;  %v5091_v19 = vld [vmem:[%s7820_s7 + $0x238] sm:$0xf0] }
 0x43a   : > { %v4930_v52 = vor.u32 %v5392_v41, %v4929_v38  ;;  %v5094_v24 = vor.u32 %v5428_v1, %v5091_v19  ;;  %v2359_v28 = vld.sshfl [vmem:[#allocation1] sm:$0xff pattern:$0x75316420]  ;;  %v2360_v41 = vld.sshfl [vmem:[#allocation1 + $0x8] sm:$0xff pattern:$0x75316420] }
 0x43b   : > { %2259 = vmatpush.bf16.msra.mxu1 %v5114_v49  ;;  %2285 = vmatpush.bf16.msra.mxu3 %v5118_v50  ;;  %v5456_v49 = vld [vmem:[%s7820_s7 + $0x2f4] sm:$0xf0]  ;;  %v5452_v50 = vld [vmem:[%s7820_s7 + $0x2dc] sm:$0xf] }
 0x43c   : > { %v5186_v56 = vor.u32 %v5456_v49, %v5185_v48  ;;  %v2424_v49 = vand.u32 31, %v5725_v34 }
 0x43d   : > { %2247 = vmatpush.bf16.msra.mxu0 %v4826_v57  ;;  %2273 = vmatpush.bf16.msra.mxu2 %v4830_v58  ;;  %v5190_v57 = vor.u32 %v5452_v50, %v5187_v51  ;;  %v5380_v58 = vld [vmem:[%s7820_s7 + $0x9c] sm:$0xf] }
 0x43e   : > { %vm2526_vm15 = vcmp.ne.s32.totalorder %v2424_v49, 31  ;;  %vm2510_vm1 = vcmp.ne.s32.totalorder %v2424_v49, 0 }
 0x43f   : > { %2260 = vmatpush.bf16.msra.mxu1 %v5082_v0  ;;  %2286 = vmatpush.bf16.msra.mxu3 %v5086_v2  ;;  %v4898_v0 = vor.u32 %v5384_v55, %v4897_v54  ;;  %v4902_v2 = vor.u32 %v5380_v58, %v4899_v59  ;;  %v2361_v55 = vld.sshfl [vmem:[#allocation1 + $0x10] sm:$0xff pattern:$0x75316420]  ;;  %v6819_v34 = vsel %vm2526_vm15, 1.0, %v6793_v31 }
 0x440   : > { %2248 = vmatmul.bf16.vlgmr.msra.gmra.mxu0 %v6409_v18  ;;  %2274 = vmatmul.bf16.vlgmr.msra.gmra.mxu2 %v6409_v18 }
 0x441   : > { %2292 = vmatpush.bf16.msrb.mxu0 %v5058_v62  ;;  %2318 = vmatpush.bf16.msrb.mxu2 %v5062_v63  ;;  %v5444_v62 = vld [vmem:[%s7820_s7 + $0x29c] sm:$0xf] }
 0x442   : > { %2261 = vmatmul.bf16.vlgmr.msra.gmra.mxu1 %v6425_v23  ;;  %2287 = vmatmul.bf16.vlgmr.msra.gmra.mxu3 %v6425_v23  ;;  %v5155_v63 = vld [vmem:[%s7820_s7 + $0x2b8] sm:$0xf0] }
 0x443   : > { %2305 = vmatpush.bf16.msrb.mxu1 %v5314_v46  ;;  %2331 = vmatpush.bf16.msrb.mxu3 %v5318_v39  ;;  %v5154_v46 = vor.u32 %v5448_v61, %v5153_v60  ;;  %v5158_v39 = vor.u32 %v5444_v62, %v5155_v63  ;;  %v2362_v61 = vld.sshfl [vmem:[#allocation1 + $0x18] sm:$0xff pattern:$0x75316420] }
 0x445   : > { %2293 = vmatpush.bf16.msrb.mxu0 %v5026_v8  ;;  %2319 = vmatpush.bf16.msrb.mxu2 %v5030_v9  ;;  %v4866_v8 = vor.u32 %v5376_v3, %v4865_v47  ;;  %v4870_v9 = vor.u32 %v5372_v40, %v4867_v4  ;;  %v6828_v47 = vsel %vm2510_vm1, 1.0, %v6793_v31  ;;  %vm2792_vm1 = vcmask 1043704  }
 0x447   : > { %2306 = vmatpush.bf16.msrb.mxu1 %v5282_v12  ;;  %2332 = vmatpush.bf16.msrb.mxu3 %v5286_v13  ;;  %v5122_v12 = vor.u32 %v5440_v6, %v5121_v5  ;;  %v5126_v13 = vor.u32 %v5436_v7, %v5123_v30  ;;  %v2407_v6 = vadd.s32 256, %v5713_v32  ;;  %v2363_v30 = vld.sshfl [vmem:[#allocation1 + $0x20] sm:$0xff pattern:$0x75316420] }
 0x449   : > { %2294 = vmatpush.bf16.msrb.mxu0 %v4994_v20  ;;  %2320 = vmatpush.bf16.msrb.mxu2 %v4998_v21  ;;  %v4834_v20 = vor.u32 %v5368_v11, %v4833_v10  ;;  %v4838_v21 = vor.u32 %v5364_v14, %v4835_v15  ;;  %v2431_v10 = vand.u32 31, %v2407_v6 }
 0x44b   : > { %2307 = vmatpush.bf16.msrb.mxu1 %v5250_v25  ;;  %2333 = vmatpush.bf16.msrb.mxu3 %v5254_v26  ;;  %v2417_v25 = vand.u32 31, %v5713_v32  ;;  %vm2527_vm13 = vcmp.ne.s32.totalorder %v2431_v10, 31  ;;  %vm2511_vm0 = vcmp.ne.s32.totalorder %v2431_v10, 0 }
 0x44c   : > { %v6848_v1 = vsel %vm2527_vm13, 1.0, %v6793_v31 }
 0x44d   : > { %2295 = vmatpush.bf16.msrb.mxu0 %v4962_v36  ;;  %2321 = vmatpush.bf16.msrb.mxu2 %v4966_v37  ;;  %vm2525_vm10 = vcmp.ne.s32.totalorder %v2417_v25, 31  ;;  %vm2509_vm14 = vcmp.ne.s32.totalorder %v2417_v25, 0  ;;  %v6860_v25 = vsel %vm2511_vm0, 1.0, %v6793_v31  ;;  %vm2723_vm0 = vcmask 261120  }
 0x44e   : > { %v6796_v33 = vsel %vm2525_vm10, 1.0, %v6793_v31  ;;  %v6799_v35 = vsel %vm2509_vm14, 1.0, %v6793_v31  ;;  %vm2740_vm10 = vcmask 1043712  }
 0x44f   : > { %2308 = vmatpush.bf16.msrb.mxu1 %v5218_v42  ;;  %2334 = vmatpush.bf16.msrb.mxu3 %v5222_v43 }
 0x451   : > { %2296 = vmatpush.bf16.msrb.mxu0 %v4930_v52  ;;  %2322 = vmatpush.bf16.msrb.mxu2 %v4934_v53 }
 0x453   : > { %2309 = vmatpush.bf16.msrb.mxu1 %v5186_v56  ;;  %2335 = vmatpush.bf16.msrb.mxu3 %v5190_v57 }
 0x455   : > { %2297 = vmatpush.bf16.msrb.mxu0 %v4898_v0  ;;  %2323 = vmatpush.bf16.msrb.mxu2 %v4902_v2 }
 0x457   : > { %2310 = vmatpush.bf16.msrb.mxu1 %v5154_v46  ;;  %2336 = vmatpush.bf16.msrb.mxu3 %v5158_v39 }
 0x459   : > { %2298 = vmatpush.bf16.msrb.mxu0 %v4866_v8  ;;  %2324 = vmatpush.bf16.msrb.mxu2 %v4870_v9 }
 0x45b   : > { %2311 = vmatpush.bf16.msrb.mxu1 %v5122_v12  ;;  %2337 = vmatpush.bf16.msrb.mxu3 %v5126_v13  ;;  %v2364_v13 = vld.sshfl [vmem:[#allocation1 + $0x28] sm:$0xff pattern:$0x75316420] }
 0x45d   : > { %2299 = vmatpush.bf16.msrb.mxu0 %v4834_v20  ;;  %2325 = vmatpush.bf16.msrb.mxu2 %v4838_v21 }
 0x45f   : > { %2312 = vmatpush.bf16.msrb.mxu1 %v5090_v22  ;;  %2338 = vmatpush.bf16.msrb.mxu3 %v5094_v24 }
 0x460   : > { %2300 = vmatmul.bf16.vlgmr.msrb.gmra.mxu0 %v6409_v18  ;;  %2326 = vmatmul.bf16.vlgmr.msrb.gmra.mxu2 %v6409_v18 }
 0x462   : > { %2313 = vmatmul.bf16.vlgmr.msrb.gmra.mxu1 %v6425_v23  ;;  %2339 = vmatmul.bf16.vlgmr.msrb.gmra.mxu3 %v6425_v23 }
 0x49d   : > { %v2145_v26 = vpop.f32.mrf.mxu0 }
 0x49f   : > { %v2158_v27 = vpop.f32.mrf.mxu1 }
 0x4a0   : > { %v2159_v29 = vadd.f32 %v2158_v27, %v2145_v26  ;;  %v2408_v27 = vadd.s32 384, %v5713_v32 }
 0x4a2   : > { %v2375_v18 = vmul.f32 %v2359_v28, %v2159_v29  ;;  %v2438_v28 = vand.u32 31, %v2408_v27 }
 0x4a3   : > { %v2171_v36 = vpop.f32.mrf.mxu2 }
 0x4a4   : > { %2844 = vst [vmem:[#allocation2 + $0x148] sm:$0xf] %v2375_v18  ;;  %2937 = vrot.lane.b32.xlu2 %v2375_v18, %s5536_s26  ;;  %v2647_v23 = vmul.f32 %v6796_v33, %v2375_v18  ;;  %v2639_v37 = vmul.f32 %v6799_v35, %v2375_v18  ;;  %vm2528_vm4 = vcmp.ne.s32.totalorder %v2438_v28, 31  ;;  %vm2512_vm6 = vcmp.ne.s32.totalorder %v2438_v28, 0 }
 0x4a5   : > { %v2184_v38 = vpop.f32.mrf.mxu3  ;;  %v2147_v42 = vpop.f32.mrf.mxu0 }
 0x4a6   : > { %v2185_v43 = vadd.f32 %v2184_v38, %v2171_v36  ;;  %2893 = vrot.lane.b32.xlu0 %v2647_v23, %s5537_s23  ;;  %2981 = vrot.lane.b32.xlu1 %v2639_v37, %s5538_s24  ;;  %v2365_v36 = vld.sshfl [vmem:[#allocation1 + $0x30] sm:$0xff pattern:$0x75316420]  ;;  %v6873_v38 = vsel %vm2528_vm4, 1.0, %v6793_v31  ;;  %vm2696_vm4 = vcmask 1043720  }
 0x4a7   : > { %v2160_v44 = vpop.f32.mrf.mxu1 }
 0x4a8   : > { %v2376_v45 = vmul.f32 %v2360_v41, %v2185_v43  ;;  %v2366_v43 = vld.sshfl [vmem:[#allocation1 + $0x38] sm:$0xff pattern:$0x75316420] }
 0x4aa   : > { %v2391_v48 = vrot.slane %v2376_v45, 4  ;;  %2845 = vst [vmem:[#allocation2 + $0x150] sm:$0xf] %v2376_v45  ;;  %v2648_v59 = vmul.f32 %v6819_v34, %v2376_v45  ;;  %v2640_v40 = vmul.f32 %v6828_v47, %v2376_v45 }
 0x4ab   : > { %v2173_v50 = vpop.f32.mrf.mxu2 }
 0x4ac   : > { %v2395_v51 = vsel %vm969_vm11, %v2375_v18, %v2391_v48  ;;  %2707 = vrot.lane.b32.xlu2 %v2375_v18, %s5539_s22 }
 0x4ad   : > { %2403 = vst [vmem:[%s6810_s20] sm:$0xff] %v2395_v51  ;;  %v2186_v52 = vpop.f32.mrf.mxu3  ;;  %v2197_v53 = vpop.f32.mrf.mxu0 }
 0x4ae   : > { %2803 = vrot.lane.b32.xlu0 %v2647_v23, %s7853_s28  ;;  %2663 = vrot.lane.b32.xlu1 %v2647_v23, %s5540_s0  ;;  %v6888_v52 = vsel %vm2512_vm6, 1.0, %v6793_v31  ;;  %vm2997_vm6 = vcmask 777216  }
 0x4af   : > { %v2210_v54 = vpop.f32.mrf.mxu1 }
 0x4b0   : > { %v2211_v56 = vadd.f32 %v2210_v54, %v2197_v53 }
 0x4b2   : > { %v2377_v57 = vmul.f32 %v2361_v55, %v2211_v56 }
 0x4b3   : > { %v2223_v58 = vpop.f32.mrf.mxu2 }
 0x4b4   : > { %2846 = vst [vmem:[#allocation2 + $0x158] sm:$0xf] %v2377_v57  ;;  %2852 = vrot.lane.b32.xlu2 %v2639_v37, %s7854_s17  ;;  %v2649_v22 = vmul.f32 %v6848_v1, %v2377_v57  ;;  %v2641_v26 = vmul.f32 %v6860_v25, %v2377_v57 }
 0x4b5   : > { %v2236_v60 = vpop.f32.mrf.mxu3  ;;  %v2199_v62 = vpop.f32.mrf.mxu0 }
 0x4b6   : > { %v2237_v63 = vadd.f32 %v2236_v60, %v2223_v58  ;;  %2939 = vrot.lane.b32.xlu0 %v2376_v45, %s5536_s26  ;;  %2895 = vrot.lane.b32.xlu1 %v2648_v59, %s5537_s23 }
 0x4b7   : > { %v2212_v0 = vpop.f32.mrf.mxu1 }
 0x4b8   : > { %v6825_v2 = vmul.f32 %v2362_v61, %v2237_v63  ;;  %v2410_v0 = vadd.s32 640, %v5713_v32 }
 0x4ba   : > { %v2392_v3 = vrot.slane %v6825_v2, 4  ;;  %2847 = vst [vmem:[#allocation2 + $0x160] sm:$0xf] %v6825_v2  ;;  %v2650_v44 = vmul.f32 %v6873_v38, %v6825_v2  ;;  %v2642_v56 = vmul.f32 %v6888_v52, %v6825_v2 }
 0x4bb   : > { %v2225_v46 = vpop.f32.mrf.mxu2 }
 0x4bc   : > { %v2396_v39 = vsel %vm969_vm11, %v2377_v57, %v2392_v3  ;;  %2759 = vrot.lane.b32.xlu2 %v2639_v37, %s5541_s19 }
 0x4bd   : > { %2404 = vst [vmem:[%s6810_s20 + $0x8] sm:$0xff] %v2396_v39  ;;  %v2238_v4 = vpop.f32.mrf.mxu3  ;;  %v2249_v5 = vpop.f32.mrf.mxu0 }
 0x4be   : > { %2854 = vrot.lane.b32.xlu0 %v2640_v40, %s7854_s17  ;;  %2805 = vrot.lane.b32.xlu1 %v2648_v59, %s7853_s28  ;;  %v2411_v4 = vadd.s32 768, %v5713_v32 }
 0x4bf   : > { %v2262_v7 = vpop.f32.mrf.mxu1 }
 0x4c0   : > { %v2263_v8 = vadd.f32 %v2262_v7, %v2249_v5  ;;  %v2459_v6 = vand.u32 31, %v2411_v4 }
 0x4c2   : > { %v6839_v9 = vmul.f32 %v2363_v30, %v2263_v8  ;;  %vm2515_vm13 = vcmp.ne.s32.totalorder %v2459_v6, 0 }
 0x4c3   : > { %v2275_v11 = vpop.f32.mrf.mxu2  ;;  %v6949_v10 = vsel %vm2515_vm13, 1.0, %v6793_v31  ;;  %vm2531_vm13 = vcmp.ne.s32.totalorder %v2459_v6, 31 }
 0x4c4   : > { %2848 = vst [vmem:[#allocation2 + $0x168] sm:$0xf] %v6839_v9  ;;  %2709 = vrot.lane.b32.xlu2 %v2376_v45, %s5539_s22 }
 0x4c5   : > { %v2288_v12 = vpop.f32.mrf.mxu3  ;;  %v2251_v15 = vpop.f32.mrf.mxu0 }
 0x4c6   : > { %v2289_v14 = vadd.f32 %v2288_v12, %v2275_v11  ;;  %2761 = vrot.lane.b32.xlu0 %v2640_v40, %s5541_s19  ;;  %2665 = vrot.lane.b32.xlu1 %v2648_v59, %s5540_s0  ;;  %v2412_v12 = vadd.s32 896, %v5713_v32 }
 0x4c7   : > { %v2264_v16 = vpop.f32.mrf.mxu1 }
 0x4c8   : > { %v6845_v17 = vmul.f32 %v2364_v13, %v2289_v14 }
 0x4ca   : > { %v2393_v19 = vrot.slane %v6845_v17, 4  ;;  %2849 = vst [vmem:[#allocation2 + $0x170] sm:$0xf] %v6845_v17 }
 0x4cb   : > { %v2277_v21 = vpop.f32.mrf.mxu2 }
 0x4cc   : > { %v2397_v20 = vsel %vm969_vm11, %v6839_v9, %v2393_v19  ;;  %2983 = vrot.lane.b32.xlu2 %v2640_v40, %s5538_s24  ;;  %v2466_v19 = vand.u32 31, %v2412_v12 }
 0x4cd   : > { %2405 = vst [vmem:[%s6810_s20 + $0x10] sm:$0xff] %v2397_v20  ;;  %v2290_v24 = vpop.f32.mrf.mxu3 }
 0x4ce   : > { %2897 = vrot.lane.b32.xlu0 %v2649_v22, %s5537_s23  ;;  %2941 = vrot.lane.b32.xlu1 %v2377_v57, %s5536_s26 }
 0x4d4   : > { %2711 = vrot.lane.b32.xlu2 %v2377_v57, %s5539_s22  ;;  %v2409_v57 = vadd.s32 512, %v5713_v32 }
 0x4d6   : > { %2763 = vrot.lane.b32.xlu0 %v2641_v26, %s5541_s19  ;;  %2985 = vrot.lane.b32.xlu1 %v2641_v26, %s5538_s24  ;;  %v2445_v58 = vand.u32 31, %v2409_v57 }
 0x4d8   : > { %vm2513_vm8 = vcmp.ne.s32.totalorder %v2445_v58, 0  ;;  %vm2529_vm3 = vcmp.ne.s32.totalorder %v2445_v58, 31 }
 0x4d9   : > { %v6905_v59 = vsel %vm2513_vm8, 1.0, %v6793_v31  ;;  %v6908_v60 = vsel %vm2529_vm3, 1.0, %v6793_v31  ;;  %vm2516_vm8 = vcmp.ne.s32.totalorder %v2466_v19, 0  ;;  %vm2953_vm3 = vcmask 785408  }
 0x4da   : > { %v2643_v61 = vmul.f32 %v6905_v59, %v6839_v9  ;;  %v2651_v62 = vmul.f32 %v6908_v60, %v6839_v9  ;;  %v6969_v21 = vsel %vm2516_vm8, 1.0, %v6793_v31  ;;  %vm2775_vm8 = vcmask 252928  }
 0x4dc   : > { %2807 = vrot.lane.b32.xlu2 %v2649_v22, %s7853_s28 }
 0x4dd   : > { %v2301_v29 = vpop.f32.mrf.mxu0 }
 0x4de   : > { %2667 = vrot.lane.b32.xlu0 %v2649_v22, %s5540_s0  ;;  %2856 = vrot.lane.b32.xlu1 %v2641_v26, %s7854_s17 }
 0x4df   : > { %v2314_v18 = vpop.f32.mrf.mxu1 }
 0x4e0   : > { %v2315_v23 = vadd.f32 %v2314_v18, %v2301_v29  ;;  %v6981_v29 = vsel %vm2531_vm13, 1.0, %v6793_v31  ;;  %vm7841_vm13 = vcmask 773120  }
 0x4e2   : > { %v6870_v37 = vmul.f32 %v2365_v36, %v2315_v23 }
 0x4e3   : > { %v2327_v41 = vpop.f32.mrf.mxu2 }
 0x4e4   : > { %2850 = vst [vmem:[#allocation2 + $0x178] sm:$0xf] %v6870_v37  ;;  %2899 = vrot.lane.b32.xlu2 %v2650_v44, %s5537_s23  ;;  %v2645_v11 = vmul.f32 %v6949_v10, %v6870_v37  ;;  %v2653_v23 = vmul.f32 %v6981_v29, %v6870_v37 }
 0x4e5   : > { %v2340_v42 = vpop.f32.mrf.mxu3  ;;  %v2303_v48 = vpop.f32.mrf.mxu0 }
 0x4e6   : > { %v2341_v45 = vadd.f32 %v2340_v42, %v2327_v41  ;;  %2713 = vrot.lane.b32.xlu0 %v6825_v2, %s5539_s22  ;;  %2943 = vrot.lane.b32.xlu1 %v6825_v2, %s5536_s26  ;;  %v2452_v2 = vand.u32 31, %v2410_v0 }
 0x4e7   : > { %v2316_v49 = vpop.f32.mrf.mxu1 }
 0x4e8   : > { %v6879_v50 = vmul.f32 %v2366_v43, %v2341_v45  ;;  %vm2530_vm14 = vcmp.ne.s32.totalorder %v2452_v2, 31  ;;  %vm2514_vm15 = vcmp.ne.s32.totalorder %v2452_v2, 0 }
 0x4e9   : > { %v6925_v46 = vsel %vm2530_vm14, 1.0, %v6793_v31  ;;  %v6937_v5 = vsel %vm2514_vm15, 1.0, %v6793_v31  ;;  %vm2909_vm14 = vcmask 793600   ;;  %vm2532_vm15 = vcmp.ne.s32.totalorder %v2466_v19, 31 }
 0x4ea   : > { %v2394_v51 = vrot.slane %v6879_v50, 4  ;;  %2851 = vst [vmem:[#allocation2 + $0x180] sm:$0xf] %v6879_v50  ;;  %v2652_v39 = vmul.f32 %v6925_v46, %v6845_v17  ;;  %v2644_v7 = vmul.f32 %v6937_v5, %v6845_v17  ;;  %v6978_v28 = vsel %vm2532_vm15, 1.0, %v6793_v31 }
 0x4eb   : > { %v2329_v54 = vpop.f32.mrf.mxu2  ;;  %v6985_v18 = vmul.f32 %v6969_v21, %v6879_v50  ;;  %v2654_v36 = vmul.f32 %v6978_v28, %v6879_v50  ;;  %vm2679_vm15 = vcmask 269312  }
 0x4ec   : > { %v2398_v53 = vsel %vm969_vm11, %v6870_v37, %v2394_v51  ;;  %2858 = vrot.lane.b32.xlu2 %v2642_v56, %s7854_s17 }
 0x4ed   : > { %2406 = vst [vmem:[%s6810_s20 + $0x18] sm:$0xff] %v2398_v53  ;;  %v2342_v55 = vpop.f32.mrf.mxu3 }
 0x4ee   : > { %2809 = vrot.lane.b32.xlu0 %v2650_v44, %s7853_s28  ;;  %2987 = vrot.lane.b32.xlu1 %v2642_v56, %s5538_s24 }
 0x4f4   : > { %2945 = vrot.lane.b32.xlu2 %v6839_v9, %s5536_s26 }
 0x4f6   : > { %2715 = vrot.lane.b32.xlu0 %v6839_v9, %s5539_s22  ;;  %2765 = vrot.lane.b32.xlu1 %v2642_v56, %s5541_s19 }
 0x4fc   : > { %2989 = vrot.lane.b32.xlu2 %v2643_v61, %s5538_s24 }
 0x4fe   : > { %v6915_v63 = vpop.permute.xlu2 %2937  ;;  %2901 = vrot.lane.b32.xlu0 %v2651_v62, %s5537_s23  ;;  %2669 = vrot.lane.b32.xlu1 %v2650_v44, %s5540_s0 }
 0x504   : > { %2671 = vrot.lane.b32.xlu2 %v2651_v62, %s5540_s0 }
 0x506   : > { %v2708_v3 = vpop.permute.xlu2 %2707  ;;  %2860 = vrot.lane.b32.xlu0 %v2643_v61, %s7854_s17  ;;  %2811 = vrot.lane.b32.xlu1 %v2651_v62, %s7853_s28 }
 0x507   : > { %2741 = vst.msk [vmem:[#allocation2 + $0x58] sm:$0xf] %vm2740_vm10, %v2708_v3 }
 0x50c   : > { %2947 = vrot.lane.b32.xlu2 %v6845_v17, %s5536_s26 }
 0x50e   : > { %2767 = vrot.lane.b32.xlu0 %v2643_v61, %s5541_s19  ;;  %v6932_v40 = vpop.permute.xlu2 %2852  ;;  %2903 = vrot.lane.b32.xlu1 %v2652_v39, %s5537_s23  ;;  %v3033_v12 = vld [vmem:[#allocation2 + $0x58] sm:$0xff] }
 0x514   : > { %2813 = vrot.lane.b32.xlu2 %v2652_v39, %s7853_s28 }
 0x516   : > { %2991 = vrot.lane.b32.xlu0 %v2644_v7, %s5538_s24  ;;  %v6943_v30 = vpop.permute.xlu2 %2759  ;;  %2862 = vrot.lane.b32.xlu1 %v2644_v7, %s7854_s17 }
 0x517   : > { %2793 = vst.msk [vmem:[#allocation2 + $0xa8] sm:$0xf] %vm2792_vm1, %v6943_v30 }
 0x518   : > { %v2894_v8 = vpop.permute.xlu0 %2893  ;;  %v2982_v9 = vpop.permute.xlu1 %2981 }
 0x51c   : > { %2949 = vrot.lane.b32.xlu2 %v6870_v37, %s5536_s26 }
 0x51e   : > { %2993 = vrot.lane.b32.xlu0 %v2645_v11, %s5538_s24  ;;  %v2710_v13 = vpop.permute.xlu2 %2709  ;;  %2769 = vrot.lane.b32.xlu1 %v2644_v7, %s5541_s19 }
 0x51f   : > { %v2724_v14 = vsel %vm2723_vm0, %v2708_v3, %v2710_v13 }
 0x520   : > { %2742 = vst [vmem:[#allocation2 + $0x60] sm:$0xf] %v2724_v14  ;;  %v2804_v15 = vpop.permute.xlu0 %2803  ;;  %v2664_v16 = vpop.permute.xlu1 %2663  ;;  %v7033_v14 = vld [vmem:[%s7822_s9] sm:$0x3] }
 0x521   : > { %2835 = vst.msk [vmem:[#allocation2 + $0xf8] sm:$0xf] %vm1061_vm9, %v2804_v15 }
 0x522   : > { %2697 = vst.msk [vmem:[#allocation2 + $0x8] sm:$0xf] %vm2696_vm4, %v2664_v16 }
 0x524   : > { %2864 = vrot.lane.b32.xlu2 %v2645_v11, %s7854_s17 }
 0x526   : > { %2771 = vrot.lane.b32.xlu0 %v2645_v11, %s5541_s19  ;;  %v6963_v32 = vpop.permute.xlu2 %2983  ;;  %2673 = vrot.lane.b32.xlu1 %v2652_v39, %s5540_s0  ;;  %v3041_v39 = vld [vmem:[#allocation2 + $0xa8] sm:$0xff] }
 0x527   : > { %v2998_v20 = vsel %vm2997_vm6, %v2982_v9, %v6963_v32 }
 0x528   : > { %3016 = vst [vmem:[#allocation2 + $0x288] sm:$0xf] %v2998_v20  ;;  %v6971_v22 = vpop.permute.xlu0 %2939  ;;  %v2896_v24 = vpop.permute.xlu1 %2895  ;;  %v3049_v3 = vld [vmem:[#allocation2 + $0xf8] sm:$0xff] }
 0x529   : > { %v2954_v26 = vsel %vm2953_vm3, %v6915_v63, %v6971_v22  ;;  %v2910_v27 = vsel %vm2909_vm14, %v2894_v8, %v2896_v24  ;;  %v3057_v63 = vld [vmem:[#allocation2 + $0x148] sm:$0xff]  ;;  %v3105_v4 = vpack.c.bf16 %v3049_v3, %v3041_v39 }
 0x52a   : > { %2972 = vst [vmem:[#allocation2 + $0x238] sm:$0xf] %v2954_v26  ;;  %v3025_v6 = vld [vmem:[#allocation2 + $0x8] sm:$0xff] }
 0x52b   : > { %2928 = vst [vmem:[#allocation2 + $0x1e8] sm:$0xf] %v2910_v27 }
 0x52c   : > { %2995 = vrot.lane.b32.xlu2 %v6985_v18, %s5538_s24 }
 0x52e   : > { %2907 = vrot.lane.b32.xlu0 %v2654_v36, %s5537_s23  ;;  %v6994_v41 = vpop.permute.xlu2 %2711  ;;  %2905 = vrot.lane.b32.xlu1 %v2653_v23, %s5537_s23 }
 0x52f   : > { %v2725_v31 = vsel %vm2723_vm0, %v2710_v13, %v6994_v41  ;;  %v3089_v42 = vld [vmem:[#allocation2 + $0x288] sm:$0xff]  ;;  %v3097_v13 = vpack.c.bf16 %v3033_v12, %v3025_v6  ;;  %v3034_v6 = vld [vmem:[#allocation2 + $0x60] sm:$0xff] }
 0x530   : > { %2743 = vst [vmem:[#allocation2 + $0x68] sm:$0xf] %v2725_v31  ;;  %v6999_v43 = vpop.permute.xlu0 %2854  ;;  %v2806_v44 = vpop.permute.xlu1 %2805  ;;  %v3129_v45 = vpack.c.bf16 %v3089_v42, %v3089_v42 }
 0x531   : > { %v2868_v48 = vsel %vm884_vm12, %v6932_v40, %v6999_v43  ;;  %v2819_v49 = vsel %vm869_vm7, %v2804_v15, %v2806_v44  ;;  %v3081_v54 = vld [vmem:[#allocation2 + $0x238] sm:$0xff] }
 0x532   : > { %2885 = vst [vmem:[#allocation2 + $0x198] sm:$0xf] %v2868_v48  ;;  %v3146_v51 = vsel %vm969_vm11, %v3129_v45, 0  ;;  %v3073_v53 = vld [vmem:[#allocation2 + $0x1e8] sm:$0xff] }
 0x533   : > { %2836 = vst [vmem:[#allocation2 + $0x100] sm:$0xf] %v2819_v49  ;;  %3172 = vmatpush.bf16.msra.mxu0 %v3146_v51  ;;  %v3121_v55 = vpack.c.bf16 %v3081_v54, %v3073_v53 }
 0x534   : > { %2717 = vrot.lane.b32.xlu2 %v6845_v17, %s5539_s22 }
 0x536   : > { %2866 = vrot.lane.b32.xlu0 %v6985_v18, %s7854_s17  ;;  %v7010_v56 = vpop.permute.xlu2 %2807  ;;  %2951 = vrot.lane.b32.xlu1 %v6879_v50, %s5536_s26 }
 0x537   : > { %v2820_v57 = vsel %vm869_vm7, %v2806_v44, %v7010_v56  ;;  %3173 = vmatpush.bf16.msra.mxu0 %v3121_v55  ;;  %v3058_v55 = vld [vmem:[#allocation2 + $0x150] sm:$0xff] }
 0x538   : > { %2837 = vst [vmem:[#allocation2 + $0x108] sm:$0xf] %v2820_v57  ;;  %v2762_v58 = vpop.permute.xlu0 %2761  ;;  %v2666_v61 = vpop.permute.xlu1 %2665 }
 0x539   : > { %v2776_v17 = vsel %vm2775_vm8, %v6943_v30, %v2762_v58  ;;  %v2680_v62 = vsel %vm2679_vm15, %v2664_v16, %v2666_v61  ;;  %v3065_v0 = vld [vmem:[#allocation2 + $0x198] sm:$0xff] }
 0x53a   : > { %2794 = vst [vmem:[#allocation2 + $0xb0] sm:$0xf] %v2776_v17  ;;  %v3113_v2 = vpack.c.bf16 %v3065_v0, %v3057_v63 }
 0x53b   : > { %2698 = vst [vmem:[#allocation2 + $0x10] sm:$0xf] %v2680_v62  ;;  %v3050_v62 = vld [vmem:[#allocation2 + $0x100] sm:$0xff] }
 0x53c   : > { %2815 = vrot.lane.b32.xlu2 %v2653_v23, %s7853_s28  ;;  %3174 = vmatpush.bf16.msra.mxu0 %v3113_v2 }
 0x53e   : > { %2817 = vrot.lane.b32.xlu0 %v2654_v36, %s7853_s28  ;;  %v7021_v40 = vpop.permute.xlu2 %2899  ;;  %2675 = vrot.lane.b32.xlu1 %v2653_v23, %s5540_s0 }
 0x540   : > { %v2898_v7 = vpop.permute.xlu0 %2897  ;;  %3175 = vmatpush.bf16.msra.mxu0 %v3105_v4  ;;  %v2942_v30 = vpop.permute.xlu1 %2941 }
 0x541   : > { %v2911_v8 = vsel %vm2909_vm14, %v2896_v24, %v2898_v7  ;;  %v2912_v9 = vsel %vm2909_vm14, %v2898_v7, %v7021_v40  ;;  %v2955_v11 = vsel %vm2953_vm3, %v6971_v22, %v2942_v30 }
 0x542   : > { %2929 = vst [vmem:[#allocation2 + $0x1f0] sm:$0xf] %v2911_v8  ;;  %v3026_v4 = vld [vmem:[#allocation2 + $0x10] sm:$0xff] }
 0x543   : > { %2930 = vst [vmem:[#allocation2 + $0x1f8] sm:$0xf] %v2912_v9  ;;  %v3098_v7 = vpack.c.bf16 %v3034_v6, %v3026_v4 }
 0x544   : > { %2973 = vst [vmem:[#allocation2 + $0x240] sm:$0xf] %v2955_v11  ;;  %2677 = vrot.lane.b32.xlu2 %v2654_v36, %s5540_s0  ;;  %3176 = vmatpush.bf16.msra.mxu0 %v3097_v13 }
 0x546   : > { %2719 = vrot.lane.b32.xlu0 %v6870_v37, %s5539_s22  ;;  %v7037_v15 = vpop.permute.xlu2 %2858  ;;  %2773 = vrot.lane.b32.xlu1 %v6985_v18, %s5541_s19  ;;  %v2632_v37 = vld [vmem:[%s7823_s10] sm:$0xf] }
 0x547   : > { %5321 = vmatmul.msk.bf16.vlgmr.msra.gmra.mxu0 %vm965_vm2, %v7033_v14 }
 0x548   : > { %v7043_v16 = vpop.permute.xlu0 %2763  ;;  %v2986_v19 = vpop.permute.xlu1 %2985 }
 0x549   : > { %v2777_v20 = vsel %vm2775_vm8, %v2762_v58, %v7043_v16  ;;  %v2999_v22 = vsel %vm2997_vm6, %v6963_v32, %v2986_v19 }
 0x54a   : > { %2795 = vst [vmem:[#allocation2 + $0xb8] sm:$0xf] %v2777_v20 }
 0x54b   : > { %3017 = vst [vmem:[#allocation2 + $0x290] sm:$0xf] %v2999_v22  ;;  %v3082_v44 = vld [vmem:[#allocation2 + $0x240] sm:$0xff] }
 0x54c   : > { %3139 = vperm.xlu2 %5515, %v2632_v37  }
 0x54e   : > { %v2946_v24 = vpop.permute.xlu2 %2945  ;;  %2721 = vrot.lane.b32.xlu1 %v6879_v50, %s5539_s22  ;;  %v3074_v50 = vld [vmem:[#allocation2 + $0x1f0] sm:$0xff] }
 0x54f   : > { %v3122_v51 = vpack.c.bf16 %v3082_v44, %v3074_v50 }
 0x550   : > { %v7054_v26 = vpop.permute.xlu0 %2667  ;;  %v2857_v27 = vpop.permute.xlu1 %2856 }
 0x551   : > { %v2681_v18 = vsel %vm2679_vm15, %v2666_v61, %v7054_v26  ;;  %v2869_v32 = vsel %vm884_vm12, %v6999_v43, %v2857_v27  ;;  %v2870_v36 = vsel %vm884_vm12, %v2857_v27, %v7037_v15  ;;  %v3042_v61 = vld [vmem:[#allocation2 + $0xb0] sm:$0xff] }
 0x552   : > { %2699 = vst [vmem:[#allocation2 + $0x18] sm:$0xf] %v2681_v18  ;;  %v3090_v23 = vld [vmem:[#allocation2 + $0x290] sm:$0xff]  ;;  %v3106_v2 = vpack.c.bf16 %v3050_v62, %v3042_v61 }
 0x553   : > { %2886 = vst [vmem:[#allocation2 + $0x1a0] sm:$0xf] %v2869_v32  ;;  %v3130_v31 = vpack.c.bf16 %v3090_v23, %v3090_v23  ;;  %v3075_v32 = vld [vmem:[#allocation2 + $0x1f8] sm:$0xff] }
 0x554   : > { %2887 = vst [vmem:[#allocation2 + $0x1a8] sm:$0xf] %v2870_v36 }
 0x555   : > { %v3149_v42 = vsel %vm969_vm11, %v3130_v31, 0 }
 0x556   : > { %3185 = vmatpush.bf16.msra.mxu1 %v3149_v42  ;;  %v7063_v45 = vpop.permute.xlu2 %2989 }
 0x558   : > { %v2714_v48 = vpop.permute.xlu0 %2713  ;;  %v2944_v49 = vpop.permute.xlu1 %2943 }
 0x559   : > { %v2726_v43 = vsel %vm2723_vm0, %v6994_v41, %v2714_v48  ;;  %v2956_v53 = vsel %vm2953_vm3, %v2942_v30, %v2944_v49  ;;  %v2957_v54 = vsel %vm2953_vm3, %v2944_v49, %v2946_v24 }
 0x55a   : > { %2744 = vst [vmem:[#allocation2 + $0x70] sm:$0xf] %v2726_v43  ;;  %3186 = vmatpush.bf16.msra.mxu1 %v3122_v51  ;;  %v3066_v57 = vld [vmem:[#allocation2 + $0x1a0] sm:$0xff]  ;;  %v3043_v51 = vld [vmem:[#allocation2 + $0xb8] sm:$0xff] }
 0x55b   : > { %2974 = vst [vmem:[#allocation2 + $0x248] sm:$0xf] %v2956_v53  ;;  %v3114_v58 = vpack.c.bf16 %v3066_v57, %v3058_v55  ;;  %v3067_v44 = vld [vmem:[#allocation2 + $0x1a8] sm:$0xff] }
 0x55c   : > { %2975 = vst [vmem:[#allocation2 + $0x250] sm:$0xf] %v2957_v54  ;;  %v3051_v53 = vld [vmem:[#allocation2 + $0x108] sm:$0xff] }
 0x55d   : > { %v3107_v55 = vpack.c.bf16 %v3051_v53, %v3043_v51 }
 0x55e   : > { %3187 = vmatpush.bf16.msra.mxu1 %v3114_v58  ;;  %v7069_v17 = vpop.permute.xlu2 %2671 }
 0x560   : > { %v2810_v63 = vpop.permute.xlu0 %2809  ;;  %v2988_v0 = vpop.permute.xlu1 %2987 }
 0x561   : > { %v2821_v41 = vsel %vm869_vm7, %v7010_v56, %v2810_v63  ;;  %v3000_v3 = vsel %vm2997_vm6, %v2986_v19, %v2988_v0  ;;  %v3001_v39 = vsel %vm2997_vm6, %v2988_v0, %v7063_v45 }
 0x562   : > { %2838 = vst [vmem:[#allocation2 + $0x110] sm:$0xf] %v2821_v41  ;;  %3188 = vmatpush.bf16.msra.mxu1 %v3106_v2  ;;  %v3027_v2 = vld [vmem:[#allocation2 + $0x18] sm:$0xff] }
 0x563   : > { %3018 = vst [vmem:[#allocation2 + $0x298] sm:$0xf] %v3000_v3  ;;  %v3084_v0 = vld [vmem:[#allocation2 + $0x250] sm:$0xff]  ;;  %v3035_v3 = vld [vmem:[#allocation2 + $0x68] sm:$0xff] }
 0x564   : > { %3019 = vst [vmem:[#allocation2 + $0x2a0] sm:$0xf] %v3001_v39  ;;  %v3099_v39 = vpack.c.bf16 %v3035_v3, %v3027_v2 }
 0x566   : > { %3189 = vmatpush.bf16.msra.mxu1 %v3098_v7  ;;  %v2948_v30 = vpop.permute.xlu2 %2947 }
 0x567   : > { %v2958_v8 = vsel %vm2953_vm3, %v2946_v24, %v2948_v30  ;;  %v3083_v24 = vld [vmem:[#allocation2 + $0x248] sm:$0xff] }
 0x568   : > { %2976 = vst [vmem:[#allocation2 + $0x258] sm:$0xf] %v2958_v8  ;;  %v7077_v9 = vpop.permute.xlu0 %2715  ;;  %v2766_v56 = vpop.permute.xlu1 %2765  ;;  %v3123_v31 = vpack.c.bf16 %v3083_v24, %v3075_v32 }
 0x569   : > { %v2727_v11 = vsel %vm2723_vm0, %v2714_v48, %v7077_v9  ;;  %5322 = vmatmul.msk.bf16.vlgmr.msra.gmra.mxu1 %vm965_vm2, %v7033_v14  ;;  %v2778_v12 = vsel %vm2775_vm8, %v7043_v16, %v2766_v56  ;;  %v3059_v48 = vld [vmem:[#allocation2 + $0x158] sm:$0xff] }
 0x56a   : > { %2745 = vst [vmem:[#allocation2 + $0x78] sm:$0xf] %v2727_v11  ;;  %v3091_v13 = vld [vmem:[#allocation2 + $0x298] sm:$0xff]  ;;  %v3115_v49 = vpack.c.bf16 %v3067_v44, %v3059_v48 }
 0x56b   : > { %2796 = vst [vmem:[#allocation2 + $0xc0] sm:$0xf] %v2778_v12  ;;  %v3131_v19 = vpack.c.bf16 %v3091_v13, %v3091_v13  ;;  %v3092_v20 = vld [vmem:[#allocation2 + $0x2a0] sm:$0xff]  ;;  %v3052_v13 = vld [vmem:[#allocation2 + $0x110] sm:$0xff] }
 0x56c   : > { %v3132_v22 = vpack.c.bf16 %v3092_v20, %v3092_v20 }
 0x56d   : > { %v3152_v37 = vsel %vm969_vm11, %v3131_v19, 0 }
 0x56e   : > { %3198 = vmatpush.bf16.msra.mxu2 %v3152_v37  ;;  %v3155_v27 = vsel %vm969_vm11, %v3132_v22, 0  ;;  %v7087_v18 = vpop.permute.xlu2 %2813 }
 0x56f   : > { %3211 = vmatpush.bf16.msra.mxu3 %v3155_v27 }
 0x570   : > { %v2902_v36 = vpop.permute.xlu0 %2901  ;;  %v2670_v23 = vpop.permute.xlu1 %2669 }
 0x571   : > { %v2913_v16 = vsel %vm2909_vm14, %v7021_v40, %v2902_v36  ;;  %v2682_v42 = vsel %vm2679_vm15, %v7054_v26, %v2670_v23  ;;  %v2683_v50 = vsel %vm2679_vm15, %v2670_v23, %v7069_v17 }
 0x572   : > { %2931 = vst [vmem:[#allocation2 + $0x200] sm:$0xf] %v2913_v16  ;;  %3199 = vmatpush.bf16.msra.mxu2 %v3123_v31  ;;  %v3044_v12 = vld [vmem:[#allocation2 + $0xc0] sm:$0xff] }
 0x573   : > { %2700 = vst [vmem:[#allocation2 + $0x20] sm:$0xf] %v2682_v42  ;;  %v3108_v20 = vpack.c.bf16 %v3052_v13, %v3044_v12 }
 0x574   : > { %2701 = vst [vmem:[#allocation2 + $0x28] sm:$0xf] %v2683_v50 }
 0x576   : > { %3200 = vmatpush.bf16.msra.mxu2 %v3115_v49  ;;  %v7095_v43 = vpop.permute.xlu2 %2949 }
 0x577   : > { %v2959_v40 = vsel %vm2953_vm3, %v2948_v30, %v7095_v43  ;;  %v3060_v30 = vld [vmem:[#allocation2 + $0x160] sm:$0xff] }
 0x578   : > { %2977 = vst [vmem:[#allocation2 + $0x260] sm:$0xf] %v2959_v40  ;;  %v2861_v26 = vpop.permute.xlu0 %2860  ;;  %v2812_v54 = vpop.permute.xlu1 %2811 }
 0x579   : > { %v2871_v57 = vsel %vm884_vm12, %v7037_v15, %v2861_v26  ;;  %v2822_v58 = vsel %vm869_vm7, %v2810_v63, %v2812_v54  ;;  %v2823_v61 = vsel %vm869_vm7, %v2812_v54, %v7087_v18  ;;  %v3076_v62 = vld [vmem:[#allocation2 + $0x200] sm:$0xff] }
 0x57a   : > { %2888 = vst [vmem:[#allocation2 + $0x1b0] sm:$0xf] %v2871_v57  ;;  %3201 = vmatpush.bf16.msra.mxu2 %v3107_v55  ;;  %v3124_v41 = vpack.c.bf16 %v3084_v0, %v3076_v62  ;;  %v3085_v57 = vld [vmem:[#allocation2 + $0x258] sm:$0xff] }
 0x57b   : > { %2839 = vst [vmem:[#allocation2 + $0x118] sm:$0xf] %v2822_v58 }
 0x57c   : > { %2840 = vst [vmem:[#allocation2 + $0x120] sm:$0xf] %v2823_v61  ;;  %3212 = vmatpush.bf16.msra.mxu3 %v3124_v41 }
 0x57e   : > { %3202 = vmatpush.bf16.msra.mxu2 %v3099_v39  ;;  %v7104_v4 = vpop.permute.xlu2 %2864 }
 0x580   : > { %v2768_v15 = vpop.permute.xlu0 %2767  ;;  %v7106_v6 = vpop.permute.xlu1 %2903 }
 0x581   : > { %v2779_v63 = vsel %vm2775_vm8, %v2766_v56, %v2768_v15  ;;  %5323 = vmatmul.msk.bf16.vlgmr.msra.gmra.mxu2 %vm965_vm2, %v7033_v14  ;;  %v2914_v7 = vsel %vm2909_vm14, %v2902_v36, %v7106_v6  ;;  %v3068_v8 = vld [vmem:[#allocation2 + $0x1b0] sm:$0xff]  ;;  %v3028_v56 = vld [vmem:[#allocation2 + $0x20] sm:$0xff] }
 0x582   : > { %2797 = vst [vmem:[#allocation2 + $0xc8] sm:$0xf] %v2779_v63  ;;  %v3116_v11 = vpack.c.bf16 %v3068_v8, %v3060_v30  ;;  %v3036_v36 = vld [vmem:[#allocation2 + $0x70] sm:$0xff] }
 0x583   : > { %2932 = vst [vmem:[#allocation2 + $0x208] sm:$0xf] %v2914_v7  ;;  %v3100_v23 = vpack.c.bf16 %v3036_v36, %v3028_v56 }
 0x584   : > { %3213 = vmatpush.bf16.msra.mxu3 %v3116_v11 }
 0x586   : > { %v2996_v19 = vpop.permute.xlu2 %2995 }
 0x587   : > { %3024 = vst.msk [vmem:[#allocation2 + $0x2c0] sm:$0xf] %vm7841_vm13, %v2996_v19  ;;  %vm7842_vm13 = vcmask 789504  }
 0x588   : > { %v2992_v22 = vpop.permute.xlu0 %2991  ;;  %3214 = vmatpush.bf16.msra.mxu3 %v3108_v20  ;;  %v2863_v37 = vpop.permute.xlu1 %2862 }
 0x589   : > { %v3002_v24 = vsel %vm2997_vm6, %v7063_v45, %v2992_v22  ;;  %v2872_v27 = vsel %vm884_vm12, %v2861_v26, %v2863_v37  ;;  %v2873_v32 = vsel %vm884_vm12, %v2863_v37, %v7104_v4  ;;  %v3045_v11 = vld [vmem:[#allocation2 + $0xc8] sm:$0xff] }
 0x58a   : > { %3020 = vst [vmem:[#allocation2 + $0x2a8] sm:$0xf] %v3002_v24  ;;  %v3077_v54 = vld [vmem:[#allocation2 + $0x208] sm:$0xff] }
 0x58b   : > { %2889 = vst [vmem:[#allocation2 + $0x1b8] sm:$0xf] %v2872_v27  ;;  %v3125_v61 = vpack.c.bf16 %v3085_v57, %v3077_v54  ;;  %v3037_v27 = vld [vmem:[#allocation2 + $0x78] sm:$0xff] }
 0x58c   : > { %2890 = vst [vmem:[#allocation2 + $0x1c0] sm:$0xf] %v2873_v32  ;;  %3215 = vmatpush.bf16.msra.mxu3 %v3100_v23 }
 0x58e   : > { %v7119_v31 = vpop.permute.xlu2 %2717  ;;  %v3096_v16 = vld [vmem:[#allocation2 + $0x2c0] sm:$0xff] }
 0x58f   : > { %v2728_v42 = vsel %vm2723_vm0, %v7077_v9, %v7119_v31  ;;  %5324 = vmatmul.msk.bf16.vlgmr.msra.gmra.mxu3 %vm965_vm2, %v7033_v14  ;;  %v3136_v45 = vpack.c.bf16 %v3096_v16, %v3096_v16 }
 0x590   : > { %2746 = vst [vmem:[#allocation2 + $0x80] sm:$0xf] %v2728_v42  ;;  %v2994_v50 = vpop.permute.xlu0 %2993  ;;  %v2770_v44 = vpop.permute.xlu1 %2769 }
 0x591   : > { %v3003_v48 = vsel %vm2997_vm6, %v2992_v22, %v2994_v50  ;;  %v3004_v49 = vsel %vm2997_vm6, %v2994_v50, %v2996_v19  ;;  %v2780_v51 = vsel %vm2775_vm8, %v2768_v15, %v2770_v44  ;;  %v3167_v40 = vsel %vm969_vm11, %v3136_v45, 0  ;;  %v3093_v53 = vld [vmem:[#allocation2 + $0x2a8] sm:$0xff]  ;;  %v3086_v45 = vld [vmem:[#allocation2 + $0x260] sm:$0xff] }
 0x592   : > { %3021 = vst [vmem:[#allocation2 + $0x2b0] sm:$0xf] %v3003_v48  ;;  %3263 = vmatpush.bf16.msrb.mxu3 %v3167_v40  ;;  %v3133_v26 = vpack.c.bf16 %v3093_v53, %v3093_v53  ;;  %v3069_v2 = vld [vmem:[#allocation2 + $0x1b8] sm:$0xff]  ;;  %v3061_v15 = vld [vmem:[#allocation2 + $0x168] sm:$0xff]  ;;  %v3062_v48 = vld [vmem:[#allocation2 + $0x170] sm:$0xff] }
 0x593   : > { %3022 = vst [vmem:[#allocation2 + $0x2b8] sm:$0xf] %v3004_v49  ;;  %v3029_v22 = vld [vmem:[#allocation2 + $0x28] sm:$0xff] }
 0x594   : > { %2798 = vst [vmem:[#allocation2 + $0xd0] sm:$0xf] %v2780_v51  ;;  %v3158_v9 = vsel %vm969_vm11, %v3133_v26, 0  ;;  %v3101_v32 = vpack.c.bf16 %v3037_v27, %v3029_v22 }
 0x595   : > { %3224 = vmatpush.bf16.msrb.mxu0 %v3158_v9  ;;  %v3054_v9 = vld [vmem:[#allocation2 + $0x120] sm:$0xff] }
 0x596   : > { %v7131_v55 = vpop.permute.xlu2 %2815 }
 0x597   : > { %v2824_v58 = vsel %vm869_vm7, %v7087_v18, %v7131_v55  ;;  %v3117_v18 = vpack.c.bf16 %v3069_v2, %v3061_v15 }
 0x598   : > { %2841 = vst [vmem:[#allocation2 + $0x128] sm:$0xf] %v2824_v58  ;;  %v7136_v62 = vpop.permute.xlu0 %2771  ;;  %v2674_v0 = vpop.permute.xlu1 %2673 }
 0x599   : > { %v2781_v41 = vsel %vm2775_vm8, %v2770_v44, %v7136_v62  ;;  %v2684_v3 = vsel %vm2679_vm15, %v7069_v17, %v2674_v0  ;;  %3225 = vmatpush.bf16.msrb.mxu0 %v3125_v61  ;;  %v3094_v39 = vld [vmem:[#allocation2 + $0x2b0] sm:$0xff]  ;;  %v3053_v17 = vld [vmem:[#allocation2 + $0x118] sm:$0xff]  ;;  %v3070_v44 = vld [vmem:[#allocation2 + $0x1c0] sm:$0xff] }
 0x59a   : > { %2799 = vst [vmem:[#allocation2 + $0xd8] sm:$0xf] %v2781_v41  ;;  %v3134_v63 = vpack.c.bf16 %v3094_v39, %v3094_v39  ;;  %v3095_v7 = vld [vmem:[#allocation2 + $0x2b8] sm:$0xff]  ;;  %v3109_v19 = vpack.c.bf16 %v3053_v17, %v3045_v11  ;;  %v3118_v49 = vpack.c.bf16 %v3070_v44, %v3062_v48 }
 0x59b   : > { %2702 = vst [vmem:[#allocation2 + $0x30] sm:$0xf] %v2684_v3  ;;  %v3135_v30 = vpack.c.bf16 %v3095_v7, %v3095_v7  ;;  %v3046_v51 = vld [vmem:[#allocation2 + $0xd0] sm:$0xff]  ;;  %v3063_v7 = vld [vmem:[#allocation2 + $0x178] sm:$0xff] }
 0x59c   : > { %v3161_v8 = vsel %vm969_vm11, %v3134_v63, 0  ;;  %v3110_v54 = vpack.c.bf16 %v3054_v9, %v3046_v51  ;;  %v3038_v63 = vld [vmem:[#allocation2 + $0x80] sm:$0xff] }
 0x59d   : > { %3226 = vmatpush.bf16.msrb.mxu0 %v3117_v18  ;;  %3237 = vmatpush.bf16.msrb.mxu1 %v3161_v8  ;;  %v3164_v12 = vsel %vm969_vm11, %v3135_v30, 0  ;;  %v3064_v18 = vld [vmem:[#allocation2 + $0x180] sm:$0xff] }
 0x59e   : > { %3250 = vmatpush.bf16.msrb.mxu2 %v3164_v12  ;;  %v2678_v13 = vpop.permute.xlu2 %2677 }
 0x5a0   : > { %v2908_v20 = vpop.permute.xlu0 %2907  ;;  %v2906_v56 = vpop.permute.xlu1 %2905 }
 0x5a1   : > { %2936 = vst.msk [vmem:[#allocation2 + $0x220] sm:$0xf] %vm7842_vm13, %v2908_v20  ;;  %v2915_v37 = vsel %vm2909_vm14, %v7106_v6, %v2906_v56  ;;  %v2916_v24 = vsel %vm2909_vm14, %v2906_v56, %v2908_v20  ;;  %3227 = vmatpush.bf16.msrb.mxu0 %v3109_v19  ;;  %vm7843_vm13 = vcmask 781312   ;;  %v3055_v20 = vld [vmem:[#allocation2 + $0x128] sm:$0xff] }
 0x5a2   : > { %2933 = vst [vmem:[#allocation2 + $0x210] sm:$0xf] %v2915_v37  ;;  %v3030_v3 = vld [vmem:[#allocation2 + $0x30] sm:$0xff] }
 0x5a3   : > { %2934 = vst [vmem:[#allocation2 + $0x218] sm:$0xf] %v2916_v24 }
 0x5a5   : > { %3228 = vmatpush.bf16.msrb.mxu0 %v3101_v32 }
 0x5a8   : > { %v2867_v36 = vpop.permute.xlu0 %2866  ;;  %5325 = vmatmul.msk.bf16.vlgmr.msrb.gmra.mxu0 %vm965_vm2, %v7033_v14  ;;  %v2952_v23 = vpop.permute.xlu1 %2951  ;;  %v3080_v61 = vld [vmem:[#allocation2 + $0x220] sm:$0xff] }
 0x5a9   : > { %v2874_v16 = vsel %vm884_vm12, %v7104_v4, %v2867_v36  ;;  %2892 = vst.msk [vmem:[#allocation2 + $0x1d0] sm:$0xf] %vm1079_vm5, %v2867_v36  ;;  %v2960_v6 = vsel %vm2953_vm3, %v7095_v43, %v2952_v23  ;;  %v3078_v42 = vld [vmem:[#allocation2 + $0x210] sm:$0xff] }
 0x5aa   : > { %2891 = vst [vmem:[#allocation2 + $0x1c8] sm:$0xf] %v2874_v16  ;;  %v3126_v50 = vpack.c.bf16 %v3086_v45, %v3078_v42  ;;  %v3079_v57 = vld [vmem:[#allocation2 + $0x218] sm:$0xff] }
 0x5ab   : > { %2978 = vst [vmem:[#allocation2 + $0x268] sm:$0xf] %v2960_v6 }
 0x5ac   : > { %2980 = vst.msk [vmem:[#allocation2 + $0x270] sm:$0xf] %vm7843_vm13, %v2952_v23  ;;  %3238 = vmatpush.bf16.msrb.mxu1 %v3126_v50 }
 0x5b0   : > { %v2818_v40 = vpop.permute.xlu0 %2817  ;;  %3239 = vmatpush.bf16.msrb.mxu1 %v3118_v49  ;;  %v2676_v4 = vpop.permute.xlu1 %2675 }
 0x5b1   : > { %v2825_v53 = vsel %vm869_vm7, %v7131_v55, %v2818_v40  ;;  %v2685_v43 = vsel %vm2679_vm15, %v2674_v0, %v2676_v4  ;;  %v2686_v26 = vsel %vm2679_vm15, %v2676_v4, %v2678_v13  ;;  %v3071_v15 = vld [vmem:[#allocation2 + $0x1c8] sm:$0xff]  ;;  %v3072_v55 = vld [vmem:[#allocation2 + $0x1d0] sm:$0xff]  ;;  %v3102_v0 = vpack.c.bf16 %v3038_v63, %v3030_v3  ;;  %v3047_v13 = vld [vmem:[#allocation2 + $0xd8] sm:$0xff] }
 0x5b2   : > { %2842 = vst [vmem:[#allocation2 + $0x130] sm:$0xf] %v2825_v53  ;;  %v3087_v58 = vld [vmem:[#allocation2 + $0x268] sm:$0xff]  ;;  %v3119_v30 = vpack.c.bf16 %v3071_v15, %v3063_v7  ;;  %v3120_v8 = vpack.c.bf16 %v3072_v55, %v3064_v18  ;;  %v3111_v56 = vpack.c.bf16 %v3055_v20, %v3047_v13 }
 0x5b3   : > { %2703 = vst [vmem:[#allocation2 + $0x38] sm:$0xf] %v2685_v43  ;;  %v3088_v2 = vld [vmem:[#allocation2 + $0x270] sm:$0xff]  ;;  %v3127_v41 = vpack.c.bf16 %v3087_v58, %v3079_v57 }
 0x5b4   : > { %2704 = vst [vmem:[#allocation2 + $0x40] sm:$0xf] %v2686_v26  ;;  %v3128_v39 = vpack.c.bf16 %v3088_v2, %v3080_v61  ;;  %3240 = vmatpush.bf16.msrb.mxu1 %v3110_v54 }
 0x5b5   : > { %3251 = vmatpush.bf16.msrb.mxu2 %v3127_v41 }
 0x5b6   : > { %3264 = vmatpush.bf16.msrb.mxu3 %v3128_v39 }
 0x5b8   : > { %v2720_v11 = vpop.permute.xlu0 %2719  ;;  %3241 = vmatpush.bf16.msrb.mxu1 %v3102_v0  ;;  %v2774_v12 = vpop.permute.xlu1 %2773 }
 0x5b9   : > { %v2729_v17 = vsel %vm2723_vm0, %v7119_v31, %v2720_v11  ;;  %3252 = vmatpush.bf16.msrb.mxu2 %v3119_v30  ;;  %v2782_v19 = vsel %vm2775_vm8, %v7136_v62, %v2774_v12  ;;  %v7167_v31 = vpop.permute.xlu2 %3139  ;;  %v3056_v62 = vld [vmem:[#allocation2 + $0x130] sm:$0xff] }
 0x5ba   : > { %3265 = vmatpush.bf16.msrb.mxu3 %v3120_v8  ;;  %2747 = vst [vmem:[#allocation2 + $0x88] sm:$0xf] %v2729_v17  ;;  %v3031_v24 = vld [vmem:[#allocation2 + $0x38] sm:$0xff] }
 0x5bb   : > { %2800 = vst [vmem:[#allocation2 + $0xe0] sm:$0xf] %v2782_v19  ;;  %5326 = vmatmul.msk.bf16.vlgmr.msrb.gmra.mxu1 %vm965_vm2, %v7033_v14  ;;  %v3032_v45 = vld [vmem:[#allocation2 + $0x40] sm:$0xff] }
 0x5bd   : > { %3253 = vmatpush.bf16.msrb.mxu2 %v3111_v56 }
 0x5c0   : > { %v2722_v22 = vpop.permute.xlu1 %2721 }
 0x5c1   : > { %v2730_v37 = vsel %vm2723_vm0, %v2720_v11, %v2722_v22  ;;  %v3039_v27 = vld [vmem:[#allocation2 + $0x88] sm:$0xff] }
 0x5c2   : > { %2748 = vst [vmem:[#allocation2 + $0x90] sm:$0xf] %v2730_v37  ;;  %v3103_v32 = vpack.c.bf16 %v3039_v27, %v3031_v24  ;;  %v3048_v36 = vld [vmem:[#allocation2 + $0xe0] sm:$0xff] }
 0x5c3   : > { %v3112_v23 = vpack.c.bf16 %v3056_v62, %v3048_v36 }
 0x5c4   : > { %v3178_v16 = vpop.f32.mrf.mxu0  ;;  %3254 = vmatpush.bf16.msrb.mxu2 %v3103_v32 }
 0x5c5   : > { %v3179_v6 = vadd.f32 %v3178_v16, %v7167_v31  ;;  %3266 = vmatpush.bf16.msrb.mxu3 %v3112_v23 }
 0x5c7   : > { %v3273_v42 = vmax.f32 %v3179_v6, 0.0  ;;  %5327 = vmatmul.msk.bf16.vlgmr.msrb.gmra.mxu2 %vm965_vm2, %v7033_v14 }
 0x5c9   : > { %3485 = vst [vmem:[#allocation2 + $0x148] sm:$0xf] %v3273_v42  ;;  %3354 = vrot.lane.b32.xlu0 %v3273_v42, %s5539_s22  ;;  %v3040_v50 = vld [vmem:[#allocation2 + $0x90] sm:$0xff]  ;;  %3575 = vrot.lane.b32.xlu1 %v3273_v42, %s5536_s26  ;;  %v3289_v44 = vmul.f32 %v3273_v42, %v6796_v33  ;;  %v3281_v51 = vmul.f32 %v3273_v42, %v6799_v35 }
 0x5ca   : > { %v3104_v48 = vpack.c.bf16 %v3040_v50, %v3032_v45 }
 0x5cb   : > { %3534 = vrot.lane.b32.xlu2 %v3289_v44, %s5537_s23 }
 0x5cc   : > { %3267 = vmatpush.bf16.msrb.mxu3 %v3104_v48  ;;  %v3180_v49 = vpop.f32.mrf.mxu0 }
 0x5cf   : > { %5328 = vmatmul.msk.bf16.vlgmr.msrb.gmra.mxu3 %vm965_vm2, %v7033_v14 }
 0x5d1   : > { %3616 = vrot.lane.b32.xlu0 %v3281_v51, %s5538_s24 }
 0x5d3   : > { %3403 = vrot.lane.b32.xlu2 %v3281_v51, %s5541_s19 }
 0x5d9   : > { %3493 = vrot.lane.b32.xlu0 %v3281_v51, %s7854_s17 }
 0x5db   : > { %3305 = vrot.lane.b32.xlu2 %v3289_v44, %s5540_s0 }
 0x5e1   : > { %3444 = vrot.lane.b32.xlu0 %v3289_v44, %s7853_s28 }
 0x5e6   : > { %v3191_v40 = vpop.f32.mrf.mxu1 }
 0x5e7   : > { %v3192_v4 = vadd.f32 %v3191_v40, %v7167_v31 }
 0x5e9   : > { %v3274_v53 = vmax.f32 %v3192_v4, 0.0 }
 0x5eb   : > { %3486 = vst [vmem:[#allocation2 + $0x150] sm:$0xf] %v3274_v53  ;;  %3356 = vrot.lane.b32.xlu0 %v3274_v53, %s5539_s22  ;;  %v3282_v43 = vmul.f32 %v3274_v53, %v6828_v47  ;;  %3577 = vrot.lane.b32.xlu2 %v3274_v53, %s5536_s26  ;;  %v3290_v26 = vmul.f32 %v3274_v53, %v6819_v34 }
 0x5ed   : > { %3618 = vrot.lane.b32.xlu1 %v3282_v43, %s5538_s24 }
 0x5ee   : > { %v3193_v14 = vpop.f32.mrf.mxu1 }
 0x5f3   : > { %3536 = vrot.lane.b32.xlu0 %v3290_v26, %s5537_s23 }
 0x5f5   : > { %3495 = vrot.lane.b32.xlu1 %v3282_v43, %s7854_s17 }
 0x5fb   : > { %3405 = vrot.lane.b32.xlu0 %v3282_v43, %s5541_s19 }
 0x603   : > { %3446 = vrot.lane.b32.xlu0 %v3290_v26, %s7853_s28 }
 0x604   : > { %v3204_v9 = vpop.f32.mrf.mxu2 }
 0x605   : > { %v3205_v54 = vadd.f32 %v3204_v9, %v7167_v31 }
 0x607   : > { %v3275_v57 = vmax.f32 %v3205_v54, 0.0 }
 0x609   : > { %3487 = vst [vmem:[#allocation2 + $0x158] sm:$0xf] %v3275_v57  ;;  %3579 = vrot.lane.b32.xlu1 %v3275_v57, %s5536_s26  ;;  %v3283_v58 = vmul.f32 %v3275_v57, %v6860_v25  ;;  %v3291_v39 = vmul.f32 %v3275_v57, %v6848_v1 }
 0x60b   : > { %3307 = vrot.lane.b32.xlu0 %v3290_v26, %s5540_s0  ;;  %3620 = vrot.lane.b32.xlu2 %v3283_v58, %s5538_s24 }
 0x60c   : > { %v3206_v61 = vpop.f32.mrf.mxu2 }
 0x611   : > { %3358 = vrot.lane.b32.xlu1 %v3275_v57, %s5539_s22 }
 0x612   : > { %v3217_v2 = vpop.f32.mrf.mxu3 }
 0x613   : > { %v3218_v41 = vadd.f32 %v3217_v2, %v7167_v31 }
 0x615   : > { %v3276_v3 = vmax.f32 %v3218_v41, 0.0 }
 0x617   : > { %3488 = vst [vmem:[#allocation2 + $0x160] sm:$0xf] %v3276_v3  ;;  %3581 = vrot.lane.b32.xlu2 %v3276_v3, %s5536_s26  ;;  %v3292_v63 = vmul.f32 %v3276_v3, %v6873_v38  ;;  %v3284_v30 = vmul.f32 %v3276_v3, %v6888_v52 }
 0x619   : > { %3538 = vrot.lane.b32.xlu1 %v3291_v39, %s5537_s23 }
 0x61a   : > { %v3219_v15 = vpop.f32.mrf.mxu3 }
 0x61f   : > { %3360 = vrot.lane.b32.xlu2 %v3276_v3, %s5539_s22 }
 0x621   : > { %3497 = vrot.lane.b32.xlu1 %v3283_v58, %s7854_s17 }
 0x625   : > { %v3230_v55 = vpop.f32.mrf.mxu0  ;;  %v7207_v0 = vpop.permute.xlu2 %3534 }
 0x626   : > { %v3231_v7 = vadd.f32 %v3230_v55, %v7167_v31 }
 0x627   : > { %3540 = vrot.lane.b32.xlu2 %v3292_v63, %s5537_s23 }
 0x628   : > { %v3277_v18 = vmax.f32 %v3231_v7, 0.0 }
 0x629   : > { %3407 = vrot.lane.b32.xlu1 %v3283_v58, %s5541_s19 }
 0x62a   : > { %3489 = vst [vmem:[#allocation2 + $0x168] sm:$0xf] %v3277_v18  ;;  %3583 = vrot.lane.b32.xlu0 %v3277_v18, %s5536_s26  ;;  %v3293_v17 = vmul.f32 %v3277_v18, %v6908_v60  ;;  %v3285_v37 = vmul.f32 %v3277_v18, %v6905_v59 }
 0x62d   : > { %v3232_v8 = vpop.f32.mrf.mxu0  ;;  %v7214_v11 = vpop.permute.xlu2 %3403 }
 0x62e   : > { %3435 = vst.msk [vmem:[#allocation2 + $0xa8] sm:$0xf] %vm2792_vm1, %v7214_v11 }
 0x62f   : > { %3499 = vrot.lane.b32.xlu2 %v3284_v30, %s7854_s17 }
 0x631   : > { %3448 = vrot.lane.b32.xlu1 %v3291_v39, %s7853_s28 }
 0x632   : > { %3622 = vrot.lane.b32.xlu0 %v3284_v30, %s5538_s24 }
 0x635   : > { %v7221_v12 = vpop.permute.xlu2 %3305 }
 0x636   : > { %3337 = vst.msk [vmem:[#allocation2 + $0x8] sm:$0xf] %vm2696_vm4, %v7221_v12 }
 0x637   : > { %3409 = vrot.lane.b32.xlu2 %v3284_v30, %s5541_s19 }
 0x638   : > { %v3243_v13 = vpop.f32.mrf.mxu1 }
 0x639   : > { %3309 = vrot.lane.b32.xlu1 %v3291_v39, %s5540_s0  ;;  %v3244_v19 = vadd.f32 %v3243_v13, %v7167_v31 }
 0x63a   : > { %3542 = vrot.lane.b32.xlu0 %v3293_v17, %s5537_s23 }
 0x63b   : > { %v7230_v20 = vmax.f32 %v3244_v19, 0.0  ;;  %v3355_v56 = vpop.permute.xlu0 %3354  ;;  %v3576_v22 = vpop.permute.xlu1 %3575 }
 0x63c   : > { %3386 = vst.msk [vmem:[#allocation2 + $0x58] sm:$0xf] %vm2740_vm10, %v3355_v56 }
 0x63d   : > { %3490 = vst [vmem:[#allocation2 + $0x170] sm:$0xf] %v7230_v20  ;;  %v3286_v49 = vmul.f32 %v7230_v20, %v6937_v5  ;;  %v7273_v43 = vmul.f32 %v7230_v20, %v6925_v46 }
 0x63f   : > { %3450 = vrot.lane.b32.xlu2 %v3292_v63, %s7853_s28 }
 0x640   : > { %v3245_v24 = vpop.f32.mrf.mxu1 }
 0x641   : > { %3362 = vrot.lane.b32.xlu1 %v3277_v18, %s5539_s22 }
 0x642   : > { %3501 = vrot.lane.b32.xlu0 %v3285_v37, %s7854_s17 }
 0x643   : > { %v3617_v27 = vpop.permute.xlu0 %3616 }
 0x645   : > { %v7238_v32 = vpop.permute.xlu2 %3577 }
 0x646   : > { %v3591_v36 = vsel %vm2953_vm3, %v3576_v22, %v7238_v32 }
 0x647   : > { %3311 = vrot.lane.b32.xlu2 %v3292_v63, %s5540_s0  ;;  %3608 = vst [vmem:[#allocation2 + $0x238] sm:$0xf] %v3591_v36  ;;  %v3673_v36 = vld [vmem:[#allocation2 + $0xa8] sm:$0xff] }
 0x649   : > { %3624 = vrot.lane.b32.xlu1 %v3285_v37, %s5538_s24 }
 0x64a   : > { %3411 = vrot.lane.b32.xlu0 %v3285_v37, %s5541_s19  ;;  %v3256_v62 = vpop.f32.mrf.mxu2 }
 0x64b   : > { %v3257_v23 = vadd.f32 %v3256_v62, %v7167_v31  ;;  %v3494_v16 = vpop.permute.xlu0 %3493 }
 0x64d   : > { %v7246_v6 = vmax.f32 %v3257_v23, 0.0  ;;  %v3657_v23 = vld [vmem:[#allocation2 + $0x8] sm:$0xff] }
 0x64e   : > { %v3713_v18 = vld [vmem:[#allocation2 + $0x238] sm:$0xff] }
 0x64f   : > { %3491 = vst [vmem:[#allocation2 + $0x178] sm:$0xf] %v7246_v6  ;;  %3585 = vrot.lane.b32.xlu2 %v7230_v20, %s5536_s26  ;;  %v7290_v57 = vmul.f32 %v7246_v6, %v6981_v29  ;;  %v3287_v63 = vmul.f32 %v7246_v6, %v6949_v10 }
 0x651   : > { %3452 = vrot.lane.b32.xlu1 %v3293_v17, %s7853_s28 }
 0x652   : > { %3313 = vrot.lane.b32.xlu0 %v3293_v17, %s5540_s0  ;;  %v3269_v42 = vpop.f32.mrf.mxu3  ;;  %v3258_v45 = vpop.f32.mrf.mxu2 }
 0x653   : > { %v3270_v50 = vadd.f32 %v3269_v42, %v7167_v31  ;;  %v3445_v44 = vpop.permute.xlu0 %3444 }
 0x654   : > { %3476 = vst.msk [vmem:[#allocation2 + $0xf8] sm:$0xf] %vm1061_vm9, %v3445_v44 }
 0x655   : > { %v7255_v48 = vmax.f32 %v3270_v50, 0.0 }
 0x657   : > { %3492 = vst [vmem:[#allocation2 + $0x180] sm:$0xf] %v7255_v48  ;;  %3589 = vrot.lane.b32.xlu2 %v7255_v48, %s5536_s26  ;;  %v3288_v31 = vmul.f32 %v7255_v48, %v6969_v21  ;;  %v7278_v26 = vmul.f32 %v7255_v48, %v6978_v28 }
 0x659   : > { %3626 = vrot.lane.b32.xlu1 %v3286_v49, %s5538_s24 }
 0x65a   : > { %3503 = vrot.lane.b32.xlu0 %v3286_v49, %s7854_s17  ;;  %v3271_v51 = vpop.f32.mrf.mxu3 }
 0x65b   : > { %v3681_v37 = vld [vmem:[#allocation2 + $0xf8] sm:$0xff] }
 0x65c   : > { %v3737_v62 = vpack.c.bf16 %v3681_v37, %v3673_v36 }
 0x65d   : > { %v7264_v40 = vpop.permute.xlu0 %3356 }
 0x65e   : > { %v3370_v4 = vsel %vm2723_vm0, %v3355_v56, %v7264_v40 }
 0x65f   : > { %3387 = vst [vmem:[#allocation2 + $0x60] sm:$0xf] %v3370_v4  ;;  %v3619_v53 = vpop.permute.xlu1 %3618  ;;  %3630 = vrot.lane.b32.xlu2 %v3288_v31, %s5538_s24 }
 0x660   : > { %v3632_v14 = vsel %vm2997_vm6, %v3617_v27, %v3619_v53 }
 0x661   : > { %3649 = vst [vmem:[#allocation2 + $0x288] sm:$0xf] %v3632_v14  ;;  %3544 = vrot.lane.b32.xlu1 %v7273_v43, %s5537_s23 }
 0x662   : > { %3548 = vrot.lane.b32.xlu0 %v7278_v26, %s5537_s23 }
 0x665   : > { %v7284_v9 = vpop.permute.xlu0 %3536  ;;  %v7286_v54 = vpop.permute.xlu2 %3620 }
 0x666   : > { %v3550_v58 = vsel %vm2909_vm14, %v7207_v0, %v7284_v9  ;;  %v3633_v61 = vsel %vm2997_vm6, %v3619_v53, %v7286_v54 }
 0x667   : > { %3567 = vst [vmem:[#allocation2 + $0x1e8] sm:$0xf] %v3550_v58  ;;  %v7297_v2 = vpop.permute.xlu1 %3495  ;;  %3546 = vrot.lane.b32.xlu2 %v7290_v57, %s5537_s23 }
 0x668   : > { %3650 = vst [vmem:[#allocation2 + $0x290] sm:$0xf] %v3633_v61  ;;  %v3509_v41 = vsel %vm884_vm12, %v3494_v16, %v7297_v2  ;;  %v3721_v3 = vld [vmem:[#allocation2 + $0x288] sm:$0xff]  ;;  %v3665_v16 = vld [vmem:[#allocation2 + $0x58] sm:$0xff] }
 0x669   : > { %3526 = vst [vmem:[#allocation2 + $0x198] sm:$0xf] %v3509_v41  ;;  %3413 = vrot.lane.b32.xlu1 %v3286_v49, %s5541_s19  ;;  %v3761_v39 = vpack.c.bf16 %v3721_v3, %v3721_v3  ;;  %v3729_v50 = vpack.c.bf16 %v3665_v16, %v3657_v23 }
 0x66a   : > { %3507 = vrot.lane.b32.xlu0 %v3288_v31, %s7854_s17 }
 0x66b   : > { %v3778_v15 = vsel %vm969_vm11, %v3761_v39, 0 }
 0x66c   : > { %3804 = vmatpush.bf16.msra.mxu0 %v3778_v15 }
 0x66d   : > { %v7306_v55 = vpop.permute.xlu0 %3405 }
 0x66e   : > { %v3419_v0 = vsel %vm2775_vm8, %v7214_v11, %v7306_v55  ;;  %v3705_v7 = vld [vmem:[#allocation2 + $0x1e8] sm:$0xff] }
 0x66f   : > { %3436 = vst [vmem:[#allocation2 + $0xb0] sm:$0xf] %v3419_v0  ;;  %3505 = vrot.lane.b32.xlu2 %v3287_v63, %s7854_s17  ;;  %v3753_v30 = vpack.c.bf16 %v3713_v18, %v3705_v7  ;;  %v3722_v8 = vld [vmem:[#allocation2 + $0x290] sm:$0xff]  ;;  %v3689_v11 = vld [vmem:[#allocation2 + $0x148] sm:$0xff] }
 0x670   : > { %v3762_v13 = vpack.c.bf16 %v3722_v8, %v3722_v8  ;;  %v3697_v17 = vld [vmem:[#allocation2 + $0x198] sm:$0xff]  ;;  %v3690_v7 = vld [vmem:[#allocation2 + $0x150] sm:$0xff] }
 0x671   : > { %3587 = vrot.lane.b32.xlu1 %v7246_v6, %s5536_s26  ;;  %3805 = vmatpush.bf16.msra.mxu0 %v3753_v30  ;;  %v7316_v19 = vpop.permute.xlu2 %3581  ;;  %v3745_v22 = vpack.c.bf16 %v3697_v17, %v3689_v11 }
 0x672   : > { %v3781_v56 = vsel %vm969_vm11, %v3762_v13, 0  ;;  %3417 = vrot.lane.b32.xlu0 %v3288_v31, %s5541_s19  ;;  %v7339_v31 = vld [vmem:[%s7824_s11] sm:$0x3] }
 0x673   : > { %3817 = vmatpush.bf16.msra.mxu1 %v3781_v56 }
 0x675   : > { %v7320_v24 = vpop.permute.xlu0 %3446  ;;  %3806 = vmatpush.bf16.msra.mxu0 %v3745_v22 }
 0x676   : > { %v3460_v27 = vsel %vm869_vm7, %v3445_v44, %v7320_v24  ;;  %v3674_v17 = vld [vmem:[#allocation2 + $0xb0] sm:$0xff] }
 0x677   : > { %3477 = vst [vmem:[#allocation2 + $0x100] sm:$0xf] %v3460_v27  ;;  %3415 = vrot.lane.b32.xlu2 %v3287_v63, %s5541_s19 }
 0x679   : > { %3628 = vrot.lane.b32.xlu1 %v3287_v63, %s5538_s24  ;;  %3807 = vmatpush.bf16.msra.mxu0 %v3737_v62  ;;  %v7326_v42 = vpop.permute.xlu2 %3360 }
 0x67a   : > { %3458 = vrot.lane.b32.xlu0 %v7278_v26, %s7853_s28 }
 0x67b   : > { %v3580_v45 = vpop.permute.xlu1 %3579 }
 0x67c   : > { %v3592_v44 = vsel %vm2953_vm3, %v7238_v32, %v3580_v45  ;;  %v3593_v49 = vsel %vm2953_vm3, %v3580_v45, %v7316_v19 }
 0x67d   : > { %3609 = vst [vmem:[#allocation2 + $0x240] sm:$0xf] %v3592_v44  ;;  %v7334_v51 = vpop.permute.xlu0 %3307  ;;  %3808 = vmatpush.bf16.msra.mxu0 %v3729_v50 }
 0x67e   : > { %3610 = vst [vmem:[#allocation2 + $0x248] sm:$0xf] %v3593_v49  ;;  %v3321_v4 = vsel %vm2679_vm15, %v7221_v12, %v7334_v51  ;;  %v3682_v13 = vld [vmem:[#allocation2 + $0x100] sm:$0xff] }
 0x67f   : > { %3338 = vst [vmem:[#allocation2 + $0x10] sm:$0xf] %v3321_v4  ;;  %3456 = vrot.lane.b32.xlu2 %v7290_v57, %s7853_s28  ;;  %v3738_v11 = vpack.c.bf16 %v3682_v13, %v3674_v17 }
 0x680   : > { %5329 = vmatmul.msk.bf16.vlgmr.msra.gmra.mxu0 %vm965_vm2, %v7339_v31 }
 0x681   : > { %3454 = vrot.lane.b32.xlu1 %v7273_v43, %s7853_s28  ;;  %v7350_v32 = vpop.permute.xlu2 %3540 }
 0x682   : > { %3319 = vrot.lane.b32.xlu0 %v7278_v26, %s5540_s0 }
 0x683   : > { %v3359_v53 = vpop.permute.xlu1 %3358 }
 0x684   : > { %v3371_v14 = vsel %vm2723_vm0, %v7264_v40, %v3359_v53  ;;  %v3372_v12 = vsel %vm2723_vm0, %v3359_v53, %v7326_v42  ;;  %v3714_v3 = vld [vmem:[#allocation2 + $0x240] sm:$0xff] }
 0x685   : > { %3388 = vst [vmem:[#allocation2 + $0x68] sm:$0xf] %v3371_v14 }
 0x686   : > { %3389 = vst [vmem:[#allocation2 + $0x70] sm:$0xf] %v3372_v12 }
 0x687   : > { %3317 = vrot.lane.b32.xlu2 %v7290_v57, %s5540_s0 }
 0x689   : > { %3315 = vrot.lane.b32.xlu1 %v7273_v43, %s5540_s0  ;;  %v7362_v58 = vpop.permute.xlu2 %3499 }
 0x68a   : > { %3368 = vrot.lane.b32.xlu0 %v7255_v48, %s5539_s22 }
 0x68b   : > { %v3539_v26 = vpop.permute.xlu1 %3538 }
 0x68c   : > { %v3551_v40 = vsel %vm2909_vm14, %v7284_v9, %v3539_v26  ;;  %v3552_v61 = vsel %vm2909_vm14, %v3539_v26, %v7350_v32 }
 0x68d   : > { %3568 = vst [vmem:[#allocation2 + $0x1f0] sm:$0xf] %v3551_v40  ;;  %v3715_v40 = vld [vmem:[#allocation2 + $0x248] sm:$0xff] }
 0x68e   : > { %3569 = vst [vmem:[#allocation2 + $0x1f8] sm:$0xf] %v3552_v61 }
 0x68f   : > { %3366 = vrot.lane.b32.xlu2 %v7246_v6, %s5539_s22  ;;  %v2634_v6 = vld [vmem:[%s7825_s12] sm:$0xf] }
 0x691   : > { %3364 = vrot.lane.b32.xlu1 %v7230_v20, %s5539_s22  ;;  %v7374_v43 = vpop.permute.xlu2 %3409 }
 0x693   : > { %v3498_v57 = vpop.permute.xlu1 %3497 }
 0x694   : > { %v3510_v48 = vsel %vm884_vm12, %v7297_v2, %v3498_v57  ;;  %v3511_v9 = vsel %vm884_vm12, %v3498_v57, %v7362_v58  ;;  %v3706_v41 = vld [vmem:[#allocation2 + $0x1f0] sm:$0xff] }
 0x695   : > { %3527 = vst [vmem:[#allocation2 + $0x1a0] sm:$0xf] %v3510_v48  ;;  %v3754_v39 = vpack.c.bf16 %v3714_v3, %v3706_v41  ;;  %v3707_v26 = vld [vmem:[#allocation2 + $0x1f8] sm:$0xff] }
 0x696   : > { %3528 = vst [vmem:[#allocation2 + $0x1a8] sm:$0xf] %v3511_v9  ;;  %v3755_v57 = vpack.c.bf16 %v3715_v40, %v3707_v26  ;;  %v3691_v41 = vld [vmem:[#allocation2 + $0x158] sm:$0xff] }
 0x697   : > { %3818 = vmatpush.bf16.msra.mxu1 %v3754_v39 }
 0x699   : > { %3771 = vperm.xlu1 %5513, %v2634_v6   ;;  %v7383_v20 = vpop.permute.xlu2 %3450 }
 0x69b   : > { %v3408_v15 = vpop.permute.xlu1 %3407 }
 0x69c   : > { %v3420_v2 = vsel %vm2775_vm8, %v7306_v55, %v3408_v15  ;;  %v3421_v63 = vsel %vm2775_vm8, %v3408_v15, %v7374_v43  ;;  %v3584_v0 = vpop.permute.xlu0 %3583  ;;  %v3698_v18 = vld [vmem:[#allocation2 + $0x1a0] sm:$0xff]  ;;  %v3658_v55 = vld [vmem:[#allocation2 + $0x10] sm:$0xff] }
 0x69d   : > { %3437 = vst [vmem:[#allocation2 + $0xb8] sm:$0xf] %v3420_v2  ;;  %v3594_v30 = vsel %vm2953_vm3, %v7316_v19, %v3584_v0  ;;  %v3746_v8 = vpack.c.bf16 %v3698_v18, %v3690_v7  ;;  %v3666_v19 = vld [vmem:[#allocation2 + $0x60] sm:$0xff]  ;;  %v3699_v9 = vld [vmem:[#allocation2 + $0x1a8] sm:$0xff] }
 0x69e   : > { %3438 = vst [vmem:[#allocation2 + $0xc0] sm:$0xf] %v3421_v63  ;;  %v3730_v23 = vpack.c.bf16 %v3666_v19, %v3658_v55  ;;  %v3747_v3 = vpack.c.bf16 %v3699_v9, %v3691_v41  ;;  %v3667_v18 = vld [vmem:[#allocation2 + $0x68] sm:$0xff] }
 0x69f   : > { %3611 = vst [vmem:[#allocation2 + $0x250] sm:$0xf] %v3594_v30  ;;  %3819 = vmatpush.bf16.msra.mxu1 %v3746_v8 }
 0x6a1   : > { %v7391_v56 = vpop.permute.xlu2 %3311 }
 0x6a3   : > { %3820 = vmatpush.bf16.msra.mxu1 %v3738_v11  ;;  %v3449_v22 = vpop.permute.xlu1 %3448 }
 0x6a4   : > { %v3461_v37 = vsel %vm869_vm7, %v7320_v24, %v3449_v22  ;;  %v3462_v27 = vsel %vm869_vm7, %v3449_v22, %v7383_v20  ;;  %v3623_v36 = vpop.permute.xlu0 %3622 }
 0x6a5   : > { %3478 = vst [vmem:[#allocation2 + $0x108] sm:$0xf] %v3461_v37  ;;  %v3634_v62 = vsel %vm2997_vm6, %v7286_v54, %v3623_v36 }
 0x6a6   : > { %3479 = vst [vmem:[#allocation2 + $0x110] sm:$0xf] %v3462_v27 }
 0x6a7   : > { %3651 = vst [vmem:[#allocation2 + $0x298] sm:$0xf] %v3634_v62  ;;  %3821 = vmatpush.bf16.msra.mxu1 %v3730_v23 }
 0x6a9   : > { %v7399_v16 = vpop.permute.xlu2 %3585 }
 0x6aa   : > { %v3595_v45 = vsel %vm2953_vm3, %v3584_v0, %v7399_v16  ;;  %5330 = vmatmul.msk.bf16.vlgmr.msra.gmra.mxu1 %vm965_vm2, %v7339_v31 }
 0x6ab   : > { %3612 = vst [vmem:[#allocation2 + $0x258] sm:$0xf] %v3595_v45  ;;  %v3310_v24 = vpop.permute.xlu1 %3309 }
 0x6ac   : > { %v3322_v50 = vsel %vm2679_vm15, %v7334_v51, %v3310_v24  ;;  %v3323_v54 = vsel %vm2679_vm15, %v3310_v24, %v7391_v56  ;;  %v7409_v44 = vpop.permute.xlu0 %3542  ;;  %v3683_v6 = vld [vmem:[#allocation2 + $0x108] sm:$0xff] }
 0x6ad   : > { %3339 = vst [vmem:[#allocation2 + $0x18] sm:$0xf] %v3322_v50  ;;  %v3553_v49 = vsel %vm2909_vm14, %v7350_v32, %v7409_v44 }
 0x6ae   : > { %3340 = vst [vmem:[#allocation2 + $0x20] sm:$0xf] %v3323_v54  ;;  %v3723_v4 = vld [vmem:[#allocation2 + $0x298] sm:$0xff]  ;;  %v3692_v54 = vld [vmem:[#allocation2 + $0x160] sm:$0xff] }
 0x6af   : > { %3570 = vst [vmem:[#allocation2 + $0x200] sm:$0xf] %v3553_v49  ;;  %v3763_v53 = vpack.c.bf16 %v3723_v4, %v3723_v4  ;;  %v3684_v4 = vld [vmem:[#allocation2 + $0x110] sm:$0xff] }
 0x6b1   : > { %v3784_v14 = vsel %vm969_vm11, %v3763_v53, 0  ;;  %v7415_v12 = vpop.permute.xlu2 %3589  ;;  %v3676_v53 = vld [vmem:[#allocation2 + $0xc0] sm:$0xff] }
 0x6b2   : > { %3830 = vmatpush.bf16.msra.mxu2 %v3784_v14  ;;  %3615 = vst.msk [vmem:[#allocation2 + $0x270] sm:$0xf] %vm7843_vm13, %v7415_v12  ;;  %vm7855_vm13 = vcmask 773120   ;;  %v3740_v26 = vpack.c.bf16 %v3684_v4, %v3676_v53  ;;  %v3696_v53 = vld [vmem:[#allocation2 + $0x180] sm:$0xff] }
 0x6b3   : > { %v7419_v51 = vpop.permute.xlu1 %3362 }
 0x6b4   : > { %v3373_v32 = vsel %vm2723_vm0, %v7326_v42, %v7419_v51  ;;  %v3502_v61 = vpop.permute.xlu0 %3501  ;;  %v3675_v42 = vld [vmem:[#allocation2 + $0xb8] sm:$0xff] }
 0x6b5   : > { %3390 = vst [vmem:[#allocation2 + $0x78] sm:$0xf] %v3373_v32  ;;  %v3512_v48 = vsel %vm884_vm12, %v7362_v58, %v3502_v61  ;;  %v3739_v0 = vpack.c.bf16 %v3683_v6, %v3675_v42  ;;  %v3659_v7 = vld [vmem:[#allocation2 + $0x18] sm:$0xff]  ;;  %v3660_v32 = vld [vmem:[#allocation2 + $0x20] sm:$0xff]  ;;  %v3668_v6 = vld [vmem:[#allocation2 + $0x70] sm:$0xff] }
 0x6b6   : > { %3529 = vst [vmem:[#allocation2 + $0x1b0] sm:$0xf] %v3512_v48  ;;  %3831 = vmatpush.bf16.msra.mxu2 %v3755_v57  ;;  %v3731_v30 = vpack.c.bf16 %v3667_v18, %v3659_v7  ;;  %v3708_v27 = vld [vmem:[#allocation2 + $0x200] sm:$0xff]  ;;  %v3732_v42 = vpack.c.bf16 %v3668_v6, %v3660_v32 }
 0x6b9   : > { %v7426_v39 = vpop.permute.xlu2 %3630 }
 0x6ba   : > { %3656 = vst.msk [vmem:[#allocation2 + $0x2c0] sm:$0xf] %vm7855_vm13, %v7426_v39  ;;  %3832 = vmatpush.bf16.msra.mxu2 %v3747_v3  ;;  %vm7856_vm13 = vcmask 789504  }
 0x6bb   : > { %v3625_v15 = vpop.permute.xlu1 %3624 }
 0x6bc   : > { %v3635_v2 = vsel %vm2997_vm6, %v3623_v36, %v3625_v15  ;;  %v7431_v63 = vpop.permute.xlu0 %3411  ;;  %v3716_v36 = vld [vmem:[#allocation2 + $0x250] sm:$0xff]  ;;  %v3669_v32 = vld [vmem:[#allocation2 + $0x78] sm:$0xff] }
 0x6bd   : > { %3652 = vst [vmem:[#allocation2 + $0x2a0] sm:$0xf] %v3635_v2  ;;  %v3422_v58 = vsel %vm2775_vm8, %v7374_v43, %v7431_v63  ;;  %v3756_v19 = vpack.c.bf16 %v3716_v36, %v3708_v27  ;;  %v3700_v62 = vld [vmem:[#allocation2 + $0x1b0] sm:$0xff] }
 0x6be   : > { %3439 = vst [vmem:[#allocation2 + $0xc8] sm:$0xf] %v3422_v58  ;;  %3833 = vmatpush.bf16.msra.mxu2 %v3739_v0  ;;  %v3748_v49 = vpack.c.bf16 %v3700_v62, %v3692_v54  ;;  %v3720_v27 = vld [vmem:[#allocation2 + $0x270] sm:$0xff] }
 0x6c1   : > { %v3547_v8 = vpop.permute.xlu2 %3546  ;;  %v3728_v14 = vld [vmem:[#allocation2 + $0x2c0] sm:$0xff] }
 0x6c2   : > { %3834 = vmatpush.bf16.msra.mxu2 %v3731_v30  ;;  %v3768_v41 = vpack.c.bf16 %v3728_v14, %v3728_v14 }
 0x6c3   : > { %v7436_v13 = vpop.permute.xlu1 %3452 }
 0x6c4   : > { %v3463_v17 = vsel %vm869_vm7, %v7383_v20, %v7436_v13  ;;  %v7441_v11 = vpop.permute.xlu0 %3313  ;;  %v3724_v55 = vld [vmem:[#allocation2 + $0x2a0] sm:$0xff] }
 0x6c5   : > { %3480 = vst [vmem:[#allocation2 + $0x118] sm:$0xf] %v3463_v17  ;;  %v3324_v43 = vsel %vm2679_vm15, %v7391_v56, %v7441_v11  ;;  %5331 = vmatmul.msk.bf16.vlgmr.msra.gmra.mxu2 %vm965_vm2, %v7339_v31  ;;  %v3764_v22 = vpack.c.bf16 %v3724_v55, %v3724_v55  ;;  %v3717_v17 = vld [vmem:[#allocation2 + $0x258] sm:$0xff] }
 0x6c6   : > { %3341 = vst [vmem:[#allocation2 + $0x28] sm:$0xf] %v3324_v43 }
 0x6c7   : > { %v3787_v37 = vsel %vm969_vm11, %v3764_v22, 0 }
 0x6c8   : > { %3843 = vmatpush.bf16.msra.mxu3 %v3787_v37 }
 0x6c9   : > { %v3506_v23 = vpop.permute.xlu2 %3505 }
 0x6cb   : > { %v7449_v20 = vpop.permute.xlu1 %3626 }
 0x6cc   : > { %v3636_v45 = vsel %vm2997_vm6, %v3625_v15, %v7449_v20  ;;  %3844 = vmatpush.bf16.msra.mxu3 %v3756_v19  ;;  %v3504_v56 = vpop.permute.xlu0 %3503  ;;  %v3693_v19 = vld [vmem:[#allocation2 + $0x168] sm:$0xff]  ;;  %v3685_v62 = vld [vmem:[#allocation2 + $0x118] sm:$0xff] }
 0x6cd   : > { %3653 = vst [vmem:[#allocation2 + $0x2a8] sm:$0xf] %v3636_v45  ;;  %v3513_v24 = vsel %vm884_vm12, %v3502_v61, %v3504_v56  ;;  %v3514_v50 = vsel %vm884_vm12, %v3504_v56, %v3506_v23  ;;  %v3661_v4 = vld [vmem:[#allocation2 + $0x28] sm:$0xff] }
 0x6ce   : > { %3530 = vst [vmem:[#allocation2 + $0x1b8] sm:$0xf] %v3513_v24 }
 0x6cf   : > { %3531 = vst [vmem:[#allocation2 + $0x1c0] sm:$0xf] %v3514_v50  ;;  %v3677_v50 = vld [vmem:[#allocation2 + $0xc8] sm:$0xff] }
 0x6d0   : > { %3845 = vmatpush.bf16.msra.mxu3 %v3748_v49  ;;  %v3741_v49 = vpack.c.bf16 %v3685_v62, %v3677_v50 }
 0x6d1   : > { %v3416_v0 = vpop.permute.xlu2 %3415 }
 0x6d3   : > { %v3545_v40 = vpop.permute.xlu1 %3544 }
 0x6d4   : > { %v3554_v57 = vsel %vm2909_vm14, %v7409_v44, %v3545_v40  ;;  %v3555_v48 = vsel %vm2909_vm14, %v3545_v40, %v3547_v8  ;;  %3846 = vmatpush.bf16.msra.mxu3 %v3740_v26  ;;  %v3549_v61 = vpop.permute.xlu0 %3548  ;;  %v3725_v9 = vld [vmem:[#allocation2 + $0x2a8] sm:$0xff]  ;;  %v3799_v44 = vsel %vm969_vm11, %v3768_v41, 0 }
 0x6d5   : > { %3571 = vst [vmem:[#allocation2 + $0x208] sm:$0xf] %v3554_v57  ;;  %v3556_v3 = vsel %vm2909_vm14, %v3547_v8, %v3549_v61  ;;  %v3765_v15 = vpack.c.bf16 %v3725_v9, %v3725_v9  ;;  %v3701_v22 = vld [vmem:[#allocation2 + $0x1b8] sm:$0xff]  ;;  %v3733_v57 = vpack.c.bf16 %v3669_v32, %v3661_v4 }
 0x6d6   : > { %3572 = vst [vmem:[#allocation2 + $0x210] sm:$0xf] %v3555_v48 }
 0x6d7   : > { %3573 = vst [vmem:[#allocation2 + $0x218] sm:$0xf] %v3556_v3  ;;  %v3790_v2 = vsel %vm969_vm11, %v3765_v15, 0 }
 0x6d8   : > { %3574 = vst.msk [vmem:[#allocation2 + $0x220] sm:$0xf] %vm7856_vm13, %v3549_v61  ;;  %3847 = vmatpush.bf16.msra.mxu3 %v3732_v42  ;;  %3856 = vmatpush.bf16.msrb.mxu0 %v3790_v2 }
 0x6d9   : > { %v3457_v26 = vpop.permute.xlu2 %3456 }
 0x6db   : > { %5332 = vmatmul.msk.bf16.vlgmr.msra.gmra.mxu3 %vm965_vm2, %v7339_v31  ;;  %v3414_v58 = vpop.permute.xlu1 %3413 }
 0x6dc   : > { %3895 = vmatpush.bf16.msrb.mxu3 %v3799_v44  ;;  %v3423_v7 = vsel %vm2775_vm8, %v7431_v63, %v3414_v58  ;;  %v3424_v18 = vsel %vm2775_vm8, %v3414_v58, %v3416_v0  ;;  %v3508_v30 = vpop.permute.xlu0 %3507  ;;  %v3709_v8 = vld [vmem:[#allocation2 + $0x208] sm:$0xff]  ;;  %v3749_v63 = vpack.c.bf16 %v3701_v22, %v3693_v19 }
 0x6dd   : > { %3440 = vst [vmem:[#allocation2 + $0xd0] sm:$0xf] %v3423_v7  ;;  %v3515_v55 = vsel %vm884_vm12, %v3506_v23, %v3508_v30  ;;  %v3757_v43 = vpack.c.bf16 %v3717_v17, %v3709_v8 }
 0x6de   : > { %3441 = vst [vmem:[#allocation2 + $0xd8] sm:$0xf] %v3424_v18  ;;  %v3711_v22 = vld [vmem:[#allocation2 + $0x218] sm:$0xff] }
 0x6df   : > { %3532 = vst [vmem:[#allocation2 + $0x1c8] sm:$0xf] %v3515_v55  ;;  %3857 = vmatpush.bf16.msrb.mxu0 %v3757_v43  ;;  %v3712_v37 = vld [vmem:[#allocation2 + $0x220] sm:$0xff]  ;;  %v3710_v55 = vld [vmem:[#allocation2 + $0x210] sm:$0xff] }
 0x6e0   : > { %3533 = vst.msk [vmem:[#allocation2 + $0x1d0] sm:$0xf] %vm1079_vm5, %v3508_v30  ;;  %v3760_v36 = vpack.c.bf16 %v3720_v27, %v3712_v37 }
 0x6e1   : > { %v3318_v41 = vpop.permute.xlu2 %3317 }
 0x6e2   : > { %3896 = vmatpush.bf16.msrb.mxu3 %v3760_v36  ;;  %v3702_v36 = vld [vmem:[#allocation2 + $0x1c0] sm:$0xff] }
 0x6e3   : > { %3858 = vmatpush.bf16.msrb.mxu0 %v3749_v63  ;;  %v3588_v45 = vpop.permute.xlu1 %3587 }
 0x6e4   : > { %v3596_v56 = vsel %vm2953_vm3, %v7399_v16, %v3588_v45  ;;  %v3597_v23 = vsel %vm2953_vm3, %v3588_v45, %v7415_v12  ;;  %v3418_v24 = vpop.permute.xlu0 %3417 }
 0x6e5   : > { %3613 = vst [vmem:[#allocation2 + $0x260] sm:$0xf] %v3596_v56  ;;  %v3425_v54 = vsel %vm2775_vm8, %v3416_v0, %v3418_v24  ;;  %v3694_v24 = vld [vmem:[#allocation2 + $0x170] sm:$0xff] }
 0x6e6   : > { %3614 = vst [vmem:[#allocation2 + $0x268] sm:$0xf] %v3597_v23  ;;  %v3703_v56 = vld [vmem:[#allocation2 + $0x1c8] sm:$0xff] }
 0x6e7   : > { %3442 = vst [vmem:[#allocation2 + $0xe0] sm:$0xf] %v3425_v54  ;;  %3859 = vmatpush.bf16.msrb.mxu0 %v3741_v49  ;;  %v3704_v14 = vld [vmem:[#allocation2 + $0x1d0] sm:$0xff]  ;;  %v3750_v54 = vpack.c.bf16 %v3702_v36, %v3694_v24  ;;  %v3695_v49 = vld [vmem:[#allocation2 + $0x178] sm:$0xff] }
 0x6e8   : > { %v3752_v40 = vpack.c.bf16 %v3704_v14, %v3696_v53  ;;  %v3751_v4 = vpack.c.bf16 %v3703_v56, %v3695_v49 }
 0x6e9   : > { %v3367_v19 = vpop.permute.xlu2 %3366 }
 0x6ea   : > { %3897 = vmatpush.bf16.msrb.mxu3 %v3752_v40  ;;  %v3679_v40 = vld [vmem:[#allocation2 + $0xd8] sm:$0xff] }
 0x6eb   : > { %3860 = vmatpush.bf16.msrb.mxu0 %v3733_v57  ;;  %v3629_v16 = vpop.permute.xlu1 %3628 }
 0x6ec   : > { %v3637_v12 = vsel %vm2997_vm6, %v7449_v20, %v3629_v16  ;;  %v3638_v48 = vsel %vm2997_vm6, %v3629_v16, %v7426_v39  ;;  %v3459_v61 = vpop.permute.xlu0 %3458  ;;  %v3718_v8 = vld [vmem:[#allocation2 + $0x260] sm:$0xff] }
 0x6ed   : > { %3654 = vst [vmem:[#allocation2 + $0x2b0] sm:$0xf] %v3637_v12  ;;  %v3466_v9 = vsel %vm869_vm7, %v3457_v26, %v3459_v61  ;;  %v3719_v17 = vld [vmem:[#allocation2 + $0x268] sm:$0xff]  ;;  %v3758_v43 = vpack.c.bf16 %v3718_v8, %v3710_v55 }
 0x6ee   : > { %3655 = vst [vmem:[#allocation2 + $0x2b8] sm:$0xf] %v3638_v48  ;;  %5333 = vmatmul.msk.bf16.vlgmr.msrb.gmra.mxu0 %vm965_vm2, %v7339_v31  ;;  %v3680_v58 = vld [vmem:[#allocation2 + $0xe0] sm:$0xff]  ;;  %v3759_v27 = vpack.c.bf16 %v3719_v17, %v3711_v22 }
 0x6ef   : > { %3483 = vst [vmem:[#allocation2 + $0x130] sm:$0xf] %v3466_v9 }
 0x6f3   : > { %v3455_v3 = vpop.permute.xlu1 %3454 }
 0x6f4   : > { %v3464_v6 = vsel %vm869_vm7, %v7436_v13, %v3455_v3  ;;  %v3465_v15 = vsel %vm869_vm7, %v3455_v3, %v3457_v26  ;;  %v3320_v20 = vpop.permute.xlu0 %3319  ;;  %v3726_v42 = vld [vmem:[#allocation2 + $0x2b0] sm:$0xff] }
 0x6f5   : > { %3481 = vst [vmem:[#allocation2 + $0x120] sm:$0xf] %v3464_v6  ;;  %v3327_v39 = vsel %vm2679_vm15, %v3318_v41, %v3320_v20  ;;  %v3766_v2 = vpack.c.bf16 %v3726_v42, %v3726_v42  ;;  %v3727_v44 = vld [vmem:[#allocation2 + $0x2b8] sm:$0xff] }
 0x6f6   : > { %3482 = vst [vmem:[#allocation2 + $0x128] sm:$0xf] %v3465_v15  ;;  %v3767_v0 = vpack.c.bf16 %v3727_v44, %v3727_v44  ;;  %v3688_v7 = vld [vmem:[#allocation2 + $0x130] sm:$0xff] }
 0x6f7   : > { %3344 = vst [vmem:[#allocation2 + $0x40] sm:$0xf] %v3327_v39  ;;  %v3793_v18 = vsel %vm969_vm11, %v3766_v2, 0  ;;  %v3744_v30 = vpack.c.bf16 %v3688_v7, %v3680_v58 }
 0x6f8   : > { %3869 = vmatpush.bf16.msrb.mxu1 %v3793_v18  ;;  %v3796_v13 = vsel %vm969_vm11, %v3767_v0, 0 }
 0x6f9   : > { %3882 = vmatpush.bf16.msrb.mxu2 %v3796_v13  ;;  %3898 = vmatpush.bf16.msrb.mxu3 %v3744_v30 }
 0x6fb   : > { %v3316_v37 = vpop.permute.xlu1 %3315 }
 0x6fc   : > { %v3325_v63 = vsel %vm2679_vm15, %v7441_v11, %v3316_v37  ;;  %v3326_v62 = vsel %vm2679_vm15, %v3316_v37, %v3318_v41  ;;  %3870 = vmatpush.bf16.msrb.mxu1 %v3758_v43  ;;  %v3369_v45 = vpop.permute.xlu0 %3368  ;;  %v3686_v53 = vld [vmem:[#allocation2 + $0x120] sm:$0xff]  ;;  %v3678_v11 = vld [vmem:[#allocation2 + $0xd0] sm:$0xff] }
 0x6fd   : > { %3342 = vst [vmem:[#allocation2 + $0x30] sm:$0xf] %v3325_v63  ;;  %3883 = vmatpush.bf16.msrb.mxu2 %v3759_v27  ;;  %v3376_v23 = vsel %vm2723_vm0, %v3367_v19, %v3369_v45  ;;  %v3810_v50 = vpop.f32.mrf.mxu0  ;;  %v3687_v14 = vld [vmem:[#allocation2 + $0x128] sm:$0xff]  ;;  %v3742_v26 = vpack.c.bf16 %v3686_v53, %v3678_v11 }
 0x6fe   : > { %3343 = vst [vmem:[#allocation2 + $0x38] sm:$0xf] %v3326_v62  ;;  %v3743_v57 = vpack.c.bf16 %v3687_v14, %v3679_v40  ;;  %v3664_v61 = vld [vmem:[#allocation2 + $0x40] sm:$0xff] }
 0x6ff   : > { %3393 = vst [vmem:[#allocation2 + $0x90] sm:$0xf] %v3376_v23 }
 0x700   : > { %3871 = vmatpush.bf16.msrb.mxu1 %v3750_v54 }
 0x701   : > { %3884 = vmatpush.bf16.msrb.mxu2 %v3751_v4 }
 0x703   : > { %v3365_v32 = vpop.permute.xlu1 %3364 }
 0x704   : > { %v3374_v16 = vsel %vm2723_vm0, %v7419_v51, %v3365_v32  ;;  %v3375_v12 = vsel %vm2723_vm0, %v3365_v32, %v3367_v19  ;;  %3872 = vmatpush.bf16.msrb.mxu1 %v3742_v26  ;;  %v3662_v6 = vld [vmem:[#allocation2 + $0x30] sm:$0xff] }
 0x705   : > { %3391 = vst [vmem:[#allocation2 + $0x80] sm:$0xf] %v3374_v16  ;;  %3885 = vmatpush.bf16.msrb.mxu2 %v3743_v57  ;;  %v3812_v48 = vpop.f32.mrf.mxu0  ;;  %v3663_v42 = vld [vmem:[#allocation2 + $0x38] sm:$0xff] }
 0x706   : > { %3392 = vst [vmem:[#allocation2 + $0x88] sm:$0xf] %v3375_v12  ;;  %v3672_v9 = vld [vmem:[#allocation2 + $0x90] sm:$0xff] }
 0x707   : > { %v3736_v41 = vpack.c.bf16 %v3672_v9, %v3664_v61 }
 0x709   : > { %3899 = vmatpush.bf16.msrb.mxu3 %v3736_v41 }
 0x70b   : > { %v7494_v3 = vpop.permute.xlu1 %3771 }
 0x70c   : > { %5336 = vmatmul.msk.bf16.vlgmr.msrb.gmra.mxu3 %vm965_vm2, %v7339_v31  ;;  %v3670_v15 = vld [vmem:[#allocation2 + $0x80] sm:$0xff]  ;;  %v3811_v51 = vadd.f32 %v3810_v50, %v7494_v3 }
 0x70d   : > { %v3734_v20 = vpack.c.bf16 %v3670_v15, %v3662_v6  ;;  %v3671_v39 = vld [vmem:[#allocation2 + $0x88] sm:$0xff] }
 0x70e   : > { %v3735_v2 = vpack.c.bf16 %v3671_v39, %v3663_v42  ;;  %v3905_v44 = vmax.f32 %v3811_v51, 0.0 }
 0x70f   : > { %3873 = vmatpush.bf16.msrb.mxu1 %v3734_v20 }
 0x710   : > { %3886 = vmatpush.bf16.msrb.mxu2 %v3735_v2  ;;  %3986 = vrot.lane.b32.xlu2 %v3905_v44, %s5539_s22  ;;  %4117 = vst [vmem:[#allocation2 + $0x148] sm:$0xf] %v3905_v44  ;;  %v3921_v0 = vmul.f32 %v3905_v44, %v6796_v33  ;;  %v3913_v58 = vmul.f32 %v3905_v44, %v6799_v35 }
 0x711   : > { %4207 = vrot.lane.b32.xlu0 %v3905_v44, %s5536_s26 }
 0x712   : > { %5334 = vmatmul.msk.bf16.vlgmr.msrb.gmra.mxu1 %vm965_vm2, %v7339_v31  ;;  %4166 = vrot.lane.b32.xlu1 %v3921_v0, %s5537_s23 }
 0x713   : > { %5335 = vmatmul.msk.bf16.vlgmr.msrb.gmra.mxu2 %vm965_vm2, %v7339_v31 }
 0x718   : > { %4248 = vrot.lane.b32.xlu2 %v3913_v58, %s5538_s24 }
 0x719   : > { %4035 = vrot.lane.b32.xlu0 %v3913_v58, %s5541_s19 }
 0x71a   : > { %4076 = vrot.lane.b32.xlu1 %v3921_v0, %s7853_s28 }
 0x720   : > { %4125 = vrot.lane.b32.xlu2 %v3913_v58, %s7854_s17 }
 0x722   : > { %3937 = vrot.lane.b32.xlu1 %v3921_v0, %s5540_s0 }
 0x727   : > { %v3823_v33 = vpop.f32.mrf.mxu1 }
 0x728   : > { %v3824_v7 = vadd.f32 %v3823_v33, %v7494_v3 }
 0x72a   : > { %v3906_v18 = vmax.f32 %v3824_v7, 0.0 }
 0x72c   : > { %4118 = vst [vmem:[#allocation2 + $0x150] sm:$0xf] %v3906_v18  ;;  %4209 = vrot.lane.b32.xlu1 %v3906_v18, %s5536_s26  ;;  %3988 = vrot.lane.b32.xlu0 %v3906_v18, %s5539_s22  ;;  %v3922_v35 = vmul.f32 %v3906_v18, %v6819_v34  ;;  %v3914_v30 = vmul.f32 %v3906_v18, %v6828_v47 }
 0x72e   : > { %4168 = vrot.lane.b32.xlu2 %v3922_v35, %s5537_s23 }
 0x72f   : > { %v3825_v31 = vpop.f32.mrf.mxu1 }
 0x734   : > { %4250 = vrot.lane.b32.xlu0 %v3914_v30, %s5538_s24 }
 0x736   : > { %4037 = vrot.lane.b32.xlu2 %v3914_v30, %s5541_s19 }
 0x73c   : > { %4127 = vrot.lane.b32.xlu0 %v3914_v30, %s7854_s17 }
 0x73e   : > { %4078 = vrot.lane.b32.xlu2 %v3922_v35, %s7853_s28 }
 0x744   : > { %3939 = vrot.lane.b32.xlu0 %v3922_v35, %s5540_s0 }
 0x748   : > { %v3836_v8 = vpop.f32.mrf.mxu2 }
 0x749   : > { %v3837_v13 = vadd.f32 %v3836_v8, %v7494_v3 }
 0x74b   : > { %v3907_v17 = vmax.f32 %v3837_v13, 0.0 }
 0x74d   : > { %4119 = vst [vmem:[#allocation2 + $0x158] sm:$0xf] %v3907_v17  ;;  %3990 = vrot.lane.b32.xlu1 %v3907_v17, %s5539_s22  ;;  %4211 = vrot.lane.b32.xlu2 %v3907_v17, %s5536_s26  ;;  %v3915_v47 = vmul.f32 %v3907_v17, %v6860_v25  ;;  %v3923_v62 = vmul.f32 %v3907_v17, %v6848_v1 }
 0x750   : > { %v3838_v34 = vpop.f32.mrf.mxu2 }
 0x755   : > { %4129 = vrot.lane.b32.xlu1 %v3915_v47, %s7854_s17 }
 0x75e   : > { %v3849_v55 = vpop.f32.mrf.mxu3 }
 0x75f   : > { %v3850_v43 = vadd.f32 %v3849_v55, %v7494_v3 }
 0x761   : > { %v3908_v22 = vmax.f32 %v3850_v43, 0.0 }
 0x763   : > { %4120 = vst [vmem:[#allocation2 + $0x160] sm:$0xf] %v3908_v22  ;;  %4213 = vrot.lane.b32.xlu0 %v3908_v22, %s5536_s26  ;;  %3992 = vrot.lane.b32.xlu2 %v3908_v22, %s5539_s22  ;;  %v3916_v37 = vmul.f32 %v3908_v22, %v6888_v52  ;;  %v3924_v19 = vmul.f32 %v3908_v22, %v6873_v38 }
 0x765   : > { %4041 = vrot.lane.b32.xlu1 %v3916_v37, %s5541_s19 }
 0x766   : > { %v3851_v27 = vpop.f32.mrf.mxu3 }
 0x76a   : > { %v7534_v36 = vpop.permute.xlu2 %3986 }
 0x76b   : > { %4018 = vst.msk [vmem:[#allocation2 + $0x58] sm:$0xf] %vm2740_vm10, %v7534_v36  ;;  %v3862_v25 = vpop.f32.mrf.mxu0  ;;  %4254 = vrot.lane.b32.xlu0 %v3916_v37, %s5538_s24  ;;  %4252 = vrot.lane.b32.xlu2 %v3915_v47, %s5538_s24  ;;  %vm7858_vm10 = vcmask 773120  }
 0x76c   : > { %v3863_v63 = vadd.f32 %v3862_v25, %v7494_v3 }
 0x76d   : > { %4082 = vrot.lane.b32.xlu1 %v3924_v19, %s7853_s28 }
 0x76e   : > { %v7543_v52 = vmax.f32 %v3863_v63, 0.0 }
 0x770   : > { %4121 = vst [vmem:[#allocation2 + $0x168] sm:$0xf] %v7543_v52  ;;  %v7562_v1 = vmul.f32 %v7543_v52, %v6905_v59  ;;  %v7574_v4 = vmul.f32 %v7543_v52, %v6908_v60 }
 0x772   : > { %v7547_v45 = vpop.permute.xlu2 %4248 }
 0x773   : > { %4172 = vrot.lane.b32.xlu0 %v3924_v19, %s5537_s23  ;;  %4170 = vrot.lane.b32.xlu2 %v3923_v62, %s5537_s23  ;;  %v3864_v56 = vpop.f32.mrf.mxu0 }
 0x775   : > { %3941 = vrot.lane.b32.xlu1 %v3923_v62, %s5540_s0 }
 0x77a   : > { %v7552_v38 = vpop.permute.xlu2 %4125 }
 0x77b   : > { %4039 = vrot.lane.b32.xlu0 %v3915_v47, %s5541_s19  ;;  %4131 = vrot.lane.b32.xlu2 %v3916_v37, %s7854_s17  ;;  %v4321_v47 = vld [vmem:[#allocation2 + $0x148] sm:$0xff] }
 0x77d   : > { %4215 = vrot.lane.b32.xlu1 %v7543_v52, %s5536_s26 }
 0x783   : > { %v4208_v23 = vpop.permute.xlu0 %4207  ;;  %4080 = vrot.lane.b32.xlu0 %v3923_v62, %s7853_s28  ;;  %3943 = vrot.lane.b32.xlu2 %v3924_v19, %s5540_s0 }
 0x784   : > { %v4167_v24 = vpop.permute.xlu1 %4166 }
 0x785   : > { %4256 = vrot.lane.b32.xlu1 %v7562_v1, %s5538_s24 }
 0x788   : > { %v7566_v50 = vpop.permute.xlu2 %4168 }
 0x789   : > { %v4182_v54 = vsel %vm2909_vm14, %v4167_v24, %v7566_v50 }
 0x78a   : > { %4199 = vst [vmem:[#allocation2 + $0x1e8] sm:$0xf] %v4182_v54 }
 0x78b   : > { %v4036_v49 = vpop.permute.xlu0 %4035  ;;  %4133 = vrot.lane.b32.xlu0 %v7562_v1, %s7854_s17 }
 0x78c   : > { %4067 = vst.msk [vmem:[#allocation2 + $0xa8] sm:$0xf] %vm2792_vm1, %v4036_v49  ;;  %v4077_v59 = vpop.permute.xlu1 %4076  ;;  %vm7859_vm1 = vmmov %vm7856_vm13 }
 0x78d   : > { %4108 = vst.msk [vmem:[#allocation2 + $0xf8] sm:$0xf] %vm1061_vm9, %v4077_v59  ;;  %4174 = vrot.lane.b32.xlu1 %v7574_v4, %s5537_s23  ;;  %vm7857_vm9 = vcmask 781312  }
 0x78f   : > { %v3875_v53 = vpop.f32.mrf.mxu1  ;;  %v3901_v14 = vpop.f32.mrf.mxu3 }
 0x790   : > { %v3876_v11 = vadd.f32 %v3875_v53, %v7494_v3  ;;  %v3902_v26 = vadd.f32 %v3901_v14, %v7494_v3  ;;  %v7582_v40 = vpop.permute.xlu2 %4037 }
 0x791   : > { %v4051_v60 = vsel %vm2775_vm8, %v4036_v49, %v7582_v40 }
 0x792   : > { %v3910_v32 = vmax.f32 %v3876_v11, 0.0  ;;  %v7586_v57 = vmax.f32 %v3902_v26, 0.0  ;;  %4068 = vst [vmem:[#allocation2 + $0xb0] sm:$0xf] %v4051_v60 }
 0x794   : > { %4122 = vst [vmem:[#allocation2 + $0x170] sm:$0xf] %v3910_v32  ;;  %v3938_v16 = vpop.permute.xlu1 %3937  ;;  %4217 = vrot.lane.b32.xlu0 %v3910_v32, %s5536_s26  ;;  %v3918_v12 = vmul.f32 %v3910_v32, %v6937_v5  ;;  %v3926_v48 = vmul.f32 %v3910_v32, %v6925_v46  ;;  %v3928_v2 = vmul.f32 %v7586_v57, %v6978_v28  ;;  %v4313_v22 = vld [vmem:[#allocation2 + $0xf8] sm:$0xff] }
 0x795   : > { %4124 = vst [vmem:[#allocation2 + $0x180] sm:$0xf] %v7586_v57  ;;  %v3920_v28 = vmul.f32 %v7586_v57, %v6969_v21  ;;  %v4337_v21 = vld [vmem:[#allocation2 + $0x1e8] sm:$0xff] }
 0x796   : > { %3969 = vst.msk [vmem:[#allocation2 + $0x8] sm:$0xf] %vm2696_vm4, %v3938_v16  ;;  %v3888_v61 = vpop.f32.mrf.mxu2  ;;  %4045 = vrot.lane.b32.xlu1 %v3918_v12, %s5541_s19  ;;  %4176 = vrot.lane.b32.xlu2 %v3926_v48, %s5537_s23 }
 0x797   : > { %v3889_v9 = vadd.f32 %v3888_v61, %v7494_v3  ;;  %v3877_v41 = vpop.f32.mrf.mxu1  ;;  %v3903_v6 = vpop.f32.mrf.mxu3 }
 0x798   : > { %v7596_v15 = vpop.permute.xlu2 %4078  ;;  %v5320_v41 = vld [vmem:[%s7825_s12 + $0x4] sm:$0xf]  ;;  %v4322_v6 = vld [vmem:[#allocation2 + $0x150] sm:$0xff] }
 0x799   : > { %v3911_v51 = vmax.f32 %v3889_v9, 0.0  ;;  %v4092_v5 = vsel %vm869_vm7, %v4077_v59, %v7596_v15 }
 0x79a   : > { %4109 = vst [vmem:[#allocation2 + $0x100] sm:$0xf] %v4092_v5 }
 0x79b   : > { %4123 = vst [vmem:[#allocation2 + $0x178] sm:$0xf] %v3911_v51  ;;  %v3919_v37 = vmul.f32 %v3911_v51, %v6949_v10  ;;  %v3927_v27 = vmul.f32 %v3911_v51, %v6981_v29  ;;  %v7647_v29 = vld [vmem:[%s7824_s11 + $0x2] sm:$0x3] }
 0x79c   : > { %4258 = vrot.lane.b32.xlu0 %v3918_v12, %s5538_s24 }
 0x79d   : > { %v4289_v63 = vld [vmem:[#allocation2 + $0x8] sm:$0xff] }
 0x79e   : > { %4086 = vrot.lane.b32.xlu1 %v3926_v48, %s7853_s28  ;;  %v4210_v46 = vpop.permute.xlu1 %4209  ;;  %v3989_v20 = vpop.permute.xlu0 %3988  ;;  %3947 = vrot.lane.b32.xlu2 %v3926_v48, %s5540_s0 }
 0x79f   : > { %v4223_v3 = vsel %vm2953_vm3, %v4208_v23, %v4210_v46  ;;  %v4002_v42 = vsel %vm2723_vm0, %v7534_v36, %v3989_v20  ;;  %v3890_v39 = vpop.f32.mrf.mxu2  ;;  %v4305_v36 = vld [vmem:[#allocation2 + $0xa8] sm:$0xff] }
 0x7a0   : > { %4240 = vst [vmem:[#allocation2 + $0x238] sm:$0xf] %v4223_v3  ;;  %v4369_v19 = vpack.c.bf16 %v4313_v22, %v4305_v36  ;;  %v4323_v22 = vld [vmem:[#allocation2 + $0x158] sm:$0xff] }
 0x7a1   : > { %4019 = vst [vmem:[#allocation2 + $0x60] sm:$0xf] %v4002_v42 }
 0x7a4   : > { %4180 = vrot.lane.b32.xlu0 %v3928_v2, %s5537_s23 }
 0x7a6   : > { %4135 = vrot.lane.b32.xlu1 %v3918_v12, %s7854_s17  ;;  %v4251_v44 = vpop.permute.xlu0 %4250  ;;  %4221 = vrot.lane.b32.xlu2 %v7586_v57, %s5536_s26 }
 0x7a7   : > { %v4264_v0 = vsel %vm2997_vm6, %v7547_v45, %v4251_v44  ;;  %v7614_v58 = vpop.permute.xlu2 %4211  ;;  %v4345_v8 = vld [vmem:[#allocation2 + $0x238] sm:$0xff] }
 0x7a8   : > { %4281 = vst [vmem:[#allocation2 + $0x288] sm:$0xf] %v4264_v0  ;;  %v4224_v33 = vsel %vm2953_vm3, %v4210_v46, %v7614_v58  ;;  %v4385_v13 = vpack.c.bf16 %v4345_v8, %v4337_v21  ;;  %v4306_v46 = vld [vmem:[#allocation2 + $0xb0] sm:$0xff]  ;;  %v4298_v39 = vld [vmem:[#allocation2 + $0x60] sm:$0xff] }
 0x7a9   : > { %4241 = vst [vmem:[#allocation2 + $0x240] sm:$0xf] %v4224_v33 }
 0x7ac   : > { %4049 = vrot.lane.b32.xlu0 %v3920_v28, %s5541_s19 }
 0x7ae   : > { %4219 = vrot.lane.b32.xlu1 %v3911_v51, %s5536_s26  ;;  %v4128_v7 = vpop.permute.xlu0 %4127  ;;  %4262 = vrot.lane.b32.xlu2 %v3920_v28, %s5538_s24 }
 0x7af   : > { %v4141_v18 = vsel %vm884_vm12, %v7552_v38, %v4128_v7  ;;  %v4353_v35 = vld [vmem:[#allocation2 + $0x288] sm:$0xff]  ;;  %v4297_v38 = vld [vmem:[#allocation2 + $0x58] sm:$0xff] }
 0x7b0   : > { %4158 = vst [vmem:[#allocation2 + $0x198] sm:$0xf] %v4141_v18  ;;  %v4393_v31 = vpack.c.bf16 %v4353_v35, %v4353_v35  ;;  %v4361_v10 = vpack.c.bf16 %v4297_v38, %v4289_v63  ;;  %v4346_v12 = vld [vmem:[#allocation2 + $0x240] sm:$0xff] }
 0x7b2   : > { %v4410_v30 = vsel %vm969_vm11, %v4393_v31, 0 }
 0x7b3   : > { %4436 = vmatpush.bf16.msra.mxu0 %v4410_v30 }
 0x7b4   : > { %4090 = vrot.lane.b32.xlu0 %v3928_v2, %s7853_s28 }
 0x7b6   : > { %4139 = vrot.lane.b32.xlu1 %v3920_v28, %s7854_s17  ;;  %v7628_v17 = vpop.permute.xlu0 %3939  ;;  %3996 = vrot.lane.b32.xlu2 %v3910_v32, %s5539_s22 }
 0x7b7   : > { %v3953_v34 = vsel %vm2679_vm15, %v3938_v16, %v7628_v17  ;;  %4437 = vmatpush.bf16.msra.mxu0 %v4385_v13  ;;  %v4329_v55 = vld [vmem:[#allocation2 + $0x198] sm:$0xff] }
 0x7b8   : > { %3970 = vst [vmem:[#allocation2 + $0x10] sm:$0xf] %v3953_v34  ;;  %v4377_v43 = vpack.c.bf16 %v4329_v55, %v4321_v47 }
 0x7bb   : > { %4438 = vmatpush.bf16.msra.mxu0 %v4377_v43 }
 0x7bc   : > { %3998 = vrot.lane.b32.xlu0 %v3911_v51, %s5539_s22 }
 0x7bd   : > { %v7636_v25 = vpop.permute.xlu2 %3992 }
 0x7be   : > { %4260 = vrot.lane.b32.xlu1 %v3919_v37, %s5538_s24  ;;  %4178 = vrot.lane.b32.xlu2 %v3927_v27, %s5537_s23 }
 0x7bf   : > { %v3991_v62 = vpop.permute.xlu1 %3990  ;;  %4439 = vmatpush.bf16.msra.mxu0 %v4369_v19  ;;  %v4290_v42 = vld [vmem:[#allocation2 + $0x10] sm:$0xff] }
 0x7c0   : > { %v4003_v45 = vsel %vm2723_vm0, %v3989_v20, %v3991_v62  ;;  %v4004_v56 = vsel %vm2723_vm0, %v3991_v62, %v7636_v25 }
 0x7c1   : > { %4020 = vst [vmem:[#allocation2 + $0x68] sm:$0xf] %v4003_v45 }
 0x7c2   : > { %4021 = vst [vmem:[#allocation2 + $0x70] sm:$0xf] %v4004_v56 }
 0x7c3   : > { %4440 = vmatpush.bf16.msra.mxu0 %v4361_v10 }
 0x7c4   : > { %4137 = vrot.lane.b32.xlu0 %v3919_v37, %s7854_s17 }
 0x7c5   : > { %v4253_v23 = vpop.permute.xlu2 %4252 }
 0x7c6   : > { %v4265_v24 = vsel %vm2997_vm6, %v4251_v44, %v4253_v23  ;;  %3951 = vrot.lane.b32.xlu1 %v3928_v2, %s5540_s0  ;;  %4047 = vrot.lane.b32.xlu2 %v3919_v37, %s5541_s19  ;;  %v4362_v2 = vpack.c.bf16 %v4298_v39, %v4290_v42 }
 0x7c7   : > { %4282 = vst [vmem:[#allocation2 + $0x290] sm:$0xf] %v4265_v24  ;;  %v4130_v54 = vpop.permute.xlu1 %4129  ;;  %5337 = vmatmul.msk.bf16.vlgmr.msra.gmra.mxu0 %vm965_vm2, %v7647_v29 }
 0x7c8   : > { %v4142_v49 = vsel %vm884_vm12, %v4128_v7, %v4130_v54 }
 0x7c9   : > { %4159 = vst [vmem:[#allocation2 + $0x1a0] sm:$0xf] %v4142_v49 }
 0x7cc   : > { %3949 = vrot.lane.b32.xlu0 %v3927_v27, %s5540_s0 }
 0x7cd   : > { %v4171_v59 = vpop.permute.xlu2 %4170 }
 0x7ce   : > { %v4183_v53 = vsel %vm2909_vm14, %v7566_v50, %v4171_v59  ;;  %4000 = vrot.lane.b32.xlu1 %v7586_v57, %s5539_s22  ;;  %4088 = vrot.lane.b32.xlu2 %v3927_v27, %s7853_s28  ;;  %v4354_v14 = vld [vmem:[#allocation2 + $0x290] sm:$0xff] }
 0x7cf   : > { %4200 = vst [vmem:[#allocation2 + $0x1f0] sm:$0xf] %v4183_v53  ;;  %v4394_v11 = vpack.c.bf16 %v4354_v14, %v4354_v14 }
 0x7d0   : > { %v4330_v9 = vld [vmem:[#allocation2 + $0x1a0] sm:$0xff] }
 0x7d1   : > { %v4413_v26 = vsel %vm969_vm11, %v4394_v11, 0  ;;  %v4378_v51 = vpack.c.bf16 %v4330_v9, %v4322_v6  ;;  %v4299_v11 = vld [vmem:[#allocation2 + $0x68] sm:$0xff]  ;;  %v4324_v6 = vld [vmem:[#allocation2 + $0x160] sm:$0xff] }
 0x7d2   : > { %4449 = vmatpush.bf16.msra.mxu1 %v4413_v26 }
 0x7d4   : > { %4084 = vrot.lane.b32.xlu0 %v7574_v4, %s7853_s28 }
 0x7d5   : > { %v4214_v60 = vpop.permute.xlu0 %4213  ;;  %v7664_v32 = vpop.permute.xlu2 %4131 }
 0x7d6   : > { %v4225_v50 = vsel %vm2953_vm3, %v7614_v58, %v4214_v60  ;;  %v4143_v57 = vsel %vm884_vm12, %v4130_v54, %v7664_v32  ;;  %3945 = vrot.lane.b32.xlu1 %v7574_v4, %s5540_s0  ;;  %4043 = vrot.lane.b32.xlu2 %v7562_v1, %s5541_s19  ;;  %v4338_v16 = vld [vmem:[#allocation2 + $0x1f0] sm:$0xff]  ;;  %v4314_v4 = vld [vmem:[#allocation2 + $0x100] sm:$0xff]  ;;  %s7800_s0 = scalar_lea.vmem %s7829_s16, %s5687_s30 }
 0x7d7   : > { %4242 = vst [vmem:[#allocation2 + $0x248] sm:$0xf] %v4225_v50  ;;  %v7674_v48 = vpop.permute.xlu1 %4041  ;;  %v4386_v61 = vpack.c.bf16 %v4346_v12, %v4338_v16  ;;  %v4370_v3 = vpack.c.bf16 %v4314_v4, %v4306_v46 }
 0x7d8   : > { %4160 = vst [vmem:[#allocation2 + $0x1a8] sm:$0xf] %v4143_v57 }
 0x7d9   : > { %4450 = vmatpush.bf16.msra.mxu1 %v4386_v61 }
 0x7dc   : > { %4403 = vperm.xlu0 %5514, %v5320_v41  }
 0x7dd   : > { %v4255_v5 = vpop.permute.xlu0 %4254  ;;  %4451 = vmatpush.bf16.msra.mxu1 %v4378_v51  ;;  %v7685_v33 = vpop.permute.xlu2 %3943 }
 0x7de   : > { %v4266_v1 = vsel %vm2997_vm6, %v4253_v23, %v4255_v5  ;;  %3994 = vrot.lane.b32.xlu2 %v7543_v52, %s5539_s22  ;;  %v4347_v13 = vld [vmem:[#allocation2 + $0x248] sm:$0xff] }
 0x7df   : > { %4283 = vst [vmem:[#allocation2 + $0x298] sm:$0xf] %v4266_v1  ;;  %v7682_v20 = vpop.permute.xlu1 %4082  ;;  %v4331_v43 = vld [vmem:[#allocation2 + $0x1a8] sm:$0xff] }
 0x7e0   : > { %v4379_v37 = vpack.c.bf16 %v4331_v43, %v4323_v22 }
 0x7e1   : > { %4452 = vmatpush.bf16.msra.mxu1 %v4370_v3 }
 0x7e5   : > { %v4173_v44 = vpop.permute.xlu0 %4172  ;;  %4453 = vmatpush.bf16.msra.mxu1 %v4362_v2 }
 0x7e6   : > { %v4184_v0 = vsel %vm2909_vm14, %v4171_v59, %v4173_v44  ;;  %v4355_v58 = vld [vmem:[#allocation2 + $0x298] sm:$0xff] }
 0x7e7   : > { %4201 = vst [vmem:[#allocation2 + $0x1f8] sm:$0xf] %v4184_v0  ;;  %v3942_v28 = vpop.permute.xlu1 %3941  ;;  %v4395_v7 = vpack.c.bf16 %v4355_v58, %v4355_v58  ;;  %v4300_v58 = vld [vmem:[#allocation2 + $0x70] sm:$0xff] }
 0x7e8   : > { %v3954_v52 = vsel %vm2679_vm15, %v7628_v17, %v3942_v28  ;;  %v3955_v18 = vsel %vm2679_vm15, %v3942_v28, %v7685_v33  ;;  %5338 = vmatmul.msk.bf16.vlgmr.msra.gmra.mxu1 %vm965_vm2, %v7647_v29 }
 0x7e9   : > { %3971 = vst [vmem:[#allocation2 + $0x18] sm:$0xf] %v3954_v52  ;;  %v4416_v35 = vsel %vm969_vm11, %v4395_v7, 0 }
 0x7ea   : > { %3972 = vst [vmem:[#allocation2 + $0x20] sm:$0xf] %v3955_v18  ;;  %4462 = vmatpush.bf16.msra.mxu2 %v4416_v35 }
 0x7ed   : > { %v4040_v31 = vpop.permute.xlu0 %4039 }
 0x7ee   : > { %v4052_v30 = vsel %vm2775_vm8, %v7582_v40, %v4040_v31  ;;  %v4053_v8 = vsel %vm2775_vm8, %v4040_v31, %v7674_v48  ;;  %v4339_v21 = vld [vmem:[#allocation2 + $0x1f8] sm:$0xff] }
 0x7ef   : > { %4069 = vst [vmem:[#allocation2 + $0xb8] sm:$0xf] %v4052_v30  ;;  %v4216_v17 = vpop.permute.xlu1 %4215  ;;  %v4387_v34 = vpack.c.bf16 %v4347_v13, %v4339_v21 }
 0x7f0   : > { %4070 = vst [vmem:[#allocation2 + $0xc0] sm:$0xf] %v4053_v8  ;;  %v4226_v47 = vsel %vm2953_vm3, %v4214_v60, %v4216_v17  ;;  %v7699_v55 = vpop.permute.xlu2 %4176  ;;  %v4291_v53 = vld [vmem:[#allocation2 + $0x18] sm:$0xff] }
 0x7f1   : > { %4243 = vst [vmem:[#allocation2 + $0x250] sm:$0xf] %v4226_v47  ;;  %4463 = vmatpush.bf16.msra.mxu2 %v4387_v34  ;;  %v4363_v60 = vpack.c.bf16 %v4299_v11, %v4291_v53 }
 0x7f5   : > { %v4081_v27 = vpop.permute.xlu0 %4080  ;;  %4464 = vmatpush.bf16.msra.mxu2 %v4379_v37 }
 0x7f6   : > { %v4093_v40 = vsel %vm869_vm7, %v7596_v15, %v4081_v27  ;;  %v4094_v36 = vsel %vm869_vm7, %v4081_v27, %v7682_v20  ;;  %v4307_v38 = vld [vmem:[#allocation2 + $0xb8] sm:$0xff] }
 0x7f7   : > { %4110 = vst [vmem:[#allocation2 + $0x108] sm:$0xf] %v4093_v40  ;;  %v4257_v19 = vpop.permute.xlu1 %4256  ;;  %v4308_v42 = vld [vmem:[#allocation2 + $0xc0] sm:$0xff] }
 0x7f8   : > { %4111 = vst [vmem:[#allocation2 + $0x110] sm:$0xf] %v4094_v36  ;;  %v4267_v63 = vsel %vm2997_vm6, %v4255_v5, %v4257_v19  ;;  %v7706_v62 = vpop.permute.xlu2 %3947  ;;  %v4348_v61 = vld [vmem:[#allocation2 + $0x250] sm:$0xff] }
 0x7f9   : > { %4284 = vst [vmem:[#allocation2 + $0x2a0] sm:$0xf] %v4267_v63 }
 0x7fd   : > { %v4134_v45 = vpop.permute.xlu0 %4133 }
 0x7fe   : > { %v4144_v56 = vsel %vm884_vm12, %v7664_v32, %v4134_v45  ;;  %v4315_v10 = vld [vmem:[#allocation2 + $0x108] sm:$0xff] }
 0x7ff   : > { %4161 = vst [vmem:[#allocation2 + $0x1b0] sm:$0xf] %v4144_v56  ;;  %v4175_v23 = vpop.permute.xlu1 %4174  ;;  %v4371_v15 = vpack.c.bf16 %v4315_v10, %v4307_v38  ;;  %v4316_v5 = vld [vmem:[#allocation2 + $0x110] sm:$0xff]  ;;  %v4325_v56 = vld [vmem:[#allocation2 + $0x168] sm:$0xff] }
 0x800   : > { %v4185_v24 = vsel %vm2909_vm14, %v4173_v44, %v4175_v23  ;;  %v4186_v54 = vsel %vm2909_vm14, %v4175_v23, %v7699_v55  ;;  %v7713_v49 = vpop.permute.xlu2 %4221  ;;  %v4356_v59 = vld [vmem:[#allocation2 + $0x2a0] sm:$0xff]  ;;  %v4372_v2 = vpack.c.bf16 %v4316_v5, %v4308_v42 }
 0x801   : > { %4202 = vst [vmem:[#allocation2 + $0x200] sm:$0xf] %v4185_v24  ;;  %4465 = vmatpush.bf16.msra.mxu2 %v4371_v15  ;;  %v4396_v14 = vpack.c.bf16 %v4356_v59, %v4356_v59  ;;  %v4292_v44 = vld [vmem:[#allocation2 + $0x20] sm:$0xff] }
 0x802   : > { %4203 = vst [vmem:[#allocation2 + $0x208] sm:$0xf] %v4186_v54  ;;  %v4364_v28 = vpack.c.bf16 %v4300_v58, %v4292_v44 }
 0x803   : > { %4247 = vst.msk [vmem:[#allocation2 + $0x270] sm:$0xf] %vm7857_vm9, %v7713_v49  ;;  %v4419_v26 = vsel %vm969_vm11, %v4396_v14, 0 }
 0x804   : > { %4475 = vmatpush.bf16.msra.mxu3 %v4419_v26 }
 0x805   : > { %4466 = vmatpush.bf16.msra.mxu2 %v4363_v60 }
 0x806   : > { %v4218_v32 = vpop.permute.xlu0 %4217  ;;  %v4332_v41 = vld [vmem:[#allocation2 + $0x1b0] sm:$0xff] }
 0x807   : > { %v4227_v50 = vsel %vm2953_vm3, %v4216_v17, %v4218_v32  ;;  %v4380_v51 = vpack.c.bf16 %v4332_v41, %v4324_v6 }
 0x808   : > { %4244 = vst [vmem:[#allocation2 + $0x258] sm:$0xf] %v4227_v50  ;;  %v7719_v57 = vpop.permute.xlu1 %4045  ;;  %5339 = vmatmul.msk.bf16.vlgmr.msra.gmra.mxu2 %vm965_vm2, %v7647_v29  ;;  %v7723_v16 = vpop.permute.xlu2 %4262  ;;  %v4340_v12 = vld [vmem:[#allocation2 + $0x200] sm:$0xff] }
 0x809   : > { %4288 = vst.msk [vmem:[#allocation2 + $0x2c0] sm:$0xf] %vm7858_vm10, %v7723_v16  ;;  %v4388_v9 = vpack.c.bf16 %v4348_v61, %v4340_v12  ;;  %v4341_v47 = vld [vmem:[#allocation2 + $0x208] sm:$0xff]  ;;  %v4328_v61 = vld [vmem:[#allocation2 + $0x180] sm:$0xff] }
 0x80a   : > { %v4352_v27 = vld [vmem:[#allocation2 + $0x270] sm:$0xff] }
 0x80b   : > { %4476 = vmatpush.bf16.msra.mxu3 %v4388_v9 }
 0x80e   : > { %v7727_v4 = vpop.permute.xlu0 %4258 }
 0x80f   : > { %v4268_v1 = vsel %vm2997_vm6, %v4257_v19, %v7727_v4  ;;  %4477 = vmatpush.bf16.msra.mxu3 %v4380_v51  ;;  %v4349_v34 = vld [vmem:[#allocation2 + $0x258] sm:$0xff] }
 0x810   : > { %4285 = vst [vmem:[#allocation2 + $0x2a8] sm:$0xf] %v4268_v1  ;;  %v7731_v46 = vpop.permute.xlu1 %4086  ;;  %v7733_v3 = vpop.permute.xlu2 %3996  ;;  %v4360_v39 = vld [vmem:[#allocation2 + $0x2c0] sm:$0xff]  ;;  %v4389_v43 = vpack.c.bf16 %v4349_v34, %v4341_v47 }
 0x811   : > { %v4400_v0 = vpack.c.bf16 %v4360_v39, %v4360_v39 }
 0x813   : > { %4478 = vmatpush.bf16.msra.mxu3 %v4372_v2  ;;  %v4431_v52 = vsel %vm969_vm11, %v4400_v0, 0 }
 0x816   : > { %v4181_v7 = vpop.permute.xlu0 %4180 }
 0x817   : > { %4206 = vst.msk [vmem:[#allocation2 + $0x220] sm:$0xf] %vm7859_vm1, %v4181_v7  ;;  %4479 = vmatpush.bf16.msra.mxu3 %v4364_v28  ;;  %v4357_v18 = vld [vmem:[#allocation2 + $0x2a8] sm:$0xff] }
 0x818   : > { %v7737_v35 = vpop.permute.xlu1 %4135  ;;  %v4179_v31 = vpop.permute.xlu2 %4178  ;;  %v4397_v30 = vpack.c.bf16 %v4357_v18, %v4357_v18 }
 0x819   : > { %v4145_v8 = vsel %vm884_vm12, %v4134_v45, %v7737_v35  ;;  %v4187_v21 = vsel %vm2909_vm14, %v7699_v55, %v4179_v31  ;;  %v4188_v13 = vsel %vm2909_vm14, %v4179_v31, %v4181_v7 }
 0x81a   : > { %4162 = vst [vmem:[#allocation2 + $0x1b8] sm:$0xf] %v4145_v8  ;;  %5340 = vmatmul.msk.bf16.vlgmr.msra.gmra.mxu3 %vm965_vm2, %v7647_v29  ;;  %v4422_v17 = vsel %vm969_vm11, %v4397_v30, 0 }
 0x81b   : > { %4527 = vmatpush.bf16.msrb.mxu3 %v4431_v52  ;;  %4204 = vst [vmem:[#allocation2 + $0x210] sm:$0xf] %v4187_v21  ;;  %4488 = vmatpush.bf16.msrb.mxu0 %v4422_v17 }
 0x81c   : > { %4205 = vst [vmem:[#allocation2 + $0x218] sm:$0xf] %v4188_v13 }
 0x81e   : > { %v4050_v22 = vpop.permute.xlu0 %4049  ;;  %v4344_v37 = vld [vmem:[#allocation2 + $0x220] sm:$0xff] }
 0x81f   : > { %4489 = vmatpush.bf16.msrb.mxu0 %v4389_v43  ;;  %v4392_v40 = vpack.c.bf16 %v4352_v27, %v4344_v37  ;;  %v4326_v43 = vld [vmem:[#allocation2 + $0x170] sm:$0xff]  ;;  %v4327_v37 = vld [vmem:[#allocation2 + $0x178] sm:$0xff] }
 0x820   : > { %v4220_v55 = vpop.permute.xlu1 %4219  ;;  %v4048_v36 = vpop.permute.xlu2 %4047 }
 0x821   : > { %v4228_v19 = vsel %vm2953_vm3, %v4218_v32, %v4220_v55  ;;  %v4229_v63 = vsel %vm2953_vm3, %v4220_v55, %v7713_v49  ;;  %v4056_v45 = vsel %vm2775_vm8, %v7719_v57, %v4048_v36  ;;  %4528 = vmatpush.bf16.msrb.mxu3 %v4392_v40  ;;  %v4333_v38 = vld [vmem:[#allocation2 + $0x1b8] sm:$0xff]  ;;  %v4057_v10 = vsel %vm2775_vm8, %v4048_v36, %v4050_v22 }
 0x822   : > { %4245 = vst [vmem:[#allocation2 + $0x260] sm:$0xf] %v4228_v19  ;;  %v4381_v23 = vpack.c.bf16 %v4333_v38, %v4325_v56  ;;  %v4342_v31 = vld [vmem:[#allocation2 + $0x210] sm:$0xff] }
 0x823   : > { %4246 = vst [vmem:[#allocation2 + $0x268] sm:$0xf] %v4229_v63  ;;  %v4343_v8 = vld [vmem:[#allocation2 + $0x218] sm:$0xff] }
 0x824   : > { %4073 = vst [vmem:[#allocation2 + $0xd8] sm:$0xf] %v4056_v45  ;;  %4490 = vmatpush.bf16.msrb.mxu0 %v4381_v23 }
 0x825   : > { %4074 = vst [vmem:[#allocation2 + $0xe0] sm:$0xf] %v4057_v10 }
 0x826   : > { %v4091_v15 = vpop.permute.xlu0 %4090 }
 0x828   : > { %v4140_v24 = vpop.permute.xlu1 %4139  ;;  %v4089_v54 = vpop.permute.xlu2 %4088 }
 0x829   : > { %4165 = vst.msk [vmem:[#allocation2 + $0x1d0] sm:$0xf] %vm1079_vm5, %v4140_v24  ;;  %v4097_v49 = vsel %vm869_vm7, %v7731_v46, %v4089_v54  ;;  %v4098_v59 = vsel %vm869_vm7, %v4089_v54, %v4091_v15  ;;  %v4350_v7 = vld [vmem:[#allocation2 + $0x260] sm:$0xff] }
 0x82a   : > { %4114 = vst [vmem:[#allocation2 + $0x128] sm:$0xf] %v4097_v49  ;;  %v4351_v18 = vld [vmem:[#allocation2 + $0x268] sm:$0xff]  ;;  %v4390_v30 = vpack.c.bf16 %v4350_v7, %v4342_v31 }
 0x82b   : > { %4115 = vst [vmem:[#allocation2 + $0x130] sm:$0xf] %v4098_v59  ;;  %v4391_v13 = vpack.c.bf16 %v4351_v18, %v4343_v8  ;;  %v4311_v45 = vld [vmem:[#allocation2 + $0xd8] sm:$0xff] }
 0x82c   : > { %v4312_v51 = vld [vmem:[#allocation2 + $0xe0] sm:$0xff] }
 0x82e   : > { %v3999_v53 = vpop.permute.xlu0 %3998 }
 0x82f   : > { %v4007_v14 = vsel %vm2723_vm0, %v7733_v3, %v3999_v53 }
 0x830   : > { %4024 = vst [vmem:[#allocation2 + $0x88] sm:$0xf] %v4007_v14  ;;  %v4261_v11 = vpop.permute.xlu1 %4260  ;;  %v4044_v26 = vpop.permute.xlu2 %4043  ;;  %v4336_v60 = vld [vmem:[#allocation2 + $0x1d0] sm:$0xff] }
 0x831   : > { %v4269_v32 = vsel %vm2997_vm6, %v7727_v4, %v4261_v11  ;;  %v4270_v50 = vsel %vm2997_vm6, %v4261_v11, %v7723_v16  ;;  %v4054_v12 = vsel %vm2775_vm8, %v7674_v48, %v4044_v26  ;;  %v4055_v9 = vsel %vm2775_vm8, %v4044_v26, %v7719_v57  ;;  %v4319_v55 = vld [vmem:[#allocation2 + $0x128] sm:$0xff] }
 0x832   : > { %4286 = vst [vmem:[#allocation2 + $0x2b0] sm:$0xf] %v4269_v32  ;;  %v4384_v41 = vpack.c.bf16 %v4336_v60, %v4328_v61  ;;  %v4320_v6 = vld [vmem:[#allocation2 + $0x130] sm:$0xff]  ;;  %v4375_v38 = vpack.c.bf16 %v4319_v55, %v4311_v45 }
 0x833   : > { %4287 = vst [vmem:[#allocation2 + $0x2b8] sm:$0xf] %v4270_v50  ;;  %v4376_v4 = vpack.c.bf16 %v4320_v6, %v4312_v51 }
 0x834   : > { %4071 = vst [vmem:[#allocation2 + $0xc8] sm:$0xf] %v4054_v12  ;;  %4529 = vmatpush.bf16.msrb.mxu3 %v4384_v41 }
 0x835   : > { %4072 = vst [vmem:[#allocation2 + $0xd0] sm:$0xf] %v4055_v9 }
 0x836   : > { %v4138_v5 = vpop.permute.xlu0 %4137 }
 0x837   : > { %v4146_v16 = vsel %vm884_vm12, %v7737_v35, %v4138_v5  ;;  %v4147_v1 = vsel %vm884_vm12, %v4138_v5, %v4140_v24  ;;  %v4303_v49 = vld [vmem:[#allocation2 + $0x88] sm:$0xff] }
 0x838   : > { %4163 = vst [vmem:[#allocation2 + $0x1c0] sm:$0xf] %v4146_v16  ;;  %4530 = vmatpush.bf16.msrb.mxu3 %v4376_v4  ;;  %v3952_v48 = vpop.permute.xlu1 %3951  ;;  %v3995_v42 = vpop.permute.xlu2 %3994 }
 0x839   : > { %4164 = vst [vmem:[#allocation2 + $0x1c8] sm:$0xf] %v4147_v1  ;;  %v4005_v57 = vsel %vm2723_vm0, %v7636_v25, %v3995_v42  ;;  %v4006_v39 = vsel %vm2723_vm0, %v3995_v42, %v7733_v3  ;;  %v4358_v2 = vld [vmem:[#allocation2 + $0x2b0] sm:$0xff] }
 0x83a   : > { %v4398_v44 = vpack.c.bf16 %v4358_v2, %v4358_v2  ;;  %v4359_v0 = vld [vmem:[#allocation2 + $0x2b8] sm:$0xff]  ;;  %4022 = vst [vmem:[#allocation2 + $0x78] sm:$0xf] %v4005_v57 }
 0x83b   : > { %v4399_v58 = vpack.c.bf16 %v4359_v0, %v4359_v0  ;;  %4023 = vst [vmem:[#allocation2 + $0x80] sm:$0xf] %v4006_v39 }
 0x83c   : > { %v4425_v28 = vsel %vm969_vm11, %v4398_v44, 0  ;;  %v4310_v11 = vld [vmem:[#allocation2 + $0xd0] sm:$0xff] }
 0x83d   : > { %4501 = vmatpush.bf16.msrb.mxu1 %v4425_v28  ;;  %v4428_v52 = vsel %vm969_vm11, %v4399_v58, 0 }
 0x83e   : > { %4514 = vmatpush.bf16.msrb.mxu2 %v4428_v52  ;;  %v3950_v35 = vpop.permute.xlu0 %3949 }
 0x83f   : > { %v3958_v25 = vsel %vm2679_vm15, %v7706_v62, %v3950_v35  ;;  %v3959_v3 = vsel %vm2679_vm15, %v3950_v35, %v3952_v48  ;;  %v4334_v17 = vld [vmem:[#allocation2 + $0x1c0] sm:$0xff] }
 0x840   : > { %3975 = vst [vmem:[#allocation2 + $0x38] sm:$0xf] %v3958_v25  ;;  %v4001_v21 = vpop.permute.xlu1 %4000  ;;  %v4335_v47 = vld [vmem:[#allocation2 + $0x1c8] sm:$0xff]  ;;  %v4382_v22 = vpack.c.bf16 %v4334_v17, %v4326_v43 }
 0x841   : > { %3976 = vst [vmem:[#allocation2 + $0x40] sm:$0xf] %v3959_v3  ;;  %v4008_v34 = vsel %vm2723_vm0, %v3999_v53, %v4001_v21  ;;  %4502 = vmatpush.bf16.msrb.mxu1 %v4390_v30  ;;  %v4383_v27 = vpack.c.bf16 %v4335_v47, %v4327_v37  ;;  %v4309_v53 = vld [vmem:[#allocation2 + $0xc8] sm:$0xff]  ;;  %v4301_v50 = vld [vmem:[#allocation2 + $0x78] sm:$0xff] }
 0x842   : > { %4025 = vst [vmem:[#allocation2 + $0x90] sm:$0xf] %v4008_v34  ;;  %4515 = vmatpush.bf16.msrb.mxu2 %v4391_v13  ;;  %v4302_v61 = vld [vmem:[#allocation2 + $0x80] sm:$0xff] }
 0x844   : > { %v4442_v40 = vpop.f32.mrf.mxu0 }
 0x845   : > { %4503 = vmatpush.bf16.msrb.mxu1 %v4382_v22 }
 0x846   : > { %4516 = vmatpush.bf16.msrb.mxu2 %v4383_v27  ;;  %v4085_v36 = vpop.permute.xlu0 %4084 }
 0x847   : > { %v4095_v19 = vsel %vm869_vm7, %v7682_v20, %v4085_v36  ;;  %v4096_v63 = vsel %vm869_vm7, %v4085_v36, %v7731_v46  ;;  %v4295_v54 = vld [vmem:[#allocation2 + $0x38] sm:$0xff] }
 0x848   : > { %4112 = vst [vmem:[#allocation2 + $0x118] sm:$0xf] %v4095_v19  ;;  %v3946_v56 = vpop.permute.xlu1 %3945  ;;  %v4296_v15 = vld [vmem:[#allocation2 + $0x40] sm:$0xff]  ;;  %v4367_v46 = vpack.c.bf16 %v4303_v49, %v4295_v54 }
 0x849   : > { %4113 = vst [vmem:[#allocation2 + $0x120] sm:$0xf] %v4096_v63  ;;  %v3956_v10 = vsel %vm2679_vm15, %v7685_v33, %v3946_v56  ;;  %v3957_v23 = vsel %vm2679_vm15, %v3946_v56, %v7706_v62  ;;  %v4304_v24 = vld [vmem:[#allocation2 + $0x90] sm:$0xff] }
 0x84a   : > { %3973 = vst [vmem:[#allocation2 + $0x28] sm:$0xf] %v3956_v10  ;;  %4517 = vmatpush.bf16.msrb.mxu2 %v4375_v38  ;;  %v4368_v20 = vpack.c.bf16 %v4304_v24, %v4296_v15 }
 0x84b   : > { %3974 = vst [vmem:[#allocation2 + $0x30] sm:$0xf] %v3957_v23 }
 0x84c   : > { %4531 = vmatpush.bf16.msrb.mxu3 %v4368_v20  ;;  %v4444_v59 = vpop.f32.mrf.mxu0 }
 0x84e   : > { %4518 = vmatpush.bf16.msrb.mxu2 %v4367_v46  ;;  %v4404_v41 = vpop.permute.xlu0 %4403 }
 0x84f   : > { %5344 = vmatmul.msk.bf16.vlgmr.msrb.gmra.mxu3 %vm965_vm2, %v7647_v29  ;;  %v4317_v33 = vld [vmem:[#allocation2 + $0x118] sm:$0xff]  ;;  %v4443_v51 = vadd.f32 %v4442_v40, %v4404_v41 }
 0x850   : > { %v4373_v14 = vpack.c.bf16 %v4317_v33, %v4309_v53  ;;  %v4318_v62 = vld [vmem:[#allocation2 + $0x120] sm:$0xff] }
 0x851   : > { %5343 = vmatmul.msk.bf16.vlgmr.msrb.gmra.mxu2 %vm965_vm2, %v7647_v29  ;;  %v4374_v26 = vpack.c.bf16 %v4318_v62, %v4310_v11  ;;  %v4293_v60 = vld [vmem:[#allocation2 + $0x28] sm:$0xff]  ;;  %v4537_v16 = vmax.f32 %v4443_v51, 0.0 }
 0x852   : > { %4491 = vmatpush.bf16.msrb.mxu0 %v4373_v14  ;;  %v4294_v32 = vld [vmem:[#allocation2 + $0x30] sm:$0xff]  ;;  %v4365_v12 = vpack.c.bf16 %v4301_v50, %v4293_v60 }
 0x853   : > { %4504 = vmatpush.bf16.msrb.mxu1 %v4374_v26  ;;  %v4366_v9 = vpack.c.bf16 %v4302_v61, %v4294_v32 }
 0x856   : > { %4492 = vmatpush.bf16.msrb.mxu0 %v4365_v12 }
 0x857   : > { %4505 = vmatpush.bf16.msrb.mxu1 %v4366_v9 }
 0x859   : > { %5341 = vmatmul.msk.bf16.vlgmr.msrb.gmra.mxu0 %vm965_vm2, %v7647_v29 }
 0x85a   : > { %5342 = vmatmul.msk.bf16.vlgmr.msrb.gmra.mxu1 %vm965_vm2, %v7647_v29 }
 0x865   : > { %v4455_v6 = vpop.f32.mrf.mxu1 }
 0x866   : > { %v4456_v5 = vadd.f32 %v4455_v6, %v4404_v41 }
 0x868   : > { %v4538_v4 = vmax.f32 %v4456_v5, 0.0 }
 0x86a   : > { %v4553_v1 = vrot.slane %v4538_v4, 4 }
 0x86c   : > { %v4557_v48 = vsel %vm969_vm11, %v4537_v16, %v4553_v1 }
 0x86d   : > { %4565 = vst [vmem:[%s7800_s0] sm:$0xff] %v4557_v48  ;;  %v4457_v42 = vpop.f32.mrf.mxu1 }
 0x88b   : > { %v4468_v57 = vpop.f32.mrf.mxu2 }
 0x88c   : > { %v4469_v2 = vadd.f32 %v4468_v57, %v4404_v41 }
 0x88e   : > { %v4539_v58 = vmax.f32 %v4469_v2, 0.0 }
 0x893   : > { %v4470_v29 = vpop.f32.mrf.mxu2 }
 0x89d   : > { %v4481_v39 = vpop.f32.mrf.mxu3 }
 0x89e   : > { %v4482_v44 = vadd.f32 %v4481_v39, %v4404_v41 }
 0x8a0   : > { %v4540_v0 = vmax.f32 %v4482_v44, 0.0 }
 0x8a2   : > { %v4554_v28 = vrot.slane %v4540_v0, 4 }
 0x8a4   : > { %v4558_v7 = vsel %vm969_vm11, %v4539_v58, %v4554_v28 }
 0x8a5   : > { %4566 = vst [vmem:[%s7800_s0 + $0x8] sm:$0xff] %v4558_v7  ;;  %v4483_v52 = vpop.f32.mrf.mxu3 }
 0x8d2   : > { %v4533_v18 = vpop.f32.mrf.mxu3 }
 0x8d3   : > { %v4534_v35 = vadd.f32 %v4533_v18, %v4404_v41 }
 0x8d4   : > { %v4520_v31 = vpop.f32.mrf.mxu2 }
 0x8d5   : > { %v4544_v25 = vmax.f32 %v4534_v35, 0.0  ;;  %v4521_v3 = vadd.f32 %v4520_v31, %v4404_v41 }
 0x8d6   : > { %v4494_v30 = vpop.f32.mrf.mxu0 }
 0x8d7   : > { %v4556_v8 = vrot.slane %v4544_v25, 4  ;;  %v4543_v21 = vmax.f32 %v4521_v3, 0.0  ;;  %v4507_v13 = vpop.f32.mrf.mxu1  ;;  %v4495_v17 = vadd.f32 %v4494_v30, %v4404_v41 }
 0x8d8   : > { %v4508_v34 = vadd.f32 %v4507_v13, %v4404_v41 }
 0x8d9   : > { %v4560_v47 = vsel %vm969_vm11, %v4543_v21, %v4556_v8  ;;  %v4541_v37 = vmax.f32 %v4495_v17, 0.0 }
 0x8da   : > { %4568 = vst [vmem:[%s7800_s0 + $0x18] sm:$0xff] %v4560_v47  ;;  %v4542_v43 = vmax.f32 %v4508_v34, 0.0  ;;  %v4535_v22 = vpop.f32.mrf.mxu3 }
 0x8dc   : > { %v4555_v27 = vrot.slane %v4542_v43, 4  ;;  %v4522_v40 = vpop.f32.mrf.mxu2 }
 0x8de   : > { %v4559_v55 = vsel %vm969_vm11, %v4541_v37, %v4555_v27  ;;  %v4496_v36 = vpop.f32.mrf.mxu0 }
 0x8df   : > { %4567 = vst [vmem:[%s7800_s0 + $0x10] sm:$0xff] %v4559_v55  ;;  %v4509_v19 = vpop.f32.mrf.mxu1 }
 0x8e0 PF: > { %s27_s21 = sadd.s32 1, %s5524_s21  }
 0x8e1   : > { %p24_p4 = scmp.ge.s32.totalorder %s27_s21, 4  }
 0x8e3   :  { %26 = sbr.rel (!%p24_p4) target bundleno = 2 (0x2), region = 151 }

</bundles_post_ra>
